<compile_context>
chip_gen: v7x
topology: tpu7x:2x2x1
jax: 0.10.0
libtpu: 0.0.40
codegen_flags: <defaults>
</compile_context>

<pallas_src>
import functools
import math

import jax
import jax.numpy as jnp
from jax.experimental import pallas as pl
from jax.experimental.pallas import tpu as pltpu

D_HIDDEN = 32          # encoder_layer._dim_hidden
N_HEADS = 4
D_HEAD = D_HIDDEN // N_HEADS
D_FF = 64
N_LAYERS = 3
LN_EPS = 1e-5

# ----------------------- packed parameter slab layout ------------------------
# One f32 slab of shape (num_layers * _SLAB_ROWS, _SLAB_W); each layer's
# parameters occupy a contiguous row range, sliced in-kernel at static offsets.
_SLAB_W = 3 * D_HIDDEN   # 96 lanes (widest segment: fused Wq|Wk|Wv)
_SLAB_SEGS = [
    # name   rows        cols
    ("wqkv", D_HIDDEN,     3 * D_HIDDEN),
    ("wo",   D_HIDDEN,     D_HIDDEN),
    ("w1",   D_HIDDEN,     D_FF),
    ("w2",   D_FF,         D_HIDDEN),
    ("bqkv", 1,            3 * D_HIDDEN),
    ("bo",   1,            D_HIDDEN),
    ("g1",   1,            D_HIDDEN),
    ("be1",  1,            D_HIDDEN),
    ("b1",   1,            D_FF),
    ("b2",   1,            D_HIDDEN),
    ("g2",   1,            D_HIDDEN),
    ("be2",  1,            D_HIDDEN),
]
_SLAB_OFF = {}
_r = 0
for _name, _rows, _cols in _SLAB_SEGS:
    _SLAB_OFF[_name] = (_r, _rows, _cols)
    _r += _rows
_SLAB_ROWS = _r          # 168 rows per layer


# ----------------------------- in-kernel helpers -----------------------------
def _ln(v, gamma_b, beta_b):
    """LayerNorm over the feature (lane) axis; gamma/beta pre-broadcast."""
    mu = jnp.mean(v, axis=-1, keepdims=True)
    var = jnp.mean((v - mu) ** 2, axis=-1, keepdims=True)
    return (v - mu) * jax.lax.rsqrt(var + LN_EPS) * gamma_b + beta_b


def _decoder_kernel(q_ref, c_ref, p_ref, o_ref, *, num_layers, b, lq, lk):
    """All layers for the whole batch, fused into one kernel invocation.

    Layout: activations are sample-major (batch*position on sublanes, D=32 on
    lanes).  No transposes anywhere; heads are 8-lane column blocks.
    """
    D, dh, H = D_HIDDEN, D_HEAD, N_HEADS
    nq, nk = b * lq, b * lk
    scale = 1.0 / math.sqrt(dh)

    x = q_ref[...].reshape(nq, D)        # (nq, D)  batches stacked on sublanes
    ctx = c_ref[...].reshape(nk, D)      # (nk, D)

    def attention(q, k, v, lk_):
        # q: (nq, D); k, v: (b*lk_, D).  Per-(head, batch) score blocks are
        # stacked along sublanes so the softmax elementwise work runs once.
        s_blocks = []
        for h in range(H):                                  # static unroll (4)
            hc = slice(h * dh, (h + 1) * dh)
            qh, kh = q[:, hc], k[:, hc]
            for bi in range(b):                             # static unroll (B)
                qr = slice(bi * lq, (bi + 1) * lq)
                kr = slice(bi * lk_, (bi + 1) * lk_)
                # (lq, lk_) = Q_h K_h^T  (contract feature axes, no transpose)
                s_blocks.append(jax.lax.dot_general(
                    qh[qr], kh[kr], (((1,), (1,)), ((), ())),
                    preferred_element_type=jnp.float32) * scale)
        s_all = jnp.concatenate(s_blocks, axis=0)           # (H*b*lq, lk_)
        s_all = s_all - jnp.max(s_all, axis=-1, keepdims=True)
        p_all = jnp.exp(s_all)
        p_all = p_all * pl.reciprocal(
            jnp.sum(p_all, axis=-1, keepdims=True), approx=False)

        head_outs = []
        for h in range(H):
            hc = slice(h * dh, (h + 1) * dh)
            vh = v[:, hc]
            rows = []
            for bi in range(b):
                kr = slice(bi * lk_, (bi + 1) * lk_)
                idx = h * b + bi
                p_blk = p_all[idx * lq:(idx + 1) * lq]      # (lq, lk_)
                rows.append(jnp.dot(p_blk, vh[kr],
                                    preferred_element_type=jnp.float32))
            head_outs.append(jnp.concatenate(rows, axis=0))  # (nq, dh)
        return jnp.concatenate(head_outs, axis=1)             # (nq, D)

    def run_layer(li, x_in, ctx_in, lk_, fused_qkv):
        base = li * _SLAB_ROWS

        def seg(name):
            off, rows, cols = _SLAB_OFF[name]
            return p_ref[base + off: base + off + rows, 0:cols]

        wqkv, wo, w1, w2 = seg("wqkv"), seg("wo"), seg("w1"), seg("w2")
        bqkv = seg("bqkv")                                   # (1, 3D)
        # Hoisted broadcasts (once per layer; JAX does not CSE broadcast_in_dim).
        bo = jnp.broadcast_to(seg("bo"), (nq, D))
        g1 = jnp.broadcast_to(seg("g1"), (nq, D))
        be1 = jnp.broadcast_to(seg("be1"), (nq, D))
        b1 = jnp.broadcast_to(seg("b1"), (nq, D_FF))
        b2 = jnp.broadcast_to(seg("b2"), (nq, D))
        g2 = jnp.broadcast_to(seg("g2"), (nq, D))
        be2 = jnp.broadcast_to(seg("be2"), (nq, D))

        if fused_qkv:    # self-attention: one fused QKV matmul
            qkv = (jnp.dot(x_in, wqkv, preferred_element_type=jnp.float32)
                   + jnp.broadcast_to(bqkv, (nq, 3 * D)))
            q, k, v = qkv[:, :D], qkv[:, D:2 * D], qkv[:, 2 * D:]
        else:            # cross-attention: Q from x, fused K|V from context
            q = (jnp.dot(x_in, wqkv[:, :D], preferred_element_type=jnp.float32)
                 + jnp.broadcast_to(bqkv[:, :D], (nq, D)))
            kv = (jnp.dot(ctx_in, wqkv[:, D:], preferred_element_type=jnp.float32)
                  + jnp.broadcast_to(bqkv[:, D:], (nk, 2 * D)))
            k, v = kv[:, :D], kv[:, D:]

        a = attention(q, k, v, lk_)
        a = jnp.dot(a, wo, preferred_element_type=jnp.float32) + bo
        h1 = _ln(x_in + a, g1, be1)
        f = jnp.maximum(
            jnp.dot(h1, w1, preferred_element_type=jnp.float32) + b1, 0.0)
        f = jnp.dot(f, w2, preferred_element_type=jnp.float32) + b2
        return _ln(h1 + f, g2, be2)

    # Layer 0: cross-attention over ctx; later layers: self-attention.
    y = run_layer(0, x, ctx, lk, fused_qkv=False)
    for li in range(1, num_layers):
        y = run_layer(li, y, y, lq, fused_qkv=True)

    # Lane-dense store: last dim D=32 on lanes.
    o_ref[...] = y.reshape(b, lq, D).astype(o_ref.dtype)


# ------------------------------- JAX wrapper ---------------------------------
def _pack_layer(p):
    (wq, bq, wk, bk, wv, bv, wo, bo,
     g1, be1, w1, b1, w2, b2, g2, be2) = p

    def padw(m):
        return jnp.pad(m, ((0, 0), (0, _SLAB_W - m.shape[1])))

    segs = [
        jnp.concatenate([wq, wk, wv], axis=1),     # (D, 3D) fused QKV weight
        padw(wo), padw(w1), padw(w2),
        jnp.concatenate([bq, bk, bv], axis=1),     # (1, 3D) fused QKV bias
        padw(bo), padw(g1), padw(be1), padw(b1), padw(b2), padw(g2), padw(be2),
    ]
    return jnp.concatenate(segs, axis=0).astype(jnp.float32)


def _pack_params(params_list):
    return jnp.concatenate([_pack_layer(p) for p in params_list], axis=0)


def decoder_forward(query, context, params_list):
    """query: (B, Lq, D), context: (B, Lk, D) -> (B, Lq, D).

    params_list: one 16-tuple of parameters per layer (PyTorch orientation:
    y = x @ W + b), matching Decoder's independent per-layer modules.
    """
    B, Lq, D = query.shape
    Lk = context.shape[1]
    num_layers = len(params_list)
    slab = _pack_params(params_list)               # (num_layers*168, 96)

    kernel = functools.partial(_decoder_kernel, num_layers=num_layers,
                               b=B, lq=Lq, lk=Lk)

    return pl.pallas_call(
        kernel,
        out_shape=jax.ShapeDtypeStruct((B, Lq, D), query.dtype),
        grid_spec=pltpu.PrefetchScalarGridSpec(
            num_scalar_prefetch=0,
            grid=(1,),                             # single step: whole batch
            in_specs=[
                pl.BlockSpec((B, Lq, D), lambda i: (0, 0, 0)),
                pl.BlockSpec((B, Lk, D), lambda i: (0, 0, 0)),
                pl.BlockSpec(slab.shape, lambda i: (0, 0)),   # one param DMA
            ],
            out_specs=pl.BlockSpec((B, Lq, D), lambda i: (0, 0, 0)),
        ),
        compiler_params=pltpu.CompilerParams(
            dimension_semantics=("arbitrary",)),
    )(query, context, slab)


# -------------------------- pure-JAX reference --------------------------------
def _ref_layer_norm(v, gamma, beta, eps=LN_EPS):
    mu = jnp.mean(v, axis=-1, keepdims=True)
    var = jnp.mean((v - mu) ** 2, axis=-1, keepdims=True)
    return (v - mu) * jax.lax.rsqrt(var + eps) * gamma + beta


def _ref_layer(x, ctx, params):
    (wq, bq, wk, bk, wv, bv, wo, bo,
     g1, be1, w1, b1, w2, b2, g2, be2) = params
    B, Lq, D = x.shape
    Lk = ctx.shape[1]
    q = x @ wq + bq
    k = ctx @ wk + bk
    v = ctx @ wv + bv
    qh = q.reshape(B, Lq, N_HEADS, D_HEAD)
    kh = k.reshape(B, Lk, N_HEADS, D_HEAD)
    vh = v.reshape(B, Lk, N_HEADS, D_HEAD)
    s = jnp.einsum('bqhd,bkhd->bhqk', qh, kh) / math.sqrt(D_HEAD)
    p = jax.nn.softmax(s, axis=-1)
    a = jnp.einsum('bhqk,bkhd->bqhd', p, vh).reshape(B, Lq, D)
    a = a @ wo + bo
    h1 = _ref_layer_norm(x + a, g1, be1)
    f = jnp.maximum(h1 @ w1 + b1, 0.0) @ w2 + b2
    return _ref_layer_norm(h1 + f, g2, be2)


def _ref_decoder(query, context, params_list):
    x = _ref_layer(query, context, params_list[0])
    for p in params_list[1:]:
        x = _ref_layer(x, x, p)
    return x


# --------------------------------- main ---------------------------------------
if __name__ == "__main__":
    B, Lq, Lk = 2, 8, 16

    def make_layer_params(k):
        ks = jax.random.split(k, 16)
        init = lambda kk, s: (0.05 * jax.random.normal(kk, s)).astype(jnp.float32)
        return (
            init(ks[0], (D_HIDDEN, D_HIDDEN)), init(ks[1], (1, D_HIDDEN)),    # Wq, bq
            init(ks[2], (D_HIDDEN, D_HIDDEN)), init(ks[3], (1, D_HIDDEN)),    # Wk, bk
            init(ks[4], (D_HIDDEN, D_HIDDEN)), init(ks[5], (1, D_HIDDEN)),    # Wv, bv
            init(ks[6], (D_HIDDEN, D_HIDDEN)), init(ks[7], (1, D_HIDDEN)),    # Wo, bo
            1.0 + init(ks[8], (1, D_HIDDEN)), init(ks[9], (1, D_HIDDEN)),     # LN1 g,b
            init(ks[10], (D_HIDDEN, D_FF)), init(ks[11], (1, D_FF)),          # W1, b1
            init(ks[12], (D_FF, D_HIDDEN)), init(ks[13], (1, D_HIDDEN)),      # W2, b2
            1.0 + init(ks[14], (1, D_HIDDEN)), init(ks[15], (1, D_HIDDEN)),   # LN2 g,b
        )

    key = jax.random.PRNGKey(0)
    keys = jax.random.split(key, N_LAYERS + 2)
    params_list = [make_layer_params(keys[i]) for i in range(N_LAYERS)]
    query = jax.random.normal(keys[N_LAYERS], (B, Lq, D_HIDDEN), jnp.float32)
    context = jax.random.normal(keys[N_LAYERS + 1], (B, Lk, D_HIDDEN), jnp.float32)

    out = jax.block_until_ready(decoder_forward(query, context, params_list))

    ref = _ref_decoder(query, context, params_list)
    assert out.shape == (B, Lq, D_HIDDEN), out.shape
    max_err = float(jnp.max(jnp.abs(out - ref)))
    assert jnp.allclose(out, ref, atol=1e-4, rtol=1e-4), max_err

    print("KERNEL_OK")
</pallas_src>

<mosaic_0001>
module attributes {stable_mosaic.version = 11 : i64} {
  func.func @_decoder_kernel(%arg0: i32, %arg1: memref<2x8x32xf32, #tpu.memory_space<vmem>>, %arg2: memref<2x16x32xf32, #tpu.memory_space<vmem>>, %arg3: memref<504x96xf32, #tpu.memory_space<vmem>>, %arg4: memref<2x8x32xf32, #tpu.memory_space<vmem>>) attributes {dimension_semantics = [#tpu.dimension_semantics<arbitrary>], iteration_bounds = array<i64: 1>, scalar_prefetch = 0 : i64, scratch_operands = 0 : i64, tpu.core_type = #tpu.core_type<tc>, window_params = [{pipeline_mode = #tpu.pipeline_mode<synchronous>, transform_indices = @transform_0, window_bounds = array<i64: 2, 8, 32>}, {pipeline_mode = #tpu.pipeline_mode<synchronous>, transform_indices = @transform_1, window_bounds = array<i64: 2, 16, 32>}, {pipeline_mode = #tpu.pipeline_mode<synchronous>, transform_indices = @transform_2, window_bounds = array<i64: 504, 96>}, {pipeline_mode = #tpu.pipeline_mode<synchronous>, transform_indices = @transform_3, window_bounds = array<i64: 2, 8, 32>}]} {
    %c0 = arith.constant 0 : index
    %c0_0 = arith.constant 0 : index
    %c0_1 = arith.constant 0 : index
    %0 = vector.load %arg1[%c0, %c0_0, %c0_1] : memref<2x8x32xf32, #tpu.memory_space<vmem>>, vector<2x8x32xf32>
    %1 = vector.shape_cast %0 : vector<2x8x32xf32> to vector<16x32xf32>
    %c0_2 = arith.constant 0 : index
    %c0_3 = arith.constant 0 : index
    %c0_4 = arith.constant 0 : index
    %2 = vector.load %arg2[%c0_2, %c0_3, %c0_4] : memref<2x16x32xf32, #tpu.memory_space<vmem>>, vector<2x16x32xf32>
    %3 = vector.shape_cast %2 : vector<2x16x32xf32> to vector<32x32xf32>
    %c0_5 = arith.constant 0 : index
    %c0_6 = arith.constant 0 : index
    %4 = vector.load %arg3[%c0_5, %c0_6] : memref<504x96xf32, #tpu.memory_space<vmem>>, vector<32x96xf32>
    %c32 = arith.constant 32 : index
    %c0_7 = arith.constant 0 : index
    %5 = vector.load %arg3[%c32, %c0_7] : memref<504x96xf32, #tpu.memory_space<vmem>>, vector<32x32xf32>
    %c64 = arith.constant 64 : index
    %c0_8 = arith.constant 0 : index
    %6 = vector.load %arg3[%c64, %c0_8] : memref<504x96xf32, #tpu.memory_space<vmem>>, vector<32x64xf32>
    %c96 = arith.constant 96 : index
    %c0_9 = arith.constant 0 : index
    %7 = vector.load %arg3[%c96, %c0_9] : memref<504x96xf32, #tpu.memory_space<vmem>>, vector<64x32xf32>
    %c160 = arith.constant 160 : index
    %c0_10 = arith.constant 0 : index
    %8 = vector.load %arg3[%c160, %c0_10] : memref<504x96xf32, #tpu.memory_space<vmem>>, vector<1x96xf32>
    %c161 = arith.constant 161 : index
    %c0_11 = arith.constant 0 : index
    %9 = vector.load %arg3[%c161, %c0_11] : memref<504x96xf32, #tpu.memory_space<vmem>>, vector<1x32xf32>
    %10 = vector.shape_cast %9 : vector<1x32xf32> to vector<1x32xf32>
    %11 = vector.broadcast %10 : vector<1x32xf32> to vector<16x32xf32>
    %c162 = arith.constant 162 : index
    %c0_12 = arith.constant 0 : index
    %12 = vector.load %arg3[%c162, %c0_12] : memref<504x96xf32, #tpu.memory_space<vmem>>, vector<1x32xf32>
    %13 = vector.shape_cast %12 : vector<1x32xf32> to vector<1x32xf32>
    %14 = vector.broadcast %13 : vector<1x32xf32> to vector<16x32xf32>
    %c163 = arith.constant 163 : index
    %c0_13 = arith.constant 0 : index
    %15 = vector.load %arg3[%c163, %c0_13] : memref<504x96xf32, #tpu.memory_space<vmem>>, vector<1x32xf32>
    %16 = vector.shape_cast %15 : vector<1x32xf32> to vector<1x32xf32>
    %17 = vector.broadcast %16 : vector<1x32xf32> to vector<16x32xf32>
    %c164 = arith.constant 164 : index
    %c0_14 = arith.constant 0 : index
    %18 = vector.load %arg3[%c164, %c0_14] : memref<504x96xf32, #tpu.memory_space<vmem>>, vector<1x64xf32>
    %19 = vector.shape_cast %18 : vector<1x64xf32> to vector<1x64xf32>
    %20 = vector.broadcast %19 : vector<1x64xf32> to vector<16x64xf32>
    %c165 = arith.constant 165 : index
    %c0_15 = arith.constant 0 : index
    %21 = vector.load %arg3[%c165, %c0_15] : memref<504x96xf32, #tpu.memory_space<vmem>>, vector<1x32xf32>
    %22 = vector.shape_cast %21 : vector<1x32xf32> to vector<1x32xf32>
    %23 = vector.broadcast %22 : vector<1x32xf32> to vector<16x32xf32>
    %c166 = arith.constant 166 : index
    %c0_16 = arith.constant 0 : index
    %24 = vector.load %arg3[%c166, %c0_16] : memref<504x96xf32, #tpu.memory_space<vmem>>, vector<1x32xf32>
    %25 = vector.shape_cast %24 : vector<1x32xf32> to vector<1x32xf32>
    %26 = vector.broadcast %25 : vector<1x32xf32> to vector<16x32xf32>
    %c167 = arith.constant 167 : index
    %c0_17 = arith.constant 0 : index
    %27 = vector.load %arg3[%c167, %c0_17] : memref<504x96xf32, #tpu.memory_space<vmem>>, vector<1x32xf32>
    %28 = vector.shape_cast %27 : vector<1x32xf32> to vector<1x32xf32>
    %29 = vector.broadcast %28 : vector<1x32xf32> to vector<16x32xf32>
    %30 = vector.extract_strided_slice %4 {offsets = [0, 0], sizes = [32, 32], strides = [1, 1]} : vector<32x96xf32> to vector<32x32xf32>
    %cst = arith.constant dense<0.000000e+00> : vector<16x32xf32>
    %31 = tpu.matmul %1, %30, %cst {dimension_numbers = #tpu.dot_dimension_numbers<[1], [0], [0], [1], [0, 0, 1, 1], [], []>} : vector<16x32xf32>, vector<32x32xf32>, vector<16x32xf32> -> vector<16x32xf32>
    %32 = vector.extract_strided_slice %8 {offsets = [0, 0], sizes = [1, 32], strides = [1, 1]} : vector<1x96xf32> to vector<1x32xf32>
    %33 = vector.shape_cast %32 : vector<1x32xf32> to vector<1x32xf32>
    %34 = vector.broadcast %33 : vector<1x32xf32> to vector<16x32xf32>
    %35 = arith.addf %31, %34 : vector<16x32xf32>
    %36 = vector.extract_strided_slice %4 {offsets = [0, 32], sizes = [32, 64], strides = [1, 1]} : vector<32x96xf32> to vector<32x64xf32>
    %cst_18 = arith.constant dense<0.000000e+00> : vector<32x64xf32>
    %37 = tpu.matmul %3, %36, %cst_18 {dimension_numbers = #tpu.dot_dimension_numbers<[1], [0], [0], [1], [0, 0, 1, 1], [], []>} : vector<32x32xf32>, vector<32x64xf32>, vector<32x64xf32> -> vector<32x64xf32>
    %38 = vector.extract_strided_slice %8 {offsets = [0, 32], sizes = [1, 64], strides = [1, 1]} : vector<1x96xf32> to vector<1x64xf32>
    %39 = vector.shape_cast %38 : vector<1x64xf32> to vector<1x64xf32>
    %40 = vector.broadcast %39 : vector<1x64xf32> to vector<32x64xf32>
    %41 = arith.addf %37, %40 : vector<32x64xf32>
    %42 = vector.extract_strided_slice %41 {offsets = [0, 0], sizes = [32, 32], strides = [1, 1]} : vector<32x64xf32> to vector<32x32xf32>
    %43 = vector.extract_strided_slice %41 {offsets = [0, 32], sizes = [32, 32], strides = [1, 1]} : vector<32x64xf32> to vector<32x32xf32>
    %44 = vector.extract_strided_slice %35 {offsets = [0, 0], sizes = [16, 8], strides = [1, 1]} : vector<16x32xf32> to vector<16x8xf32>
    %45 = vector.extract_strided_slice %42 {offsets = [0, 0], sizes = [32, 8], strides = [1, 1]} : vector<32x32xf32> to vector<32x8xf32>
    %46 = vector.extract_strided_slice %44 {offsets = [0, 0], sizes = [8, 8], strides = [1, 1]} : vector<16x8xf32> to vector<8x8xf32>
    %47 = vector.extract_strided_slice %45 {offsets = [0, 0], sizes = [16, 8], strides = [1, 1]} : vector<32x8xf32> to vector<16x8xf32>
    %cst_19 = arith.constant dense<0.000000e+00> : vector<8x16xf32>
    %48 = tpu.matmul %46, %47, %cst_19 {dimension_numbers = #tpu.dot_dimension_numbers<[1], [1], [0], [0], [0, 0, 1, 0], [], []>} : vector<8x8xf32>, vector<16x8xf32>, vector<8x16xf32> -> vector<8x16xf32>
    %cst_20 = arith.constant 0.353553385 : f32
    %49 = vector.broadcast %cst_20 : f32 to vector<8x16xf32>
    %50 = arith.mulf %48, %49 : vector<8x16xf32>
    %51 = vector.extract_strided_slice %44 {offsets = [8, 0], sizes = [8, 8], strides = [1, 1]} : vector<16x8xf32> to vector<8x8xf32>
    %52 = vector.extract_strided_slice %45 {offsets = [16, 0], sizes = [16, 8], strides = [1, 1]} : vector<32x8xf32> to vector<16x8xf32>
    %cst_21 = arith.constant dense<0.000000e+00> : vector<8x16xf32>
    %53 = tpu.matmul %51, %52, %cst_21 {dimension_numbers = #tpu.dot_dimension_numbers<[1], [1], [0], [0], [0, 0, 1, 0], [], []>} : vector<8x8xf32>, vector<16x8xf32>, vector<8x16xf32> -> vector<8x16xf32>
    %cst_22 = arith.constant 0.353553385 : f32
    %54 = vector.broadcast %cst_22 : f32 to vector<8x16xf32>
    %55 = arith.mulf %53, %54 : vector<8x16xf32>
    %56 = vector.extract_strided_slice %35 {offsets = [0, 8], sizes = [16, 8], strides = [1, 1]} : vector<16x32xf32> to vector<16x8xf32>
    %57 = vector.extract_strided_slice %42 {offsets = [0, 8], sizes = [32, 8], strides = [1, 1]} : vector<32x32xf32> to vector<32x8xf32>
    %58 = vector.extract_strided_slice %56 {offsets = [0, 0], sizes = [8, 8], strides = [1, 1]} : vector<16x8xf32> to vector<8x8xf32>
    %59 = vector.extract_strided_slice %57 {offsets = [0, 0], sizes = [16, 8], strides = [1, 1]} : vector<32x8xf32> to vector<16x8xf32>
    %cst_23 = arith.constant dense<0.000000e+00> : vector<8x16xf32>
    %60 = tpu.matmul %58, %59, %cst_23 {dimension_numbers = #tpu.dot_dimension_numbers<[1], [1], [0], [0], [0, 0, 1, 0], [], []>} : vector<8x8xf32>, vector<16x8xf32>, vector<8x16xf32> -> vector<8x16xf32>
    %cst_24 = arith.constant 0.353553385 : f32
    %61 = vector.broadcast %cst_24 : f32 to vector<8x16xf32>
    %62 = arith.mulf %60, %61 : vector<8x16xf32>
    %63 = vector.extract_strided_slice %56 {offsets = [8, 0], sizes = [8, 8], strides = [1, 1]} : vector<16x8xf32> to vector<8x8xf32>
    %64 = vector.extract_strided_slice %57 {offsets = [16, 0], sizes = [16, 8], strides = [1, 1]} : vector<32x8xf32> to vector<16x8xf32>
    %cst_25 = arith.constant dense<0.000000e+00> : vector<8x16xf32>
    %65 = tpu.matmul %63, %64, %cst_25 {dimension_numbers = #tpu.dot_dimension_numbers<[1], [1], [0], [0], [0, 0, 1, 0], [], []>} : vector<8x8xf32>, vector<16x8xf32>, vector<8x16xf32> -> vector<8x16xf32>
    %cst_26 = arith.constant 0.353553385 : f32
    %66 = vector.broadcast %cst_26 : f32 to vector<8x16xf32>
    %67 = arith.mulf %65, %66 : vector<8x16xf32>
    %68 = vector.extract_strided_slice %35 {offsets = [0, 16], sizes = [16, 8], strides = [1, 1]} : vector<16x32xf32> to vector<16x8xf32>
    %69 = vector.extract_strided_slice %42 {offsets = [0, 16], sizes = [32, 8], strides = [1, 1]} : vector<32x32xf32> to vector<32x8xf32>
    %70 = vector.extract_strided_slice %68 {offsets = [0, 0], sizes = [8, 8], strides = [1, 1]} : vector<16x8xf32> to vector<8x8xf32>
    %71 = vector.extract_strided_slice %69 {offsets = [0, 0], sizes = [16, 8], strides = [1, 1]} : vector<32x8xf32> to vector<16x8xf32>
    %cst_27 = arith.constant dense<0.000000e+00> : vector<8x16xf32>
    %72 = tpu.matmul %70, %71, %cst_27 {dimension_numbers = #tpu.dot_dimension_numbers<[1], [1], [0], [0], [0, 0, 1, 0], [], []>} : vector<8x8xf32>, vector<16x8xf32>, vector<8x16xf32> -> vector<8x16xf32>
    %cst_28 = arith.constant 0.353553385 : f32
    %73 = vector.broadcast %cst_28 : f32 to vector<8x16xf32>
    %74 = arith.mulf %72, %73 : vector<8x16xf32>
    %75 = vector.extract_strided_slice %68 {offsets = [8, 0], sizes = [8, 8], strides = [1, 1]} : vector<16x8xf32> to vector<8x8xf32>
    %76 = vector.extract_strided_slice %69 {offsets = [16, 0], sizes = [16, 8], strides = [1, 1]} : vector<32x8xf32> to vector<16x8xf32>
    %cst_29 = arith.constant dense<0.000000e+00> : vector<8x16xf32>
    %77 = tpu.matmul %75, %76, %cst_29 {dimension_numbers = #tpu.dot_dimension_numbers<[1], [1], [0], [0], [0, 0, 1, 0], [], []>} : vector<8x8xf32>, vector<16x8xf32>, vector<8x16xf32> -> vector<8x16xf32>
    %cst_30 = arith.constant 0.353553385 : f32
    %78 = vector.broadcast %cst_30 : f32 to vector<8x16xf32>
    %79 = arith.mulf %77, %78 : vector<8x16xf32>
    %80 = vector.extract_strided_slice %35 {offsets = [0, 24], sizes = [16, 8], strides = [1, 1]} : vector<16x32xf32> to vector<16x8xf32>
    %81 = vector.extract_strided_slice %42 {offsets = [0, 24], sizes = [32, 8], strides = [1, 1]} : vector<32x32xf32> to vector<32x8xf32>
    %82 = vector.extract_strided_slice %80 {offsets = [0, 0], sizes = [8, 8], strides = [1, 1]} : vector<16x8xf32> to vector<8x8xf32>
    %83 = vector.extract_strided_slice %81 {offsets = [0, 0], sizes = [16, 8], strides = [1, 1]} : vector<32x8xf32> to vector<16x8xf32>
    %cst_31 = arith.constant dense<0.000000e+00> : vector<8x16xf32>
    %84 = tpu.matmul %82, %83, %cst_31 {dimension_numbers = #tpu.dot_dimension_numbers<[1], [1], [0], [0], [0, 0, 1, 0], [], []>} : vector<8x8xf32>, vector<16x8xf32>, vector<8x16xf32> -> vector<8x16xf32>
    %cst_32 = arith.constant 0.353553385 : f32
    %85 = vector.broadcast %cst_32 : f32 to vector<8x16xf32>
    %86 = arith.mulf %84, %85 : vector<8x16xf32>
    %87 = vector.extract_strided_slice %80 {offsets = [8, 0], sizes = [8, 8], strides = [1, 1]} : vector<16x8xf32> to vector<8x8xf32>
    %88 = vector.extract_strided_slice %81 {offsets = [16, 0], sizes = [16, 8], strides = [1, 1]} : vector<32x8xf32> to vector<16x8xf32>
    %cst_33 = arith.constant dense<0.000000e+00> : vector<8x16xf32>
    %89 = tpu.matmul %87, %88, %cst_33 {dimension_numbers = #tpu.dot_dimension_numbers<[1], [1], [0], [0], [0, 0, 1, 0], [], []>} : vector<8x8xf32>, vector<16x8xf32>, vector<8x16xf32> -> vector<8x16xf32>
    %cst_34 = arith.constant 0.353553385 : f32
    %90 = vector.broadcast %cst_34 : f32 to vector<8x16xf32>
    %91 = arith.mulf %89, %90 : vector<8x16xf32>
    %92 = tpu.concatenate %50, %55, %62, %67, %74, %79, %86, %91 in 0 : vector<8x16xf32>, vector<8x16xf32>, vector<8x16xf32>, vector<8x16xf32>, vector<8x16xf32>, vector<8x16xf32>, vector<8x16xf32>, vector<8x16xf32> -> vector<64x16xf32>
    %cst_35 = arith.constant dense<0xFF800000> : vector<64xf32>
    %93 = vector.multi_reduction <maximumf>, %92, %cst_35 [1] : vector<64x16xf32> to vector<64xf32>
    %94 = vector.shape_cast %93 : vector<64xf32> to vector<64x1xf32>
    %95 = vector.broadcast %94 : vector<64x1xf32> to vector<64x16xf32>
    %96 = arith.subf %92, %95 : vector<64x16xf32>
    %97 = math.exp %96 : vector<64x16xf32>
    %cst_36 = arith.constant dense<0.000000e+00> : vector<64xf32>
    %98 = vector.multi_reduction <add>, %97, %cst_36 [1] : vector<64x16xf32> to vector<64xf32>
    %99 = vector.shape_cast %98 : vector<64xf32> to vector<64x1xf32>
    %100 = tpu.reciprocal %99 : vector<64x1xf32> -> vector<64x1xf32>
    %101 = vector.broadcast %100 : vector<64x1xf32> to vector<64x16xf32>
    %102 = arith.mulf %97, %101 : vector<64x16xf32>
    %103 = vector.extract_strided_slice %43 {offsets = [0, 0], sizes = [32, 8], strides = [1, 1]} : vector<32x32xf32> to vector<32x8xf32>
    %104 = vector.extract_strided_slice %102 {offsets = [0, 0], sizes = [8, 16], strides = [1, 1]} : vector<64x16xf32> to vector<8x16xf32>
    %105 = vector.extract_strided_slice %103 {offsets = [0, 0], sizes = [16, 8], strides = [1, 1]} : vector<32x8xf32> to vector<16x8xf32>
    %cst_37 = arith.constant dense<0.000000e+00> : vector<8x8xf32>
    %106 = tpu.matmul %104, %105, %cst_37 {dimension_numbers = #tpu.dot_dimension_numbers<[1], [0], [0], [1], [0, 0, 1, 1], [], []>} : vector<8x16xf32>, vector<16x8xf32>, vector<8x8xf32> -> vector<8x8xf32>
    %107 = vector.extract_strided_slice %102 {offsets = [8, 0], sizes = [8, 16], strides = [1, 1]} : vector<64x16xf32> to vector<8x16xf32>
    %108 = vector.extract_strided_slice %103 {offsets = [16, 0], sizes = [16, 8], strides = [1, 1]} : vector<32x8xf32> to vector<16x8xf32>
    %cst_38 = arith.constant dense<0.000000e+00> : vector<8x8xf32>
    %109 = tpu.matmul %107, %108, %cst_38 {dimension_numbers = #tpu.dot_dimension_numbers<[1], [0], [0], [1], [0, 0, 1, 1], [], []>} : vector<8x16xf32>, vector<16x8xf32>, vector<8x8xf32> -> vector<8x8xf32>
    %110 = tpu.concatenate %106, %109 in 0 : vector<8x8xf32>, vector<8x8xf32> -> vector<16x8xf32>
    %111 = vector.extract_strided_slice %43 {offsets = [0, 8], sizes = [32, 8], strides = [1, 1]} : vector<32x32xf32> to vector<32x8xf32>
    %112 = vector.extract_strided_slice %102 {offsets = [16, 0], sizes = [8, 16], strides = [1, 1]} : vector<64x16xf32> to vector<8x16xf32>
    %113 = vector.extract_strided_slice %111 {offsets = [0, 0], sizes = [16, 8], strides = [1, 1]} : vector<32x8xf32> to vector<16x8xf32>
    %cst_39 = arith.constant dense<0.000000e+00> : vector<8x8xf32>
    %114 = tpu.matmul %112, %113, %cst_39 {dimension_numbers = #tpu.dot_dimension_numbers<[1], [0], [0], [1], [0, 0, 1, 1], [], []>} : vector<8x16xf32>, vector<16x8xf32>, vector<8x8xf32> -> vector<8x8xf32>
    %115 = vector.extract_strided_slice %102 {offsets = [24, 0], sizes = [8, 16], strides = [1, 1]} : vector<64x16xf32> to vector<8x16xf32>
    %116 = vector.extract_strided_slice %111 {offsets = [16, 0], sizes = [16, 8], strides = [1, 1]} : vector<32x8xf32> to vector<16x8xf32>
    %cst_40 = arith.constant dense<0.000000e+00> : vector<8x8xf32>
    %117 = tpu.matmul %115, %116, %cst_40 {dimension_numbers = #tpu.dot_dimension_numbers<[1], [0], [0], [1], [0, 0, 1, 1], [], []>} : vector<8x16xf32>, vector<16x8xf32>, vector<8x8xf32> -> vector<8x8xf32>
    %118 = tpu.concatenate %114, %117 in 0 : vector<8x8xf32>, vector<8x8xf32> -> vector<16x8xf32>
    %119 = vector.extract_strided_slice %43 {offsets = [0, 16], sizes = [32, 8], strides = [1, 1]} : vector<32x32xf32> to vector<32x8xf32>
    %120 = vector.extract_strided_slice %102 {offsets = [32, 0], sizes = [8, 16], strides = [1, 1]} : vector<64x16xf32> to vector<8x16xf32>
    %121 = vector.extract_strided_slice %119 {offsets = [0, 0], sizes = [16, 8], strides = [1, 1]} : vector<32x8xf32> to vector<16x8xf32>
    %cst_41 = arith.constant dense<0.000000e+00> : vector<8x8xf32>
    %122 = tpu.matmul %120, %121, %cst_41 {dimension_numbers = #tpu.dot_dimension_numbers<[1], [0], [0], [1], [0, 0, 1, 1], [], []>} : vector<8x16xf32>, vector<16x8xf32>, vector<8x8xf32> -> vector<8x8xf32>
    %123 = vector.extract_strided_slice %102 {offsets = [40, 0], sizes = [8, 16], strides = [1, 1]} : vector<64x16xf32> to vector<8x16xf32>
    %124 = vector.extract_strided_slice %119 {offsets = [16, 0], sizes = [16, 8], strides = [1, 1]} : vector<32x8xf32> to vector<16x8xf32>
    %cst_42 = arith.constant dense<0.000000e+00> : vector<8x8xf32>
    %125 = tpu.matmul %123, %124, %cst_42 {dimension_numbers = #tpu.dot_dimension_numbers<[1], [0], [0], [1], [0, 0, 1, 1], [], []>} : vector<8x16xf32>, vector<16x8xf32>, vector<8x8xf32> -> vector<8x8xf32>
    %126 = tpu.concatenate %122, %125 in 0 : vector<8x8xf32>, vector<8x8xf32> -> vector<16x8xf32>
    %127 = vector.extract_strided_slice %43 {offsets = [0, 24], sizes = [32, 8], strides = [1, 1]} : vector<32x32xf32> to vector<32x8xf32>
    %128 = vector.extract_strided_slice %102 {offsets = [48, 0], sizes = [8, 16], strides = [1, 1]} : vector<64x16xf32> to vector<8x16xf32>
    %129 = vector.extract_strided_slice %127 {offsets = [0, 0], sizes = [16, 8], strides = [1, 1]} : vector<32x8xf32> to vector<16x8xf32>
    %cst_43 = arith.constant dense<0.000000e+00> : vector<8x8xf32>
    %130 = tpu.matmul %128, %129, %cst_43 {dimension_numbers = #tpu.dot_dimension_numbers<[1], [0], [0], [1], [0, 0, 1, 1], [], []>} : vector<8x16xf32>, vector<16x8xf32>, vector<8x8xf32> -> vector<8x8xf32>
    %131 = vector.extract_strided_slice %102 {offsets = [56, 0], sizes = [8, 16], strides = [1, 1]} : vector<64x16xf32> to vector<8x16xf32>
    %132 = vector.extract_strided_slice %127 {offsets = [16, 0], sizes = [16, 8], strides = [1, 1]} : vector<32x8xf32> to vector<16x8xf32>
    %cst_44 = arith.constant dense<0.000000e+00> : vector<8x8xf32>
    %133 = tpu.matmul %131, %132, %cst_44 {dimension_numbers = #tpu.dot_dimension_numbers<[1], [0], [0], [1], [0, 0, 1, 1], [], []>} : vector<8x16xf32>, vector<16x8xf32>, vector<8x8xf32> -> vector<8x8xf32>
    %134 = tpu.concatenate %130, %133 in 0 : vector<8x8xf32>, vector<8x8xf32> -> vector<16x8xf32>
    %135 = tpu.concatenate %110, %118, %126, %134 in 1 : vector<16x8xf32>, vector<16x8xf32>, vector<16x8xf32>, vector<16x8xf32> -> vector<16x32xf32>
    %cst_45 = arith.constant dense<0.000000e+00> : vector<16x32xf32>
    %136 = tpu.matmul %135, %5, %cst_45 {dimension_numbers = #tpu.dot_dimension_numbers<[1], [0], [0], [1], [0, 0, 1, 1], [], []>} : vector<16x32xf32>, vector<32x32xf32>, vector<16x32xf32> -> vector<16x32xf32>
    %137 = arith.addf %136, %11 : vector<16x32xf32>
    %138 = arith.addf %1, %137 : vector<16x32xf32>
    %cst_46 = arith.constant dense<0.000000e+00> : vector<16xf32>
    %139 = vector.multi_reduction <add>, %138, %cst_46 [1] : vector<16x32xf32> to vector<16xf32>
    %140 = vector.shape_cast %139 : vector<16xf32> to vector<16x1xf32>
    %cst_47 = arith.constant 3.200000e+01 : f32
    %141 = vector.broadcast %cst_47 : f32 to vector<16x1xf32>
    %142 = arith.divf %140, %141 : vector<16x1xf32>
    %143 = vector.broadcast %142 : vector<16x1xf32> to vector<16x32xf32>
    %144 = arith.subf %138, %143 : vector<16x32xf32>
    %145 = arith.mulf %144, %144 : vector<16x32xf32>
    %cst_48 = arith.constant dense<0.000000e+00> : vector<16xf32>
    %146 = vector.multi_reduction <add>, %145, %cst_48 [1] : vector<16x32xf32> to vector<16xf32>
    %147 = vector.shape_cast %146 : vector<16xf32> to vector<16x1xf32>
    %cst_49 = arith.constant 3.200000e+01 : f32
    %148 = vector.broadcast %cst_49 : f32 to vector<16x1xf32>
    %149 = arith.divf %147, %148 : vector<16x1xf32>
    %150 = vector.broadcast %142 : vector<16x1xf32> to vector<16x32xf32>
    %151 = arith.subf %138, %150 : vector<16x32xf32>
    %cst_50 = arith.constant 9.99999974E-6 : f32
    %152 = vector.broadcast %cst_50 : f32 to vector<16x1xf32>
    %153 = arith.addf %149, %152 : vector<16x1xf32>
    %154 = math.rsqrt %153 : vector<16x1xf32>
    %155 = vector.broadcast %154 : vector<16x1xf32> to vector<16x32xf32>
    %156 = arith.mulf %151, %155 : vector<16x32xf32>
    %157 = arith.mulf %156, %14 : vector<16x32xf32>
    %158 = arith.addf %157, %17 : vector<16x32xf32>
    %cst_51 = arith.constant dense<0.000000e+00> : vector<16x64xf32>
    %159 = tpu.matmul %158, %6, %cst_51 {dimension_numbers = #tpu.dot_dimension_numbers<[1], [0], [0], [1], [0, 0, 1, 1], [], []>} : vector<16x32xf32>, vector<32x64xf32>, vector<16x64xf32> -> vector<16x64xf32>
    %160 = arith.addf %159, %20 : vector<16x64xf32>
    %cst_52 = arith.constant 0.000000e+00 : f32
    %161 = vector.broadcast %cst_52 : f32 to vector<16x64xf32>
    %162 = arith.maximumf %160, %161 : vector<16x64xf32>
    %cst_53 = arith.constant dense<0.000000e+00> : vector<16x32xf32>
    %163 = tpu.matmul %162, %7, %cst_53 {dimension_numbers = #tpu.dot_dimension_numbers<[1], [0], [0], [1], [0, 0, 1, 1], [], []>} : vector<16x64xf32>, vector<64x32xf32>, vector<16x32xf32> -> vector<16x32xf32>
    %164 = arith.addf %163, %23 : vector<16x32xf32>
    %165 = arith.addf %158, %164 : vector<16x32xf32>
    %cst_54 = arith.constant dense<0.000000e+00> : vector<16xf32>
    %166 = vector.multi_reduction <add>, %165, %cst_54 [1] : vector<16x32xf32> to vector<16xf32>
    %167 = vector.shape_cast %166 : vector<16xf32> to vector<16x1xf32>
    %cst_55 = arith.constant 3.200000e+01 : f32
    %168 = vector.broadcast %cst_55 : f32 to vector<16x1xf32>
    %169 = arith.divf %167, %168 : vector<16x1xf32>
    %170 = vector.broadcast %169 : vector<16x1xf32> to vector<16x32xf32>
    %171 = arith.subf %165, %170 : vector<16x32xf32>
    %172 = arith.mulf %171, %171 : vector<16x32xf32>
    %cst_56 = arith.constant dense<0.000000e+00> : vector<16xf32>
    %173 = vector.multi_reduction <add>, %172, %cst_56 [1] : vector<16x32xf32> to vector<16xf32>
    %174 = vector.shape_cast %173 : vector<16xf32> to vector<16x1xf32>
    %cst_57 = arith.constant 3.200000e+01 : f32
    %175 = vector.broadcast %cst_57 : f32 to vector<16x1xf32>
    %176 = arith.divf %174, %175 : vector<16x1xf32>
    %177 = vector.broadcast %169 : vector<16x1xf32> to vector<16x32xf32>
    %178 = arith.subf %165, %177 : vector<16x32xf32>
    %cst_58 = arith.constant 9.99999974E-6 : f32
    %179 = vector.broadcast %cst_58 : f32 to vector<16x1xf32>
    %180 = arith.addf %176, %179 : vector<16x1xf32>
    %181 = math.rsqrt %180 : vector<16x1xf32>
    %182 = vector.broadcast %181 : vector<16x1xf32> to vector<16x32xf32>
    %183 = arith.mulf %178, %182 : vector<16x32xf32>
    %184 = arith.mulf %183, %26 : vector<16x32xf32>
    %185 = arith.addf %184, %29 : vector<16x32xf32>
    %c168 = arith.constant 168 : index
    %c0_59 = arith.constant 0 : index
    %186 = vector.load %arg3[%c168, %c0_59] : memref<504x96xf32, #tpu.memory_space<vmem>>, vector<32x96xf32>
    %c200 = arith.constant 200 : index
    %c0_60 = arith.constant 0 : index
    %187 = vector.load %arg3[%c200, %c0_60] : memref<504x96xf32, #tpu.memory_space<vmem>>, vector<32x32xf32>
    %c232 = arith.constant 232 : index
    %c0_61 = arith.constant 0 : index
    %188 = vector.load %arg3[%c232, %c0_61] : memref<504x96xf32, #tpu.memory_space<vmem>>, vector<32x64xf32>
    %c264 = arith.constant 264 : index
    %c0_62 = arith.constant 0 : index
    %189 = vector.load %arg3[%c264, %c0_62] : memref<504x96xf32, #tpu.memory_space<vmem>>, vector<64x32xf32>
    %c328 = arith.constant 328 : index
    %c0_63 = arith.constant 0 : index
    %190 = vector.load %arg3[%c328, %c0_63] : memref<504x96xf32, #tpu.memory_space<vmem>>, vector<1x96xf32>
    %c329 = arith.constant 329 : index
    %c0_64 = arith.constant 0 : index
    %191 = vector.load %arg3[%c329, %c0_64] : memref<504x96xf32, #tpu.memory_space<vmem>>, vector<1x32xf32>
    %192 = vector.shape_cast %191 : vector<1x32xf32> to vector<1x32xf32>
    %193 = vector.broadcast %192 : vector<1x32xf32> to vector<16x32xf32>
    %c330 = arith.constant 330 : index
    %c0_65 = arith.constant 0 : index
    %194 = vector.load %arg3[%c330, %c0_65] : memref<504x96xf32, #tpu.memory_space<vmem>>, vector<1x32xf32>
    %195 = vector.shape_cast %194 : vector<1x32xf32> to vector<1x32xf32>
    %196 = vector.broadcast %195 : vector<1x32xf32> to vector<16x32xf32>
    %c331 = arith.constant 331 : index
    %c0_66 = arith.constant 0 : index
    %197 = vector.load %arg3[%c331, %c0_66] : memref<504x96xf32, #tpu.memory_space<vmem>>, vector<1x32xf32>
    %198 = vector.shape_cast %197 : vector<1x32xf32> to vector<1x32xf32>
    %199 = vector.broadcast %198 : vector<1x32xf32> to vector<16x32xf32>
    %c332 = arith.constant 332 : index
    %c0_67 = arith.constant 0 : index
    %200 = vector.load %arg3[%c332, %c0_67] : memref<504x96xf32, #tpu.memory_space<vmem>>, vector<1x64xf32>
    %201 = vector.shape_cast %200 : vector<1x64xf32> to vector<1x64xf32>
    %202 = vector.broadcast %201 : vector<1x64xf32> to vector<16x64xf32>
    %c333 = arith.constant 333 : index
    %c0_68 = arith.constant 0 : index
    %203 = vector.load %arg3[%c333, %c0_68] : memref<504x96xf32, #tpu.memory_space<vmem>>, vector<1x32xf32>
    %204 = vector.shape_cast %203 : vector<1x32xf32> to vector<1x32xf32>
    %205 = vector.broadcast %204 : vector<1x32xf32> to vector<16x32xf32>
    %c334 = arith.constant 334 : index
    %c0_69 = arith.constant 0 : index
    %206 = vector.load %arg3[%c334, %c0_69] : memref<504x96xf32, #tpu.memory_space<vmem>>, vector<1x32xf32>
    %207 = vector.shape_cast %206 : vector<1x32xf32> to vector<1x32xf32>
    %208 = vector.broadcast %207 : vector<1x32xf32> to vector<16x32xf32>
    %c335 = arith.constant 335 : index
    %c0_70 = arith.constant 0 : index
    %209 = vector.load %arg3[%c335, %c0_70] : memref<504x96xf32, #tpu.memory_space<vmem>>, vector<1x32xf32>
    %210 = vector.shape_cast %209 : vector<1x32xf32> to vector<1x32xf32>
    %211 = vector.broadcast %210 : vector<1x32xf32> to vector<16x32xf32>
    %cst_71 = arith.constant dense<0.000000e+00> : vector<16x96xf32>
    %212 = tpu.matmul %185, %186, %cst_71 {dimension_numbers = #tpu.dot_dimension_numbers<[1], [0], [0], [1], [0, 0, 1, 1], [], []>} : vector<16x32xf32>, vector<32x96xf32>, vector<16x96xf32> -> vector<16x96xf32>
    %213 = vector.shape_cast %190 : vector<1x96xf32> to vector<1x96xf32>
    %214 = vector.broadcast %213 : vector<1x96xf32> to vector<16x96xf32>
    %215 = arith.addf %212, %214 : vector<16x96xf32>
    %216 = vector.extract_strided_slice %215 {offsets = [0, 0], sizes = [16, 32], strides = [1, 1]} : vector<16x96xf32> to vector<16x32xf32>
    %217 = vector.extract_strided_slice %215 {offsets = [0, 32], sizes = [16, 32], strides = [1, 1]} : vector<16x96xf32> to vector<16x32xf32>
    %218 = vector.extract_strided_slice %215 {offsets = [0, 64], sizes = [16, 32], strides = [1, 1]} : vector<16x96xf32> to vector<16x32xf32>
    %219 = vector.extract_strided_slice %216 {offsets = [0, 0], sizes = [16, 8], strides = [1, 1]} : vector<16x32xf32> to vector<16x8xf32>
    %220 = vector.extract_strided_slice %217 {offsets = [0, 0], sizes = [16, 8], strides = [1, 1]} : vector<16x32xf32> to vector<16x8xf32>
    %221 = vector.extract_strided_slice %219 {offsets = [0, 0], sizes = [8, 8], strides = [1, 1]} : vector<16x8xf32> to vector<8x8xf32>
    %222 = vector.extract_strided_slice %220 {offsets = [0, 0], sizes = [8, 8], strides = [1, 1]} : vector<16x8xf32> to vector<8x8xf32>
    %cst_72 = arith.constant dense<0.000000e+00> : vector<8x8xf32>
    %223 = tpu.matmul %221, %222, %cst_72 {dimension_numbers = #tpu.dot_dimension_numbers<[1], [1], [0], [0], [0, 0, 1, 0], [], []>} : vector<8x8xf32>, vector<8x8xf32>, vector<8x8xf32> -> vector<8x8xf32>
    %cst_73 = arith.constant 0.353553385 : f32
    %224 = vector.broadcast %cst_73 : f32 to vector<8x8xf32>
    %225 = arith.mulf %223, %224 : vector<8x8xf32>
    %226 = vector.extract_strided_slice %219 {offsets = [8, 0], sizes = [8, 8], strides = [1, 1]} : vector<16x8xf32> to vector<8x8xf32>
    %227 = vector.extract_strided_slice %220 {offsets = [8, 0], sizes = [8, 8], strides = [1, 1]} : vector<16x8xf32> to vector<8x8xf32>
    %cst_74 = arith.constant dense<0.000000e+00> : vector<8x8xf32>
    %228 = tpu.matmul %226, %227, %cst_74 {dimension_numbers = #tpu.dot_dimension_numbers<[1], [1], [0], [0], [0, 0, 1, 0], [], []>} : vector<8x8xf32>, vector<8x8xf32>, vector<8x8xf32> -> vector<8x8xf32>
    %cst_75 = arith.constant 0.353553385 : f32
    %229 = vector.broadcast %cst_75 : f32 to vector<8x8xf32>
    %230 = arith.mulf %228, %229 : vector<8x8xf32>
    %231 = vector.extract_strided_slice %216 {offsets = [0, 8], sizes = [16, 8], strides = [1, 1]} : vector<16x32xf32> to vector<16x8xf32>
    %232 = vector.extract_strided_slice %217 {offsets = [0, 8], sizes = [16, 8], strides = [1, 1]} : vector<16x32xf32> to vector<16x8xf32>
    %233 = vector.extract_strided_slice %231 {offsets = [0, 0], sizes = [8, 8], strides = [1, 1]} : vector<16x8xf32> to vector<8x8xf32>
    %234 = vector.extract_strided_slice %232 {offsets = [0, 0], sizes = [8, 8], strides = [1, 1]} : vector<16x8xf32> to vector<8x8xf32>
    %cst_76 = arith.constant dense<0.000000e+00> : vector<8x8xf32>
    %235 = tpu.matmul %233, %234, %cst_76 {dimension_numbers = #tpu.dot_dimension_numbers<[1], [1], [0], [0], [0, 0, 1, 0], [], []>} : vector<8x8xf32>, vector<8x8xf32>, vector<8x8xf32> -> vector<8x8xf32>
    %cst_77 = arith.constant 0.353553385 : f32
    %236 = vector.broadcast %cst_77 : f32 to vector<8x8xf32>
    %237 = arith.mulf %235, %236 : vector<8x8xf32>
    %238 = vector.extract_strided_slice %231 {offsets = [8, 0], sizes = [8, 8], strides = [1, 1]} : vector<16x8xf32> to vector<8x8xf32>
    %239 = vector.extract_strided_slice %232 {offsets = [8, 0], sizes = [8, 8], strides = [1, 1]} : vector<16x8xf32> to vector<8x8xf32>
    %cst_78 = arith.constant dense<0.000000e+00> : vector<8x8xf32>
    %240 = tpu.matmul %238, %239, %cst_78 {dimension_numbers = #tpu.dot_dimension_numbers<[1], [1], [0], [0], [0, 0, 1, 0], [], []>} : vector<8x8xf32>, vector<8x8xf32>, vector<8x8xf32> -> vector<8x8xf32>
    %cst_79 = arith.constant 0.353553385 : f32
    %241 = vector.broadcast %cst_79 : f32 to vector<8x8xf32>
    %242 = arith.mulf %240, %241 : vector<8x8xf32>
    %243 = vector.extract_strided_slice %216 {offsets = [0, 16], sizes = [16, 8], strides = [1, 1]} : vector<16x32xf32> to vector<16x8xf32>
    %244 = vector.extract_strided_slice %217 {offsets = [0, 16], sizes = [16, 8], strides = [1, 1]} : vector<16x32xf32> to vector<16x8xf32>
    %245 = vector.extract_strided_slice %243 {offsets = [0, 0], sizes = [8, 8], strides = [1, 1]} : vector<16x8xf32> to vector<8x8xf32>
    %246 = vector.extract_strided_slice %244 {offsets = [0, 0], sizes = [8, 8], strides = [1, 1]} : vector<16x8xf32> to vector<8x8xf32>
    %cst_80 = arith.constant dense<0.000000e+00> : vector<8x8xf32>
    %247 = tpu.matmul %245, %246, %cst_80 {dimension_numbers = #tpu.dot_dimension_numbers<[1], [1], [0], [0], [0, 0, 1, 0], [], []>} : vector<8x8xf32>, vector<8x8xf32>, vector<8x8xf32> -> vector<8x8xf32>
    %cst_81 = arith.constant 0.353553385 : f32
    %248 = vector.broadcast %cst_81 : f32 to vector<8x8xf32>
    %249 = arith.mulf %247, %248 : vector<8x8xf32>
    %250 = vector.extract_strided_slice %243 {offsets = [8, 0], sizes = [8, 8], strides = [1, 1]} : vector<16x8xf32> to vector<8x8xf32>
    %251 = vector.extract_strided_slice %244 {offsets = [8, 0], sizes = [8, 8], strides = [1, 1]} : vector<16x8xf32> to vector<8x8xf32>
    %cst_82 = arith.constant dense<0.000000e+00> : vector<8x8xf32>
    %252 = tpu.matmul %250, %251, %cst_82 {dimension_numbers = #tpu.dot_dimension_numbers<[1], [1], [0], [0], [0, 0, 1, 0], [], []>} : vector<8x8xf32>, vector<8x8xf32>, vector<8x8xf32> -> vector<8x8xf32>
    %cst_83 = arith.constant 0.353553385 : f32
    %253 = vector.broadcast %cst_83 : f32 to vector<8x8xf32>
    %254 = arith.mulf %252, %253 : vector<8x8xf32>
    %255 = vector.extract_strided_slice %216 {offsets = [0, 24], sizes = [16, 8], strides = [1, 1]} : vector<16x32xf32> to vector<16x8xf32>
    %256 = vector.extract_strided_slice %217 {offsets = [0, 24], sizes = [16, 8], strides = [1, 1]} : vector<16x32xf32> to vector<16x8xf32>
    %257 = vector.extract_strided_slice %255 {offsets = [0, 0], sizes = [8, 8], strides = [1, 1]} : vector<16x8xf32> to vector<8x8xf32>
    %258 = vector.extract_strided_slice %256 {offsets = [0, 0], sizes = [8, 8], strides = [1, 1]} : vector<16x8xf32> to vector<8x8xf32>
    %cst_84 = arith.constant dense<0.000000e+00> : vector<8x8xf32>
    %259 = tpu.matmul %257, %258, %cst_84 {dimension_numbers = #tpu.dot_dimension_numbers<[1], [1], [0], [0], [0, 0, 1, 0], [], []>} : vector<8x8xf32>, vector<8x8xf32>, vector<8x8xf32> -> vector<8x8xf32>
    %cst_85 = arith.constant 0.353553385 : f32
    %260 = vector.broadcast %cst_85 : f32 to vector<8x8xf32>
    %261 = arith.mulf %259, %260 : vector<8x8xf32>
    %262 = vector.extract_strided_slice %255 {offsets = [8, 0], sizes = [8, 8], strides = [1, 1]} : vector<16x8xf32> to vector<8x8xf32>
    %263 = vector.extract_strided_slice %256 {offsets = [8, 0], sizes = [8, 8], strides = [1, 1]} : vector<16x8xf32> to vector<8x8xf32>
    %cst_86 = arith.constant dense<0.000000e+00> : vector<8x8xf32>
    %264 = tpu.matmul %262, %263, %cst_86 {dimension_numbers = #tpu.dot_dimension_numbers<[1], [1], [0], [0], [0, 0, 1, 0], [], []>} : vector<8x8xf32>, vector<8x8xf32>, vector<8x8xf32> -> vector<8x8xf32>
    %cst_87 = arith.constant 0.353553385 : f32
    %265 = vector.broadcast %cst_87 : f32 to vector<8x8xf32>
    %266 = arith.mulf %264, %265 : vector<8x8xf32>
    %267 = tpu.concatenate %225, %230, %237, %242, %249, %254, %261, %266 in 0 : vector<8x8xf32>, vector<8x8xf32>, vector<8x8xf32>, vector<8x8xf32>, vector<8x8xf32>, vector<8x8xf32>, vector<8x8xf32>, vector<8x8xf32> -> vector<64x8xf32>
    %cst_88 = arith.constant dense<0xFF800000> : vector<64xf32>
    %268 = vector.multi_reduction <maximumf>, %267, %cst_88 [1] : vector<64x8xf32> to vector<64xf32>
    %269 = vector.shape_cast %268 : vector<64xf32> to vector<64x1xf32>
    %270 = vector.broadcast %269 : vector<64x1xf32> to vector<64x8xf32>
    %271 = arith.subf %267, %270 : vector<64x8xf32>
    %272 = math.exp %271 : vector<64x8xf32>
    %cst_89 = arith.constant dense<0.000000e+00> : vector<64xf32>
    %273 = vector.multi_reduction <add>, %272, %cst_89 [1] : vector<64x8xf32> to vector<64xf32>
    %274 = vector.shape_cast %273 : vector<64xf32> to vector<64x1xf32>
    %275 = tpu.reciprocal %274 : vector<64x1xf32> -> vector<64x1xf32>
    %276 = vector.broadcast %275 : vector<64x1xf32> to vector<64x8xf32>
    %277 = arith.mulf %272, %276 : vector<64x8xf32>
    %278 = vector.extract_strided_slice %218 {offsets = [0, 0], sizes = [16, 8], strides = [1, 1]} : vector<16x32xf32> to vector<16x8xf32>
    %279 = vector.extract_strided_slice %277 {offsets = [0, 0], sizes = [8, 8], strides = [1, 1]} : vector<64x8xf32> to vector<8x8xf32>
    %280 = vector.extract_strided_slice %278 {offsets = [0, 0], sizes = [8, 8], strides = [1, 1]} : vector<16x8xf32> to vector<8x8xf32>
    %cst_90 = arith.constant dense<0.000000e+00> : vector<8x8xf32>
    %281 = tpu.matmul %279, %280, %cst_90 {dimension_numbers = #tpu.dot_dimension_numbers<[1], [0], [0], [1], [0, 0, 1, 1], [], []>} : vector<8x8xf32>, vector<8x8xf32>, vector<8x8xf32> -> vector<8x8xf32>
    %282 = vector.extract_strided_slice %277 {offsets = [8, 0], sizes = [8, 8], strides = [1, 1]} : vector<64x8xf32> to vector<8x8xf32>
    %283 = vector.extract_strided_slice %278 {offsets = [8, 0], sizes = [8, 8], strides = [1, 1]} : vector<16x8xf32> to vector<8x8xf32>
    %cst_91 = arith.constant dense<0.000000e+00> : vector<8x8xf32>
    %284 = tpu.matmul %282, %283, %cst_91 {dimension_numbers = #tpu.dot_dimension_numbers<[1], [0], [0], [1], [0, 0, 1, 1], [], []>} : vector<8x8xf32>, vector<8x8xf32>, vector<8x8xf32> -> vector<8x8xf32>
    %285 = tpu.concatenate %281, %284 in 0 : vector<8x8xf32>, vector<8x8xf32> -> vector<16x8xf32>
    %286 = vector.extract_strided_slice %218 {offsets = [0, 8], sizes = [16, 8], strides = [1, 1]} : vector<16x32xf32> to vector<16x8xf32>
    %287 = vector.extract_strided_slice %277 {offsets = [16, 0], sizes = [8, 8], strides = [1, 1]} : vector<64x8xf32> to vector<8x8xf32>
    %288 = vector.extract_strided_slice %286 {offsets = [0, 0], sizes = [8, 8], strides = [1, 1]} : vector<16x8xf32> to vector<8x8xf32>
    %cst_92 = arith.constant dense<0.000000e+00> : vector<8x8xf32>
    %289 = tpu.matmul %287, %288, %cst_92 {dimension_numbers = #tpu.dot_dimension_numbers<[1], [0], [0], [1], [0, 0, 1, 1], [], []>} : vector<8x8xf32>, vector<8x8xf32>, vector<8x8xf32> -> vector<8x8xf32>
    %290 = vector.extract_strided_slice %277 {offsets = [24, 0], sizes = [8, 8], strides = [1, 1]} : vector<64x8xf32> to vector<8x8xf32>
    %291 = vector.extract_strided_slice %286 {offsets = [8, 0], sizes = [8, 8], strides = [1, 1]} : vector<16x8xf32> to vector<8x8xf32>
    %cst_93 = arith.constant dense<0.000000e+00> : vector<8x8xf32>
    %292 = tpu.matmul %290, %291, %cst_93 {dimension_numbers = #tpu.dot_dimension_numbers<[1], [0], [0], [1], [0, 0, 1, 1], [], []>} : vector<8x8xf32>, vector<8x8xf32>, vector<8x8xf32> -> vector<8x8xf32>
    %293 = tpu.concatenate %289, %292 in 0 : vector<8x8xf32>, vector<8x8xf32> -> vector<16x8xf32>
    %294 = vector.extract_strided_slice %218 {offsets = [0, 16], sizes = [16, 8], strides = [1, 1]} : vector<16x32xf32> to vector<16x8xf32>
    %295 = vector.extract_strided_slice %277 {offsets = [32, 0], sizes = [8, 8], strides = [1, 1]} : vector<64x8xf32> to vector<8x8xf32>
    %296 = vector.extract_strided_slice %294 {offsets = [0, 0], sizes = [8, 8], strides = [1, 1]} : vector<16x8xf32> to vector<8x8xf32>
    %cst_94 = arith.constant dense<0.000000e+00> : vector<8x8xf32>
    %297 = tpu.matmul %295, %296, %cst_94 {dimension_numbers = #tpu.dot_dimension_numbers<[1], [0], [0], [1], [0, 0, 1, 1], [], []>} : vector<8x8xf32>, vector<8x8xf32>, vector<8x8xf32> -> vector<8x8xf32>
    %298 = vector.extract_strided_slice %277 {offsets = [40, 0], sizes = [8, 8], strides = [1, 1]} : vector<64x8xf32> to vector<8x8xf32>
    %299 = vector.extract_strided_slice %294 {offsets = [8, 0], sizes = [8, 8], strides = [1, 1]} : vector<16x8xf32> to vector<8x8xf32>
    %cst_95 = arith.constant dense<0.000000e+00> : vector<8x8xf32>
    %300 = tpu.matmul %298, %299, %cst_95 {dimension_numbers = #tpu.dot_dimension_numbers<[1], [0], [0], [1], [0, 0, 1, 1], [], []>} : vector<8x8xf32>, vector<8x8xf32>, vector<8x8xf32> -> vector<8x8xf32>
    %301 = tpu.concatenate %297, %300 in 0 : vector<8x8xf32>, vector<8x8xf32> -> vector<16x8xf32>
    %302 = vector.extract_strided_slice %218 {offsets = [0, 24], sizes = [16, 8], strides = [1, 1]} : vector<16x32xf32> to vector<16x8xf32>
    %303 = vector.extract_strided_slice %277 {offsets = [48, 0], sizes = [8, 8], strides = [1, 1]} : vector<64x8xf32> to vector<8x8xf32>
    %304 = vector.extract_strided_slice %302 {offsets = [0, 0], sizes = [8, 8], strides = [1, 1]} : vector<16x8xf32> to vector<8x8xf32>
    %cst_96 = arith.constant dense<0.000000e+00> : vector<8x8xf32>
    %305 = tpu.matmul %303, %304, %cst_96 {dimension_numbers = #tpu.dot_dimension_numbers<[1], [0], [0], [1], [0, 0, 1, 1], [], []>} : vector<8x8xf32>, vector<8x8xf32>, vector<8x8xf32> -> vector<8x8xf32>
    %306 = vector.extract_strided_slice %277 {offsets = [56, 0], sizes = [8, 8], strides = [1, 1]} : vector<64x8xf32> to vector<8x8xf32>
    %307 = vector.extract_strided_slice %302 {offsets = [8, 0], sizes = [8, 8], strides = [1, 1]} : vector<16x8xf32> to vector<8x8xf32>
    %cst_97 = arith.constant dense<0.000000e+00> : vector<8x8xf32>
    %308 = tpu.matmul %306, %307, %cst_97 {dimension_numbers = #tpu.dot_dimension_numbers<[1], [0], [0], [1], [0, 0, 1, 1], [], []>} : vector<8x8xf32>, vector<8x8xf32>, vector<8x8xf32> -> vector<8x8xf32>
    %309 = tpu.concatenate %305, %308 in 0 : vector<8x8xf32>, vector<8x8xf32> -> vector<16x8xf32>
    %310 = tpu.concatenate %285, %293, %301, %309 in 1 : vector<16x8xf32>, vector<16x8xf32>, vector<16x8xf32>, vector<16x8xf32> -> vector<16x32xf32>
    %cst_98 = arith.constant dense<0.000000e+00> : vector<16x32xf32>
    %311 = tpu.matmul %310, %187, %cst_98 {dimension_numbers = #tpu.dot_dimension_numbers<[1], [0], [0], [1], [0, 0, 1, 1], [], []>} : vector<16x32xf32>, vector<32x32xf32>, vector<16x32xf32> -> vector<16x32xf32>
    %312 = arith.addf %311, %193 : vector<16x32xf32>
    %313 = arith.addf %185, %312 : vector<16x32xf32>
    %cst_99 = arith.constant dense<0.000000e+00> : vector<16xf32>
    %314 = vector.multi_reduction <add>, %313, %cst_99 [1] : vector<16x32xf32> to vector<16xf32>
    %315 = vector.shape_cast %314 : vector<16xf32> to vector<16x1xf32>
    %cst_100 = arith.constant 3.200000e+01 : f32
    %316 = vector.broadcast %cst_100 : f32 to vector<16x1xf32>
    %317 = arith.divf %315, %316 : vector<16x1xf32>
    %318 = vector.broadcast %317 : vector<16x1xf32> to vector<16x32xf32>
    %319 = arith.subf %313, %318 : vector<16x32xf32>
    %320 = arith.mulf %319, %319 : vector<16x32xf32>
    %cst_101 = arith.constant dense<0.000000e+00> : vector<16xf32>
    %321 = vector.multi_reduction <add>, %320, %cst_101 [1] : vector<16x32xf32> to vector<16xf32>
    %322 = vector.shape_cast %321 : vector<16xf32> to vector<16x1xf32>
    %cst_102 = arith.constant 3.200000e+01 : f32
    %323 = vector.broadcast %cst_102 : f32 to vector<16x1xf32>
    %324 = arith.divf %322, %323 : vector<16x1xf32>
    %325 = vector.broadcast %317 : vector<16x1xf32> to vector<16x32xf32>
    %326 = arith.subf %313, %325 : vector<16x32xf32>
    %cst_103 = arith.constant 9.99999974E-6 : f32
    %327 = vector.broadcast %cst_103 : f32 to vector<16x1xf32>
    %328 = arith.addf %324, %327 : vector<16x1xf32>
    %329 = math.rsqrt %328 : vector<16x1xf32>
    %330 = vector.broadcast %329 : vector<16x1xf32> to vector<16x32xf32>
    %331 = arith.mulf %326, %330 : vector<16x32xf32>
    %332 = arith.mulf %331, %196 : vector<16x32xf32>
    %333 = arith.addf %332, %199 : vector<16x32xf32>
    %cst_104 = arith.constant dense<0.000000e+00> : vector<16x64xf32>
    %334 = tpu.matmul %333, %188, %cst_104 {dimension_numbers = #tpu.dot_dimension_numbers<[1], [0], [0], [1], [0, 0, 1, 1], [], []>} : vector<16x32xf32>, vector<32x64xf32>, vector<16x64xf32> -> vector<16x64xf32>
    %335 = arith.addf %334, %202 : vector<16x64xf32>
    %cst_105 = arith.constant 0.000000e+00 : f32
    %336 = vector.broadcast %cst_105 : f32 to vector<16x64xf32>
    %337 = arith.maximumf %335, %336 : vector<16x64xf32>
    %cst_106 = arith.constant dense<0.000000e+00> : vector<16x32xf32>
    %338 = tpu.matmul %337, %189, %cst_106 {dimension_numbers = #tpu.dot_dimension_numbers<[1], [0], [0], [1], [0, 0, 1, 1], [], []>} : vector<16x64xf32>, vector<64x32xf32>, vector<16x32xf32> -> vector<16x32xf32>
    %339 = arith.addf %338, %205 : vector<16x32xf32>
    %340 = arith.addf %333, %339 : vector<16x32xf32>
    %cst_107 = arith.constant dense<0.000000e+00> : vector<16xf32>
    %341 = vector.multi_reduction <add>, %340, %cst_107 [1] : vector<16x32xf32> to vector<16xf32>
    %342 = vector.shape_cast %341 : vector<16xf32> to vector<16x1xf32>
    %cst_108 = arith.constant 3.200000e+01 : f32
    %343 = vector.broadcast %cst_108 : f32 to vector<16x1xf32>
    %344 = arith.divf %342, %343 : vector<16x1xf32>
    %345 = vector.broadcast %344 : vector<16x1xf32> to vector<16x32xf32>
    %346 = arith.subf %340, %345 : vector<16x32xf32>
    %347 = arith.mulf %346, %346 : vector<16x32xf32>
    %cst_109 = arith.constant dense<0.000000e+00> : vector<16xf32>
    %348 = vector.multi_reduction <add>, %347, %cst_109 [1] : vector<16x32xf32> to vector<16xf32>
    %349 = vector.shape_cast %348 : vector<16xf32> to vector<16x1xf32>
    %cst_110 = arith.constant 3.200000e+01 : f32
    %350 = vector.broadcast %cst_110 : f32 to vector<16x1xf32>
    %351 = arith.divf %349, %350 : vector<16x1xf32>
    %352 = vector.broadcast %344 : vector<16x1xf32> to vector<16x32xf32>
    %353 = arith.subf %340, %352 : vector<16x32xf32>
    %cst_111 = arith.constant 9.99999974E-6 : f32
    %354 = vector.broadcast %cst_111 : f32 to vector<16x1xf32>
    %355 = arith.addf %351, %354 : vector<16x1xf32>
    %356 = math.rsqrt %355 : vector<16x1xf32>
    %357 = vector.broadcast %356 : vector<16x1xf32> to vector<16x32xf32>
    %358 = arith.mulf %353, %357 : vector<16x32xf32>
    %359 = arith.mulf %358, %208 : vector<16x32xf32>
    %360 = arith.addf %359, %211 : vector<16x32xf32>
    %c336 = arith.constant 336 : index
    %c0_112 = arith.constant 0 : index
    %361 = vector.load %arg3[%c336, %c0_112] : memref<504x96xf32, #tpu.memory_space<vmem>>, vector<32x96xf32>
    %c368 = arith.constant 368 : index
    %c0_113 = arith.constant 0 : index
    %362 = vector.load %arg3[%c368, %c0_113] : memref<504x96xf32, #tpu.memory_space<vmem>>, vector<32x32xf32>
    %c400 = arith.constant 400 : index
    %c0_114 = arith.constant 0 : index
    %363 = vector.load %arg3[%c400, %c0_114] : memref<504x96xf32, #tpu.memory_space<vmem>>, vector<32x64xf32>
    %c432 = arith.constant 432 : index
    %c0_115 = arith.constant 0 : index
    %364 = vector.load %arg3[%c432, %c0_115] : memref<504x96xf32, #tpu.memory_space<vmem>>, vector<64x32xf32>
    %c496 = arith.constant 496 : index
    %c0_116 = arith.constant 0 : index
    %365 = vector.load %arg3[%c496, %c0_116] : memref<504x96xf32, #tpu.memory_space<vmem>>, vector<1x96xf32>
    %c497 = arith.constant 497 : index
    %c0_117 = arith.constant 0 : index
    %366 = vector.load %arg3[%c497, %c0_117] : memref<504x96xf32, #tpu.memory_space<vmem>>, vector<1x32xf32>
    %367 = vector.shape_cast %366 : vector<1x32xf32> to vector<1x32xf32>
    %368 = vector.broadcast %367 : vector<1x32xf32> to vector<16x32xf32>
    %c498 = arith.constant 498 : index
    %c0_118 = arith.constant 0 : index
    %369 = vector.load %arg3[%c498, %c0_118] : memref<504x96xf32, #tpu.memory_space<vmem>>, vector<1x32xf32>
    %370 = vector.shape_cast %369 : vector<1x32xf32> to vector<1x32xf32>
    %371 = vector.broadcast %370 : vector<1x32xf32> to vector<16x32xf32>
    %c499 = arith.constant 499 : index
    %c0_119 = arith.constant 0 : index
    %372 = vector.load %arg3[%c499, %c0_119] : memref<504x96xf32, #tpu.memory_space<vmem>>, vector<1x32xf32>
    %373 = vector.shape_cast %372 : vector<1x32xf32> to vector<1x32xf32>
    %374 = vector.broadcast %373 : vector<1x32xf32> to vector<16x32xf32>
    %c500 = arith.constant 500 : index
    %c0_120 = arith.constant 0 : index
    %375 = vector.load %arg3[%c500, %c0_120] : memref<504x96xf32, #tpu.memory_space<vmem>>, vector<1x64xf32>
    %376 = vector.shape_cast %375 : vector<1x64xf32> to vector<1x64xf32>
    %377 = vector.broadcast %376 : vector<1x64xf32> to vector<16x64xf32>
    %c501 = arith.constant 501 : index
    %c0_121 = arith.constant 0 : index
    %378 = vector.load %arg3[%c501, %c0_121] : memref<504x96xf32, #tpu.memory_space<vmem>>, vector<1x32xf32>
    %379 = vector.shape_cast %378 : vector<1x32xf32> to vector<1x32xf32>
    %380 = vector.broadcast %379 : vector<1x32xf32> to vector<16x32xf32>
    %c502 = arith.constant 502 : index
    %c0_122 = arith.constant 0 : index
    %381 = vector.load %arg3[%c502, %c0_122] : memref<504x96xf32, #tpu.memory_space<vmem>>, vector<1x32xf32>
    %382 = vector.shape_cast %381 : vector<1x32xf32> to vector<1x32xf32>
    %383 = vector.broadcast %382 : vector<1x32xf32> to vector<16x32xf32>
    %c503 = arith.constant 503 : index
    %c0_123 = arith.constant 0 : index
    %384 = vector.load %arg3[%c503, %c0_123] : memref<504x96xf32, #tpu.memory_space<vmem>>, vector<1x32xf32>
    %385 = vector.shape_cast %384 : vector<1x32xf32> to vector<1x32xf32>
    %386 = vector.broadcast %385 : vector<1x32xf32> to vector<16x32xf32>
    %cst_124 = arith.constant dense<0.000000e+00> : vector<16x96xf32>
    %387 = tpu.matmul %360, %361, %cst_124 {dimension_numbers = #tpu.dot_dimension_numbers<[1], [0], [0], [1], [0, 0, 1, 1], [], []>} : vector<16x32xf32>, vector<32x96xf32>, vector<16x96xf32> -> vector<16x96xf32>
    %388 = vector.shape_cast %365 : vector<1x96xf32> to vector<1x96xf32>
    %389 = vector.broadcast %388 : vector<1x96xf32> to vector<16x96xf32>
    %390 = arith.addf %387, %389 : vector<16x96xf32>
    %391 = vector.extract_strided_slice %390 {offsets = [0, 0], sizes = [16, 32], strides = [1, 1]} : vector<16x96xf32> to vector<16x32xf32>
    %392 = vector.extract_strided_slice %390 {offsets = [0, 32], sizes = [16, 32], strides = [1, 1]} : vector<16x96xf32> to vector<16x32xf32>
    %393 = vector.extract_strided_slice %390 {offsets = [0, 64], sizes = [16, 32], strides = [1, 1]} : vector<16x96xf32> to vector<16x32xf32>
    %394 = vector.extract_strided_slice %391 {offsets = [0, 0], sizes = [16, 8], strides = [1, 1]} : vector<16x32xf32> to vector<16x8xf32>
    %395 = vector.extract_strided_slice %392 {offsets = [0, 0], sizes = [16, 8], strides = [1, 1]} : vector<16x32xf32> to vector<16x8xf32>
    %396 = vector.extract_strided_slice %394 {offsets = [0, 0], sizes = [8, 8], strides = [1, 1]} : vector<16x8xf32> to vector<8x8xf32>
    %397 = vector.extract_strided_slice %395 {offsets = [0, 0], sizes = [8, 8], strides = [1, 1]} : vector<16x8xf32> to vector<8x8xf32>
    %cst_125 = arith.constant dense<0.000000e+00> : vector<8x8xf32>
    %398 = tpu.matmul %396, %397, %cst_125 {dimension_numbers = #tpu.dot_dimension_numbers<[1], [1], [0], [0], [0, 0, 1, 0], [], []>} : vector<8x8xf32>, vector<8x8xf32>, vector<8x8xf32> -> vector<8x8xf32>
    %cst_126 = arith.constant 0.353553385 : f32
    %399 = vector.broadcast %cst_126 : f32 to vector<8x8xf32>
    %400 = arith.mulf %398, %399 : vector<8x8xf32>
    %401 = vector.extract_strided_slice %394 {offsets = [8, 0], sizes = [8, 8], strides = [1, 1]} : vector<16x8xf32> to vector<8x8xf32>
    %402 = vector.extract_strided_slice %395 {offsets = [8, 0], sizes = [8, 8], strides = [1, 1]} : vector<16x8xf32> to vector<8x8xf32>
    %cst_127 = arith.constant dense<0.000000e+00> : vector<8x8xf32>
    %403 = tpu.matmul %401, %402, %cst_127 {dimension_numbers = #tpu.dot_dimension_numbers<[1], [1], [0], [0], [0, 0, 1, 0], [], []>} : vector<8x8xf32>, vector<8x8xf32>, vector<8x8xf32> -> vector<8x8xf32>
    %cst_128 = arith.constant 0.353553385 : f32
    %404 = vector.broadcast %cst_128 : f32 to vector<8x8xf32>
    %405 = arith.mulf %403, %404 : vector<8x8xf32>
    %406 = vector.extract_strided_slice %391 {offsets = [0, 8], sizes = [16, 8], strides = [1, 1]} : vector<16x32xf32> to vector<16x8xf32>
    %407 = vector.extract_strided_slice %392 {offsets = [0, 8], sizes = [16, 8], strides = [1, 1]} : vector<16x32xf32> to vector<16x8xf32>
    %408 = vector.extract_strided_slice %406 {offsets = [0, 0], sizes = [8, 8], strides = [1, 1]} : vector<16x8xf32> to vector<8x8xf32>
    %409 = vector.extract_strided_slice %407 {offsets = [0, 0], sizes = [8, 8], strides = [1, 1]} : vector<16x8xf32> to vector<8x8xf32>
    %cst_129 = arith.constant dense<0.000000e+00> : vector<8x8xf32>
    %410 = tpu.matmul %408, %409, %cst_129 {dimension_numbers = #tpu.dot_dimension_numbers<[1], [1], [0], [0], [0, 0, 1, 0], [], []>} : vector<8x8xf32>, vector<8x8xf32>, vector<8x8xf32> -> vector<8x8xf32>
    %cst_130 = arith.constant 0.353553385 : f32
    %411 = vector.broadcast %cst_130 : f32 to vector<8x8xf32>
    %412 = arith.mulf %410, %411 : vector<8x8xf32>
    %413 = vector.extract_strided_slice %406 {offsets = [8, 0], sizes = [8, 8], strides = [1, 1]} : vector<16x8xf32> to vector<8x8xf32>
    %414 = vector.extract_strided_slice %407 {offsets = [8, 0], sizes = [8, 8], strides = [1, 1]} : vector<16x8xf32> to vector<8x8xf32>
    %cst_131 = arith.constant dense<0.000000e+00> : vector<8x8xf32>
    %415 = tpu.matmul %413, %414, %cst_131 {dimension_numbers = #tpu.dot_dimension_numbers<[1], [1], [0], [0], [0, 0, 1, 0], [], []>} : vector<8x8xf32>, vector<8x8xf32>, vector<8x8xf32> -> vector<8x8xf32>
    %cst_132 = arith.constant 0.353553385 : f32
    %416 = vector.broadcast %cst_132 : f32 to vector<8x8xf32>
    %417 = arith.mulf %415, %416 : vector<8x8xf32>
    %418 = vector.extract_strided_slice %391 {offsets = [0, 16], sizes = [16, 8], strides = [1, 1]} : vector<16x32xf32> to vector<16x8xf32>
    %419 = vector.extract_strided_slice %392 {offsets = [0, 16], sizes = [16, 8], strides = [1, 1]} : vector<16x32xf32> to vector<16x8xf32>
    %420 = vector.extract_strided_slice %418 {offsets = [0, 0], sizes = [8, 8], strides = [1, 1]} : vector<16x8xf32> to vector<8x8xf32>
    %421 = vector.extract_strided_slice %419 {offsets = [0, 0], sizes = [8, 8], strides = [1, 1]} : vector<16x8xf32> to vector<8x8xf32>
    %cst_133 = arith.constant dense<0.000000e+00> : vector<8x8xf32>
    %422 = tpu.matmul %420, %421, %cst_133 {dimension_numbers = #tpu.dot_dimension_numbers<[1], [1], [0], [0], [0, 0, 1, 0], [], []>} : vector<8x8xf32>, vector<8x8xf32>, vector<8x8xf32> -> vector<8x8xf32>
    %cst_134 = arith.constant 0.353553385 : f32
    %423 = vector.broadcast %cst_134 : f32 to vector<8x8xf32>
    %424 = arith.mulf %422, %423 : vector<8x8xf32>
    %425 = vector.extract_strided_slice %418 {offsets = [8, 0], sizes = [8, 8], strides = [1, 1]} : vector<16x8xf32> to vector<8x8xf32>
    %426 = vector.extract_strided_slice %419 {offsets = [8, 0], sizes = [8, 8], strides = [1, 1]} : vector<16x8xf32> to vector<8x8xf32>
    %cst_135 = arith.constant dense<0.000000e+00> : vector<8x8xf32>
    %427 = tpu.matmul %425, %426, %cst_135 {dimension_numbers = #tpu.dot_dimension_numbers<[1], [1], [0], [0], [0, 0, 1, 0], [], []>} : vector<8x8xf32>, vector<8x8xf32>, vector<8x8xf32> -> vector<8x8xf32>
    %cst_136 = arith.constant 0.353553385 : f32
    %428 = vector.broadcast %cst_136 : f32 to vector<8x8xf32>
    %429 = arith.mulf %427, %428 : vector<8x8xf32>
    %430 = vector.extract_strided_slice %391 {offsets = [0, 24], sizes = [16, 8], strides = [1, 1]} : vector<16x32xf32> to vector<16x8xf32>
    %431 = vector.extract_strided_slice %392 {offsets = [0, 24], sizes = [16, 8], strides = [1, 1]} : vector<16x32xf32> to vector<16x8xf32>
    %432 = vector.extract_strided_slice %430 {offsets = [0, 0], sizes = [8, 8], strides = [1, 1]} : vector<16x8xf32> to vector<8x8xf32>
    %433 = vector.extract_strided_slice %431 {offsets = [0, 0], sizes = [8, 8], strides = [1, 1]} : vector<16x8xf32> to vector<8x8xf32>
    %cst_137 = arith.constant dense<0.000000e+00> : vector<8x8xf32>
    %434 = tpu.matmul %432, %433, %cst_137 {dimension_numbers = #tpu.dot_dimension_numbers<[1], [1], [0], [0], [0, 0, 1, 0], [], []>} : vector<8x8xf32>, vector<8x8xf32>, vector<8x8xf32> -> vector<8x8xf32>
    %cst_138 = arith.constant 0.353553385 : f32
    %435 = vector.broadcast %cst_138 : f32 to vector<8x8xf32>
    %436 = arith.mulf %434, %435 : vector<8x8xf32>
    %437 = vector.extract_strided_slice %430 {offsets = [8, 0], sizes = [8, 8], strides = [1, 1]} : vector<16x8xf32> to vector<8x8xf32>
    %438 = vector.extract_strided_slice %431 {offsets = [8, 0], sizes = [8, 8], strides = [1, 1]} : vector<16x8xf32> to vector<8x8xf32>
    %cst_139 = arith.constant dense<0.000000e+00> : vector<8x8xf32>
    %439 = tpu.matmul %437, %438, %cst_139 {dimension_numbers = #tpu.dot_dimension_numbers<[1], [1], [0], [0], [0, 0, 1, 0], [], []>} : vector<8x8xf32>, vector<8x8xf32>, vector<8x8xf32> -> vector<8x8xf32>
    %cst_140 = arith.constant 0.353553385 : f32
    %440 = vector.broadcast %cst_140 : f32 to vector<8x8xf32>
    %441 = arith.mulf %439, %440 : vector<8x8xf32>
    %442 = tpu.concatenate %400, %405, %412, %417, %424, %429, %436, %441 in 0 : vector<8x8xf32>, vector<8x8xf32>, vector<8x8xf32>, vector<8x8xf32>, vector<8x8xf32>, vector<8x8xf32>, vector<8x8xf32>, vector<8x8xf32> -> vector<64x8xf32>
    %cst_141 = arith.constant dense<0xFF800000> : vector<64xf32>
    %443 = vector.multi_reduction <maximumf>, %442, %cst_141 [1] : vector<64x8xf32> to vector<64xf32>
    %444 = vector.shape_cast %443 : vector<64xf32> to vector<64x1xf32>
    %445 = vector.broadcast %444 : vector<64x1xf32> to vector<64x8xf32>
    %446 = arith.subf %442, %445 : vector<64x8xf32>
    %447 = math.exp %446 : vector<64x8xf32>
    %cst_142 = arith.constant dense<0.000000e+00> : vector<64xf32>
    %448 = vector.multi_reduction <add>, %447, %cst_142 [1] : vector<64x8xf32> to vector<64xf32>
    %449 = vector.shape_cast %448 : vector<64xf32> to vector<64x1xf32>
    %450 = tpu.reciprocal %449 : vector<64x1xf32> -> vector<64x1xf32>
    %451 = vector.broadcast %450 : vector<64x1xf32> to vector<64x8xf32>
    %452 = arith.mulf %447, %451 : vector<64x8xf32>
    %453 = vector.extract_strided_slice %393 {offsets = [0, 0], sizes = [16, 8], strides = [1, 1]} : vector<16x32xf32> to vector<16x8xf32>
    %454 = vector.extract_strided_slice %452 {offsets = [0, 0], sizes = [8, 8], strides = [1, 1]} : vector<64x8xf32> to vector<8x8xf32>
    %455 = vector.extract_strided_slice %453 {offsets = [0, 0], sizes = [8, 8], strides = [1, 1]} : vector<16x8xf32> to vector<8x8xf32>
    %cst_143 = arith.constant dense<0.000000e+00> : vector<8x8xf32>
    %456 = tpu.matmul %454, %455, %cst_143 {dimension_numbers = #tpu.dot_dimension_numbers<[1], [0], [0], [1], [0, 0, 1, 1], [], []>} : vector<8x8xf32>, vector<8x8xf32>, vector<8x8xf32> -> vector<8x8xf32>
    %457 = vector.extract_strided_slice %452 {offsets = [8, 0], sizes = [8, 8], strides = [1, 1]} : vector<64x8xf32> to vector<8x8xf32>
    %458 = vector.extract_strided_slice %453 {offsets = [8, 0], sizes = [8, 8], strides = [1, 1]} : vector<16x8xf32> to vector<8x8xf32>
    %cst_144 = arith.constant dense<0.000000e+00> : vector<8x8xf32>
    %459 = tpu.matmul %457, %458, %cst_144 {dimension_numbers = #tpu.dot_dimension_numbers<[1], [0], [0], [1], [0, 0, 1, 1], [], []>} : vector<8x8xf32>, vector<8x8xf32>, vector<8x8xf32> -> vector<8x8xf32>
    %460 = tpu.concatenate %456, %459 in 0 : vector<8x8xf32>, vector<8x8xf32> -> vector<16x8xf32>
    %461 = vector.extract_strided_slice %393 {offsets = [0, 8], sizes = [16, 8], strides = [1, 1]} : vector<16x32xf32> to vector<16x8xf32>
    %462 = vector.extract_strided_slice %452 {offsets = [16, 0], sizes = [8, 8], strides = [1, 1]} : vector<64x8xf32> to vector<8x8xf32>
    %463 = vector.extract_strided_slice %461 {offsets = [0, 0], sizes = [8, 8], strides = [1, 1]} : vector<16x8xf32> to vector<8x8xf32>
    %cst_145 = arith.constant dense<0.000000e+00> : vector<8x8xf32>
    %464 = tpu.matmul %462, %463, %cst_145 {dimension_numbers = #tpu.dot_dimension_numbers<[1], [0], [0], [1], [0, 0, 1, 1], [], []>} : vector<8x8xf32>, vector<8x8xf32>, vector<8x8xf32> -> vector<8x8xf32>
    %465 = vector.extract_strided_slice %452 {offsets = [24, 0], sizes = [8, 8], strides = [1, 1]} : vector<64x8xf32> to vector<8x8xf32>
    %466 = vector.extract_strided_slice %461 {offsets = [8, 0], sizes = [8, 8], strides = [1, 1]} : vector<16x8xf32> to vector<8x8xf32>
    %cst_146 = arith.constant dense<0.000000e+00> : vector<8x8xf32>
    %467 = tpu.matmul %465, %466, %cst_146 {dimension_numbers = #tpu.dot_dimension_numbers<[1], [0], [0], [1], [0, 0, 1, 1], [], []>} : vector<8x8xf32>, vector<8x8xf32>, vector<8x8xf32> -> vector<8x8xf32>
    %468 = tpu.concatenate %464, %467 in 0 : vector<8x8xf32>, vector<8x8xf32> -> vector<16x8xf32>
    %469 = vector.extract_strided_slice %393 {offsets = [0, 16], sizes = [16, 8], strides = [1, 1]} : vector<16x32xf32> to vector<16x8xf32>
    %470 = vector.extract_strided_slice %452 {offsets = [32, 0], sizes = [8, 8], strides = [1, 1]} : vector<64x8xf32> to vector<8x8xf32>
    %471 = vector.extract_strided_slice %469 {offsets = [0, 0], sizes = [8, 8], strides = [1, 1]} : vector<16x8xf32> to vector<8x8xf32>
    %cst_147 = arith.constant dense<0.000000e+00> : vector<8x8xf32>
    %472 = tpu.matmul %470, %471, %cst_147 {dimension_numbers = #tpu.dot_dimension_numbers<[1], [0], [0], [1], [0, 0, 1, 1], [], []>} : vector<8x8xf32>, vector<8x8xf32>, vector<8x8xf32> -> vector<8x8xf32>
    %473 = vector.extract_strided_slice %452 {offsets = [40, 0], sizes = [8, 8], strides = [1, 1]} : vector<64x8xf32> to vector<8x8xf32>
    %474 = vector.extract_strided_slice %469 {offsets = [8, 0], sizes = [8, 8], strides = [1, 1]} : vector<16x8xf32> to vector<8x8xf32>
    %cst_148 = arith.constant dense<0.000000e+00> : vector<8x8xf32>
    %475 = tpu.matmul %473, %474, %cst_148 {dimension_numbers = #tpu.dot_dimension_numbers<[1], [0], [0], [1], [0, 0, 1, 1], [], []>} : vector<8x8xf32>, vector<8x8xf32>, vector<8x8xf32> -> vector<8x8xf32>
    %476 = tpu.concatenate %472, %475 in 0 : vector<8x8xf32>, vector<8x8xf32> -> vector<16x8xf32>
    %477 = vector.extract_strided_slice %393 {offsets = [0, 24], sizes = [16, 8], strides = [1, 1]} : vector<16x32xf32> to vector<16x8xf32>
    %478 = vector.extract_strided_slice %452 {offsets = [48, 0], sizes = [8, 8], strides = [1, 1]} : vector<64x8xf32> to vector<8x8xf32>
    %479 = vector.extract_strided_slice %477 {offsets = [0, 0], sizes = [8, 8], strides = [1, 1]} : vector<16x8xf32> to vector<8x8xf32>
    %cst_149 = arith.constant dense<0.000000e+00> : vector<8x8xf32>
    %480 = tpu.matmul %478, %479, %cst_149 {dimension_numbers = #tpu.dot_dimension_numbers<[1], [0], [0], [1], [0, 0, 1, 1], [], []>} : vector<8x8xf32>, vector<8x8xf32>, vector<8x8xf32> -> vector<8x8xf32>
    %481 = vector.extract_strided_slice %452 {offsets = [56, 0], sizes = [8, 8], strides = [1, 1]} : vector<64x8xf32> to vector<8x8xf32>
    %482 = vector.extract_strided_slice %477 {offsets = [8, 0], sizes = [8, 8], strides = [1, 1]} : vector<16x8xf32> to vector<8x8xf32>
    %cst_150 = arith.constant dense<0.000000e+00> : vector<8x8xf32>
    %483 = tpu.matmul %481, %482, %cst_150 {dimension_numbers = #tpu.dot_dimension_numbers<[1], [0], [0], [1], [0, 0, 1, 1], [], []>} : vector<8x8xf32>, vector<8x8xf32>, vector<8x8xf32> -> vector<8x8xf32>
    %484 = tpu.concatenate %480, %483 in 0 : vector<8x8xf32>, vector<8x8xf32> -> vector<16x8xf32>
    %485 = tpu.concatenate %460, %468, %476, %484 in 1 : vector<16x8xf32>, vector<16x8xf32>, vector<16x8xf32>, vector<16x8xf32> -> vector<16x32xf32>
    %cst_151 = arith.constant dense<0.000000e+00> : vector<16x32xf32>
    %486 = tpu.matmul %485, %362, %cst_151 {dimension_numbers = #tpu.dot_dimension_numbers<[1], [0], [0], [1], [0, 0, 1, 1], [], []>} : vector<16x32xf32>, vector<32x32xf32>, vector<16x32xf32> -> vector<16x32xf32>
    %487 = arith.addf %486, %368 : vector<16x32xf32>
    %488 = arith.addf %360, %487 : vector<16x32xf32>
    %cst_152 = arith.constant dense<0.000000e+00> : vector<16xf32>
    %489 = vector.multi_reduction <add>, %488, %cst_152 [1] : vector<16x32xf32> to vector<16xf32>
    %490 = vector.shape_cast %489 : vector<16xf32> to vector<16x1xf32>
    %cst_153 = arith.constant 3.200000e+01 : f32
    %491 = vector.broadcast %cst_153 : f32 to vector<16x1xf32>
    %492 = arith.divf %490, %491 : vector<16x1xf32>
    %493 = vector.broadcast %492 : vector<16x1xf32> to vector<16x32xf32>
    %494 = arith.subf %488, %493 : vector<16x32xf32>
    %495 = arith.mulf %494, %494 : vector<16x32xf32>
    %cst_154 = arith.constant dense<0.000000e+00> : vector<16xf32>
    %496 = vector.multi_reduction <add>, %495, %cst_154 [1] : vector<16x32xf32> to vector<16xf32>
    %497 = vector.shape_cast %496 : vector<16xf32> to vector<16x1xf32>
    %cst_155 = arith.constant 3.200000e+01 : f32
    %498 = vector.broadcast %cst_155 : f32 to vector<16x1xf32>
    %499 = arith.divf %497, %498 : vector<16x1xf32>
    %500 = vector.broadcast %492 : vector<16x1xf32> to vector<16x32xf32>
    %501 = arith.subf %488, %500 : vector<16x32xf32>
    %cst_156 = arith.constant 9.99999974E-6 : f32
    %502 = vector.broadcast %cst_156 : f32 to vector<16x1xf32>
    %503 = arith.addf %499, %502 : vector<16x1xf32>
    %504 = math.rsqrt %503 : vector<16x1xf32>
    %505 = vector.broadcast %504 : vector<16x1xf32> to vector<16x32xf32>
    %506 = arith.mulf %501, %505 : vector<16x32xf32>
    %507 = arith.mulf %506, %371 : vector<16x32xf32>
    %508 = arith.addf %507, %374 : vector<16x32xf32>
    %cst_157 = arith.constant dense<0.000000e+00> : vector<16x64xf32>
    %509 = tpu.matmul %508, %363, %cst_157 {dimension_numbers = #tpu.dot_dimension_numbers<[1], [0], [0], [1], [0, 0, 1, 1], [], []>} : vector<16x32xf32>, vector<32x64xf32>, vector<16x64xf32> -> vector<16x64xf32>
    %510 = arith.addf %509, %377 : vector<16x64xf32>
    %cst_158 = arith.constant 0.000000e+00 : f32
    %511 = vector.broadcast %cst_158 : f32 to vector<16x64xf32>
    %512 = arith.maximumf %510, %511 : vector<16x64xf32>
    %cst_159 = arith.constant dense<0.000000e+00> : vector<16x32xf32>
    %513 = tpu.matmul %512, %364, %cst_159 {dimension_numbers = #tpu.dot_dimension_numbers<[1], [0], [0], [1], [0, 0, 1, 1], [], []>} : vector<16x64xf32>, vector<64x32xf32>, vector<16x32xf32> -> vector<16x32xf32>
    %514 = arith.addf %513, %380 : vector<16x32xf32>
    %515 = arith.addf %508, %514 : vector<16x32xf32>
    %cst_160 = arith.constant dense<0.000000e+00> : vector<16xf32>
    %516 = vector.multi_reduction <add>, %515, %cst_160 [1] : vector<16x32xf32> to vector<16xf32>
    %517 = vector.shape_cast %516 : vector<16xf32> to vector<16x1xf32>
    %cst_161 = arith.constant 3.200000e+01 : f32
    %518 = vector.broadcast %cst_161 : f32 to vector<16x1xf32>
    %519 = arith.divf %517, %518 : vector<16x1xf32>
    %520 = vector.broadcast %519 : vector<16x1xf32> to vector<16x32xf32>
    %521 = arith.subf %515, %520 : vector<16x32xf32>
    %522 = arith.mulf %521, %521 : vector<16x32xf32>
    %cst_162 = arith.constant dense<0.000000e+00> : vector<16xf32>
    %523 = vector.multi_reduction <add>, %522, %cst_162 [1] : vector<16x32xf32> to vector<16xf32>
    %524 = vector.shape_cast %523 : vector<16xf32> to vector<16x1xf32>
    %cst_163 = arith.constant 3.200000e+01 : f32
    %525 = vector.broadcast %cst_163 : f32 to vector<16x1xf32>
    %526 = arith.divf %524, %525 : vector<16x1xf32>
    %527 = vector.broadcast %519 : vector<16x1xf32> to vector<16x32xf32>
    %528 = arith.subf %515, %527 : vector<16x32xf32>
    %cst_164 = arith.constant 9.99999974E-6 : f32
    %529 = vector.broadcast %cst_164 : f32 to vector<16x1xf32>
    %530 = arith.addf %526, %529 : vector<16x1xf32>
    %531 = math.rsqrt %530 : vector<16x1xf32>
    %532 = vector.broadcast %531 : vector<16x1xf32> to vector<16x32xf32>
    %533 = arith.mulf %528, %532 : vector<16x32xf32>
    %534 = arith.mulf %533, %383 : vector<16x32xf32>
    %535 = arith.addf %534, %386 : vector<16x32xf32>
    %536 = vector.shape_cast %535 : vector<16x32xf32> to vector<2x8x32xf32>
    %c0_165 = arith.constant 0 : index
    %c0_166 = arith.constant 0 : index
    %c0_167 = arith.constant 0 : index
    %537 = vector.load %arg4[%c0_165, %c0_166, %c0_167] : memref<2x8x32xf32, #tpu.memory_space<vmem>>, vector<2x8x32xf32>
    tpu.vector_store %arg4[%c0_165, %c0_166, %c0_167], %536 {strides = array<i32>} : memref<2x8x32xf32, #tpu.memory_space<vmem>>, vector<2x8x32xf32>,
    return
  }
  func.func @transform_0(%arg0: i32) -> (i32, i32, i32) {
    %c0_i32 = arith.constant 0 : i32
    %c0_i32_0 = arith.constant 0 : i32
    %c0_i32_1 = arith.constant 0 : i32
    %c0_i32_2 = arith.constant 0 : i32
    return %c0_i32, %c0_i32_0, %c0_i32_1 : i32, i32, i32
  }
  func.func @transform_1(%arg0: i32) -> (i32, i32, i32) {
    %c0_i32 = arith.constant 0 : i32
    %c0_i32_0 = arith.constant 0 : i32
    %c0_i32_1 = arith.constant 0 : i32
    %c0_i32_2 = arith.constant 0 : i32
    return %c0_i32, %c0_i32_0, %c0_i32_1 : i32, i32, i32
  }
  func.func @transform_2(%arg0: i32) -> (i32, i32) {
    %c0_i32 = arith.constant 0 : i32
    %c0_i32_0 = arith.constant 0 : i32
    %c0_i32_1 = arith.constant 0 : i32
    return %c0_i32, %c0_i32_0 : i32, i32
  }
  func.func @transform_3(%arg0: i32) -> (i32, i32, i32) {
    %c0_i32 = arith.constant 0 : i32
    %c0_i32_0 = arith.constant 0 : i32
    %c0_i32_1 = arith.constant 0 : i32
    %c0_i32_2 = arith.constant 0 : i32
    return %c0_i32, %c0_i32_0, %c0_i32_1 : i32, i32, i32
  }
}

</mosaic_0001>

<bundles_post_ra>
// kernel: tpu_custom_call.1
= control target key start
LH: loop header
LB: loop body
LE: loop exit
PB: predicated region body
PF: predicated region fallthrough
CT: control target
= control target key end

     0   :  { %vm81_vm0 = vcmask 261120   ;;  %s6837_s22 = smov 96   ;;  %s7745_s0 = inlined_call_operand.vmem [shape: f32[2,8,32], index: 0, kind: input, shape index: {}]   ;;  %s7746_s1 = inlined_call_operand.vmem [shape: f32[2,16,32], index: 1, kind: input, shape index: {}]   ;;  %s7747_s2 = inlined_call_operand.vmem [shape: f32[504,96], index: 2, kind: input, shape index: {}]   ;;  %s7748_s3 = inlined_call_operand.hbm [shape: f32[2,8,32], index: 3, kind: output, shape index: {}]  }
   0x1   :  { %v21_v0 = vld [vmem:[%s7747_s2] sm:$0xff]  ;;  %v22_v1 = vld [vmem:[%s7747_s2 + $0x8] sm:$0xff]  ;;  %v23_v2 = vld [vmem:[%s7747_s2 + $0x10] sm:$0xff] }
   0x2   :  { %v6613_v3 = vpack.i.bf16 %v22_v1, %v21_v0  ;;  %v24_v4 = vld [vmem:[%s7747_s2 + $0x18] sm:$0xff]  ;;  %v6410_v5 = vpack.c.bf16 %v22_v1, %v21_v0  ;;  %v6891_v6 = vld [vmem:[%s7745_s0] sm:$0xff] }
   0x3   :  { %v6414_v7 = vpack.c.bf16 %v24_v4, %v23_v2  ;;  %5976 = vmatprep.mubr.msk.f32.mxu1 %vm81_vm0, %v6891_v6  ;;  %v6618_v8 = vpack.i.bf16 %v24_v4, %v23_v2 }
   0x4   :  { %6614 = vrot.lane.b32.xlu0 %v6613_v3, %s6837_s22  ;;  %6411 = vmatprep.subr.bf16.mxu1 %v6410_v5 }
   0x5   :  { %8 = vsyncpa [#allocation3], 0  ;;  %6413 = vmatpush3.bf16.msra.mxu1 %v6410_v5  ;;  %v6899_v9 = vld [vmem:[%s7747_s2 + $0xa0] ss:$0 sm:$0xff]  ;;  %v6907_v10 = vld [vmem:[%s7745_s0 + $0x8] sm:$0xff]  ;;  %v6838_v23 = vmov 0.0|0.0  }
   0x6   :  { %6415 = vmatprep.subr.bf16.mxu1 %v6414_v7  ;;  %180 = vrot.lane.b32.xlu1 %v6899_v9, %s6837_s22  ;;  %v17_v11 = vld [vmem:[%s7746_s1] sm:$0xff]  ;;  %v18_v20 = vld [vmem:[%s7746_s1 + $0x8] sm:$0xff]  ;;  %v19_v21 = vld [vmem:[%s7746_s1 + $0x10] sm:$0xff]  ;;  %vm6839_vm1 = vmmov 0   ;;  %v6840_v26 = vmov 0.0   ;;  %vm280_vm2 = vcmask 64512  }
   0x7   :  { %v20_v22 = vld [vmem:[%s7746_s1 + $0x18] sm:$0xff]  ;;  %6426 = vmatprep.subr.bf16.mxu0 %v6838_v23  ;;  %5997 = vmatprep.mubr.msk.f32.mxu0 %vm6839_vm1, %v6840_v26  ;;  %vm6935_vm3 = vmpackc.low %vm280_vm2, %vm280_vm2  ;;  %s6841_s1 = smov 120   ;;  %s6842_s7 = smov 112   ;;  %vm939_vm4 = vcmask 130048   ;;  %vm1688_vm5 = vcmask 195584   ;;  %vm1888_vm6 = vcmask 523264  }
   0x8   :  { %6619 = vrot.lane.b32.xlu0 %v6618_v8, %s6837_s22  ;;  %s6843_s8 = smov 104   ;;  %s6844_s9 = smov 88  }
   0x9   :  { %6417 = vmatpush3.bf16.msra.mxu1 %v6414_v7  ;;  %s6845_s10 = smov 80   ;;  %s6846_s11 = smov 72  }
   0xa   :  { %s6847_s18 = smov 8   ;;  %s6848_s21 = smov 16  }
   0xb   :  { %s6849_s23 = smov 24   ;;  %s6850_s6 = smov 64  }
   0xc   :  { %5977 = vmatmul.mubr.msk.f32.vlgmr.msra.gmra.mrb[0].mxu1 %vm81_vm0, %v6907_v10  ;;  %s6851_s12 = smov 56   ;;  %s6852_s13 = smov 48  }
   0xd   :  { %5987 = vmatprep.mubr.msk.f32.mxu1 %vm81_vm0, %v17_v11  ;;  %s6853_s14 = smov 40   ;;  %s6854_s16 = smov [#allocation2]  }
   0xe   :  { %s5621_s17 = sshll.u32 %s6854_s16, 4  ;;  %s5622_s17 = int_to_ptr.vmem [resolvable:$true] %s5621_s17 }
   0xf   :  { %s6813_s19 = scalar_lea.vmem %s5622_s17, 256  ;;  %p6818_p1 = scmp.lt.s32.totalorder %s5622_s17, %s5622_s17 }
  0x10   :  { %p6814_p0 = scmp.ne.s32.totalorder %s5622_s17, %s6813_s19  ;;  %p6819_p2 = scmp.lt.s32.totalorder %s6813_s19, %s6813_s19 }
  0x12   :  { %p6820_p3 = por %p6819_p2, %p6818_p1 }
  0x14   :  { %p6821_p4 = pnand %p6820_p3, %p6814_p0 }
  0x76   :  { %v6615_v12 = vpop.permute.xlu0 %6614 }
  0x77   :  { %v6617_v13 = vunpack.i.h.bf16 %v6615_v12  ;;  %v6616_v14 = vunpack.i.l.bf16 %v6615_v12 }
  0x78   :  { %v181_v27 = vpop.permute.xlu1 %180 }
  0x79   :  { %v6418_v15 = vpack.c.bf16 %v6617_v13, %v6616_v14 }
  0x7a   :  { %v6620_v16 = vpop.permute.xlu0 %6619 }
  0x7b   :  { %v6622_v17 = vunpack.i.h.bf16 %v6620_v16  ;;  %v6621_v18 = vunpack.i.l.bf16 %v6620_v16  ;;  %6419 = vmatprep.subr.bf16.mxu1 %v6418_v15 }
  0x7c   :  { %6421 = vmatpush3.bf16.msra.mxu1 %v6418_v15 }
  0x7d   :  { %v6422_v19 = vpack.c.bf16 %v6622_v17, %v6621_v18 }
  0x7f   :  { %6423 = vmatprep.subr.bf16.mxu1 %v6422_v19 }
  0x80   :  { %6425 = vmatpush3.bf16.msra.mxu1 %v6422_v19 }
  0x81   :  { %6430 = vmatprep.subr.bf16.mxu1 %v6838_v23 }
  0x83   :  { %5988 = vmatmul.mubr.msk.f32.vlgmr.msra.gmra.mrb[2].mxu1 %vm81_vm0, %v18_v20 }
  0x84   :  { %5990 = vmatprep.mubr.msk.f32.mxu1 %vm81_vm0, %v19_v21 }
  0x87   :  { %5991 = vmatmul.mubr.msk.f32.gmra.mrb[4].mxu1 %vm81_vm0, %v20_v22 }
  0x88   :  { %6004 = vmatprep.mubr.msk.f32.mxu1 %vm6839_vm1, %v6840_v26 }
  0xdf   :  { %v5978_v24 = vpop.f32.mrb[0].mxu1 }
  0xe0   :  { %v154_v25 = vpop.f32.mrb[1].mxu1  ;;  %v160_v42 = vadd.f32 %v5978_v24, %v6899_v9 }
  0xe1   :  { %v155_v41 = vadd.f32 %v6899_v9, %v154_v25 }
 0x156   :  { %v5989_v28 = vpop.f32.mrb[2].mxu1 }
 0x157   :  { %v267_v29 = vadd.f32 %v5989_v28, %v181_v27  ;;  %v261_v30 = vpop.f32.mrb[3].mxu1 }
 0x158   :  { %v262_v31 = vadd.f32 %v261_v30, %v181_v27 }
 0x15a   :  { %v5992_v33 = vpop.f32.mrb[4].mxu1  ;;  %v6939_v34 = vpack.i.bf16 %v267_v29, %v262_v31  ;;  %v6427_v35 = vpack.c.bf16 %v267_v29, %v262_v31 }
 0x15b   :  { %v277_v36 = vadd.f32 %v5992_v33, %v181_v27  ;;  %v271_v37 = vpop.f32.mrb[5].mxu1 }
 0x15c   :  { %v272_v38 = vadd.f32 %v271_v37, %v181_v27  ;;  %6624 = vrot.lane.b32.xlu1 %v6939_v34, %s6841_s1  ;;  %6429 = vmatpush3.bf16.xpose.msk.msra.mxu0 %vm6935_vm3, %v6427_v35 }
 0x15d   :  { %6434 = vmatprep.subr.bf16.mxu0 %v6838_v23 }
 0x15e   :  { %v6946_v39 = vpack.i.bf16 %v277_v36, %v272_v38  ;;  %v6431_v40 = vpack.c.bf16 %v277_v36, %v272_v38 }
 0x160   :  { %6629 = vrot.lane.b32.xlu0 %v6946_v39, %s6841_s1  ;;  %6433 = vmatpush3.bf16.xpose.msk.msra.mxu1 %vm6935_vm3, %v6431_v40 }
 0x161   :  { %6634 = vrot.lane.b32.xlu1 %v6939_v34, %s6842_s7  ;;  %6438 = vmatprep.subr.bf16.mxu1 %v6838_v23 }
 0x163   :  { %5998 = vmatmul.mubr.msk.f32.vlgmr.msra.gmra.mrb[0].mxu0 %vm280_vm2, %v155_v41 }
 0x164   :  { %6639 = vrot.lane.b32.xlu0 %v6946_v39, %s6842_s7  ;;  %6011 = vmatprep.mubr.msk.f32.mxu0 %vm6839_vm1, %v6840_v26 }
 0x165   :  { %441 = vrot.lane.b32.xlu1 %v155_v41, %s6841_s1 }
 0x167   :  { %6005 = vmatmul.mubr.msk.f32.vlgmr.msra.gmra.mrb[6].mxu1 %vm280_vm2, %v160_v42 }
 0x168   :  { %524 = vrot.lane.b32.xlu0 %v160_v42, %s6841_s1  ;;  %6018 = vmatprep.mubr.msk.f32.mxu1 %vm6839_vm1, %v6840_v26 }
 0x169   :  { %6644 = vrot.lane.b32.xlu1 %v6939_v34, %s6843_s8 }
 0x16c   :  { %6649 = vrot.lane.b32.xlu0 %v6946_v39, %s6843_s8 }
 0x16d   :  { %607 = vrot.lane.b32.xlu1 %v155_v41, %s6842_s7 }
 0x170   :  { %690 = vrot.lane.b32.xlu0 %v160_v42, %s6842_s7 }
 0x171   :  { %773 = vrot.lane.b32.xlu1 %v155_v41, %s6843_s8 }
 0x174   :  { %856 = vrot.lane.b32.xlu0 %v160_v42, %s6843_s8 }
 0x1ce   :  { %v6625_v43 = vpop.permute.xlu1 %6624 }
 0x1cf   :  { %v6627_v44 = vunpack.i.h.bf16 %v6625_v43  ;;  %v6626_v45 = vunpack.i.l.bf16 %v6625_v43 }
 0x1d1   :  { %v6435_v46 = vpack.c.bf16 %v6627_v44, %v6626_v45 }
 0x1d2   :  { %v6630_v47 = vpop.permute.xlu0 %6629 }
 0x1d3   :  { %v6632_v48 = vunpack.i.h.bf16 %v6630_v47  ;;  %v6631_v49 = vunpack.i.l.bf16 %v6630_v47  ;;  %v6635_v50 = vpop.permute.xlu1 %6634  ;;  %6437 = vmatpush3.bf16.xpose.msk.msra.mxu0 %vm6935_vm3, %v6435_v46 }
 0x1d4   :  { %6442 = vmatprep.subr.bf16.mxu0 %v6838_v23  ;;  %v6637_v52 = vunpack.i.h.bf16 %v6635_v50  ;;  %v6636_v53 = vunpack.i.l.bf16 %v6635_v50 }
 0x1d5   :  { %v6439_v51 = vpack.c.bf16 %v6632_v48, %v6631_v49 }
 0x1d6   :  { %v6640_v54 = vpop.permute.xlu0 %6639  ;;  %v6443_v56 = vpack.c.bf16 %v6637_v52, %v6636_v53 }
 0x1d7   :  { %v442_v55 = vpop.permute.xlu1 %441  ;;  %6441 = vmatpush3.bf16.xpose.msk.msra.mxu1 %vm6935_vm3, %v6439_v51  ;;  %v6642_v57 = vunpack.i.h.bf16 %v6640_v54  ;;  %v6641_v58 = vunpack.i.l.bf16 %v6640_v54 }
 0x1d8   :  { %6446 = vmatprep.subr.bf16.mxu1 %v6838_v23 }
 0x1d9   :  { %v6447_v61 = vpack.c.bf16 %v6642_v57, %v6641_v58 }
 0x1da   :  { %v525_v59 = vpop.permute.xlu0 %524  ;;  %6012 = vmatmul.mubr.msk.f32.vlgmr.msra.gmra.mrb[2].mxu0 %vm280_vm2, %v442_v55 }
 0x1db   :  { %v6645_v60 = vpop.permute.xlu1 %6644  ;;  %6445 = vmatpush3.bf16.xpose.msk.msra.mxu0 %vm6935_vm3, %v6443_v56  ;;  %6025 = vmatprep.mubr.msk.f32.mxu0 %vm6839_vm1, %v6840_v26 }
 0x1dc   :  { %6450 = vmatprep.subr.bf16.mxu0 %v6838_v23  ;;  %v6647_v62 = vunpack.i.h.bf16 %v6645_v60  ;;  %v6646_v63 = vunpack.i.l.bf16 %v6645_v60 }
 0x1de   :  { %v6650_v0 = vpop.permute.xlu0 %6649  ;;  %6019 = vmatmul.mubr.msk.f32.vlgmr.msra.gmra.mrb[8].mxu1 %vm280_vm2, %v525_v59  ;;  %v6451_v1 = vpack.c.bf16 %v6647_v62, %v6646_v63 }
 0x1df   :  { %6449 = vmatpush3.bf16.xpose.msk.msra.mxu1 %vm6935_vm3, %v6447_v61  ;;  %6032 = vmatprep.mubr.msk.f32.mxu1 %vm6839_vm1, %v6840_v26  ;;  %v6652_v2 = vunpack.i.h.bf16 %v6650_v0  ;;  %v6651_v3 = vunpack.i.l.bf16 %v6650_v0  ;;  %v608_v4 = vpop.permute.xlu1 %607 }
 0x1e0   :  { %6454 = vmatprep.subr.bf16.mxu1 %v6838_v23 }
 0x1e1   :  { %v6455_v5 = vpack.c.bf16 %v6652_v2, %v6651_v3 }
 0x1e2   :  { %6026 = vmatmul.mubr.msk.f32.vlgmr.msra.gmra.mrb[4].mxu0 %vm280_vm2, %v608_v4  ;;  %v691_v7 = vpop.permute.xlu0 %690 }
 0x1e3   :  { %6453 = vmatpush3.bf16.xpose.msk.msra.mxu0 %vm6935_vm3, %v6451_v1  ;;  %6039 = vmatprep.mubr.msk.f32.mxu0 %vm6839_vm1, %v6840_v26  ;;  %v774_v8 = vpop.permute.xlu1 %773 }
 0x1e4   :  { %6458 = vmatprep.subr.bf16.mxu0 %v6838_v23 }
 0x1e6   :  { %6033 = vmatmul.mubr.msk.f32.vlgmr.msra.gmra.mrb[10].mxu1 %vm280_vm2, %v691_v7  ;;  %v857_v9 = vpop.permute.xlu0 %856 }
 0x1e7   :  { %6457 = vmatpush3.bf16.xpose.msk.msra.mxu1 %vm6935_vm3, %v6455_v5  ;;  %6046 = vmatprep.mubr.msk.f32.mxu1 %vm6839_vm1, %v6840_v26 }
 0x1e8   :  { %6461 = vmatprep.subr.bf16.mxu1 %v6838_v23 }
 0x1ea   :  { %6040 = vmatmul.mubr.msk.f32.vlgmr.msra.gmra.mrb[6].mxu0 %vm280_vm2, %v774_v8 }
 0x1eb   :  { %6053 = vmatprep.mubr.msk.f32.mxu0 %vm6839_vm1, %v6840_v26 }
 0x1ee   :  { %6047 = vmatmul.mubr.msk.f32.vlgmr.msra.gmra.mrb[12].mxu1 %vm280_vm2, %v857_v9 }
 0x1ef   :  { %6060 = vmatprep.mubr.msk.f32.mxu1 %vm6839_vm1, %v6840_v26 }
 0x236   :  { %v356_v11 = vpop.f32.mrb[0].mxu0 }
 0x237   :  { %v360_v12 = vmul.f32 0.35355338, %v356_v11  ;;  %v5999_v13 = vpop.f32.mrb[1].mxu0 }
 0x239   :  { %v940_v14 = vsel %vm939_vm4, %v360_v12, -inf }
 0x23a   :  { %v436_v15 = vpop.f32.mrb[6].mxu1  ;;  %941 = vmax.xlane.f32.xlu1 %v940_v14 }
 0x23b   :  { %v440_v16 = vmul.f32 0.35355338, %v436_v15  ;;  %v6006_v17 = vpop.f32.mrb[7].mxu1 }
 0x23d   :  { %v943_v18 = vsel %vm939_vm4, %v440_v16, -inf }
 0x23e   :  { %944 = vmax.xlane.f32.xlu0 %v943_v18 }
 0x2ad   :  { %v519_v19 = vpop.f32.mrb[2].mxu0 }
 0x2ae   :  { %v523_v20 = vmul.f32 0.35355338, %v519_v19  ;;  %v6013_v21 = vpop.f32.mrb[3].mxu0 }
 0x2b0   :  { %v946_v22 = vsel %vm939_vm4, %v523_v20, -inf }
 0x2b1   :  { %v602_v24 = vpop.f32.mrb[8].mxu1  ;;  %947 = vmax.xlane.f32.xlu0 %v946_v22 }
 0x2b2   :  { %v606_v25 = vmul.f32 0.35355338, %v602_v24  ;;  %v6020_v27 = vpop.f32.mrb[9].mxu1 }
 0x2b4   :  { %v949_v28 = vsel %vm939_vm4, %v606_v25, -inf }
 0x2b5   :  { %950 = vmax.xlane.f32.xlu1 %v949_v28  ;;  %v685_v29 = vpop.f32.mrb[4].mxu0 }
 0x2b6   :  { %v689_v30 = vmul.f32 0.35355338, %v685_v29  ;;  %v6027_v31 = vpop.f32.mrb[5].mxu0 }
 0x2b8   :  { %v952_v32 = vsel %vm939_vm4, %v689_v30, -inf }
 0x2b9   :  { %v768_v33 = vpop.f32.mrb[10].mxu1  ;;  %953 = vmax.xlane.f32.xlu0 %v952_v32 }
 0x2ba   :  { %v772_v35 = vmul.f32 0.35355338, %v768_v33  ;;  %v6034_v36 = vpop.f32.mrb[11].mxu1 }
 0x2bc   :  { %v955_v37 = vsel %vm939_vm4, %v772_v35, -inf }
 0x2bd   :  { %956 = vmax.xlane.f32.xlu1 %v955_v37  ;;  %v851_v38 = vpop.f32.mrb[6].mxu0 }
 0x2be   :  { %v855_v40 = vmul.f32 0.35355338, %v851_v38  ;;  %v6041_v41 = vpop.f32.mrb[7].mxu0 }
 0x2c0   :  { %v958_v42 = vsel %vm939_vm4, %v855_v40, -inf }
 0x2c1   :  { %v934_v43 = vpop.f32.mrb[12].mxu1  ;;  %959 = vmax.xlane.f32.xlu0 %v958_v42 }
 0x2c2   :  { %v938_v44 = vmul.f32 0.35355338, %v934_v43  ;;  %v6048_v45 = vpop.f32.mrb[13].mxu1 }
 0x2c4   :  { %v961_v46 = vsel %vm939_vm4, %v938_v44, -inf }
 0x2c5   :  { %962 = vmax.xlane.f32.xlu1 %v961_v46 }
 0x2c7   :  { %v942_v47 = vpop.xlane.xlu1 %941 }
 0x2c8   :  { %v964_v48 = vsub.f32 %v360_v12, %v942_v47 }
 0x2ca   :  { %v972_v50 = vmul.f32 1.442695, %v964_v48 }
 0x2cb   :  { %v945_v49 = vpop.xlane.xlu0 %944 }
 0x2cc   :  { %v965_v51 = vsub.f32 %v440_v16, %v945_v49  ;;  %6693 = vpow2.f32 %v972_v50 }
 0x2ce   :  { %v974_v52 = vmul.f32 1.442695, %v965_v51 }
 0x2d0   :  { %6695 = vpow2.f32 %v974_v52 }
 0x2d6   :  { %6659 = vrot.lane.b32.xlu1 %v6946_v39, %s6837_s22  ;;  %v7031_v53 = vpop.eup %6693 }
 0x2d7   :  { %6654 = vrot.lane.b32.xlu0 %v6939_v34, %s6837_s22  ;;  %v988_v54 = vsel %vm939_vm4, %v7031_v53, 0.0 }
 0x2da   :  { %6664 = vrot.lane.b32.xlu1 %v6939_v34, %s6844_s9  ;;  %v7035_v55 = vpop.eup %6695 }
 0x2db   :  { %6669 = vrot.lane.b32.xlu0 %v6946_v39, %s6844_s9  ;;  %v991_v56 = vsel %vm939_vm4, %v7035_v55, 0.0 }
 0x2de   :  { %6674 = vrot.lane.b32.xlu1 %v6939_v34, %s6845_s10 }
 0x2df   :  { %6679 = vrot.lane.b32.xlu0 %v6946_v39, %s6845_s10 }
 0x2fe   :  { %989 = vadd.xlane.f32.xlu0 %v988_v54 }
 0x302   :  { %992 = vadd.xlane.f32.xlu1 %v991_v56 }
 0x33e   :  { %v948_v57 = vpop.xlane.xlu0 %947 }
 0x33f   :  { %v966_v58 = vsub.f32 %v523_v20, %v948_v57 }
 0x341   :  { %v976_v59 = vmul.f32 1.442695, %v966_v58 }
 0x342   :  { %v951_v60 = vpop.xlane.xlu1 %950 }
 0x343   :  { %6697 = vpow2.f32 %v976_v59  ;;  %v967_v61 = vsub.f32 %v606_v25, %v951_v60 }
 0x345   :  { %v978_v62 = vmul.f32 1.442695, %v967_v61 }
 0x346   :  { %v954_v63 = vpop.xlane.xlu0 %953 }
 0x347   :  { %6699 = vpow2.f32 %v978_v62  ;;  %v968_v0 = vsub.f32 %v689_v30, %v954_v63 }
 0x349   :  { %v980_v1 = vmul.f32 1.442695, %v968_v0 }
 0x34a   :  { %v957_v2 = vpop.xlane.xlu1 %956 }
 0x34b   :  { %6701 = vpow2.f32 %v980_v1  ;;  %v969_v3 = vsub.f32 %v772_v35, %v957_v2 }
 0x34d   :  { %v7039_v4 = vpop.eup %6697  ;;  %v982_v5 = vmul.f32 1.442695, %v969_v3 }
 0x34e   :  { %v960_v7 = vpop.xlane.xlu0 %959  ;;  %v994_v8 = vsel %vm939_vm4, %v7039_v4, 0.0 }
 0x34f   :  { %6703 = vpow2.f32 %v982_v5  ;;  %v970_v9 = vsub.f32 %v855_v40, %v960_v7  ;;  %995 = vadd.xlane.f32.xlu0 %v994_v8 }
 0x351   :  { %v7043_v11 = vpop.eup %6699  ;;  %v984_v12 = vmul.f32 1.442695, %v970_v9 }
 0x352   :  { %v963_v13 = vpop.xlane.xlu1 %962  ;;  %v6655_v14 = vpop.permute.xlu0 %6654  ;;  %v997_v15 = vsel %vm939_vm4, %v7043_v11, 0.0 }
 0x353   :  { %6705 = vpow2.f32 %v984_v12  ;;  %v971_v16 = vsub.f32 %v938_v44, %v963_v13  ;;  %v6657_v17 = vunpack.i.h.bf16 %v6655_v14  ;;  %v6656_v18 = vunpack.i.l.bf16 %v6655_v14  ;;  %998 = vadd.xlane.f32.xlu1 %v997_v15 }
 0x355   :  { %v7047_v19 = vpop.eup %6701  ;;  %v986_v20 = vmul.f32 1.442695, %v971_v16  ;;  %v6459_v21 = vpack.c.bf16 %v6657_v17, %v6656_v18 }
 0x356   :  { %v6660_v22 = vpop.permute.xlu1 %6659  ;;  %v1000_v24 = vsel %vm939_vm4, %v7047_v19, 0.0  ;;  %v6670_v36 = vpop.permute.xlu0 %6669 }
 0x357   :  { %6707 = vpow2.f32 %v986_v20  ;;  %v6662_v25 = vunpack.i.h.bf16 %v6660_v22  ;;  %v6661_v27 = vunpack.i.l.bf16 %v6660_v22  ;;  %1001 = vadd.xlane.f32.xlu0 %v1000_v24  ;;  %6460 = vmatpush3.bf16.msra.mxu0 %v6459_v21  ;;  %v6672_v47 = vunpack.i.h.bf16 %v6670_v36 }
 0x358   :  { %6464 = vmatprep.subr.bf16.mxu0 %v6838_v23  ;;  %v6671_v48 = vunpack.i.l.bf16 %v6670_v36 }
 0x359   :  { %v7052_v28 = vpop.eup %6703  ;;  %v6462_v29 = vpack.c.bf16 %v6662_v25, %v6661_v27  ;;  %v25_v27 = vld [vmem:[%s7747_s2 + $0x20] sm:$0xff] }
 0x35a   :  { %v1003_v30 = vsel %vm939_vm4, %v7052_v28, 0.0  ;;  %v6665_v37 = vpop.permute.xlu1 %6664  ;;  %v6680_v38 = vpop.permute.xlu0 %6679  ;;  %v6468_v50 = vpack.c.bf16 %v6672_v47, %v6671_v48 }
 0x35b   :  { %1004 = vadd.xlane.f32.xlu1 %v1003_v30  ;;  %6463 = vmatpush3.bf16.msra.mxu1 %v6462_v29  ;;  %v6667_v43 = vunpack.i.h.bf16 %v6665_v37  ;;  %v6666_v44 = vunpack.i.l.bf16 %v6665_v37  ;;  %v6682_v59 = vunpack.i.h.bf16 %v6680_v38  ;;  %v6681_v60 = vunpack.i.l.bf16 %v6680_v38  ;;  %v27_v29 = vld [vmem:[%s7747_s2 + $0x30] sm:$0xff] }
 0x35c   :  { %6467 = vmatprep.subr.bf16.mxu1 %v6838_v23 }
 0x35d   :  { %v7057_v31 = vpop.eup %6705  ;;  %v6465_v49 = vpack.c.bf16 %v6667_v43, %v6666_v44  ;;  %v6474_v1 = vpack.c.bf16 %v6682_v59, %v6681_v60 }
 0x35e   :  { %v1006_v32 = vsel %vm939_vm4, %v7057_v31, 0.0  ;;  %v6675_v40 = vpop.permute.xlu1 %6674 }
 0x35f   :  { %1007 = vadd.xlane.f32.xlu0 %v1006_v32  ;;  %v6677_v54 = vunpack.i.h.bf16 %v6675_v40  ;;  %v6676_v56 = vunpack.i.l.bf16 %v6675_v40  ;;  %v28_v32 = vld [vmem:[%s7747_s2 + $0x38] sm:$0xff] }
 0x361   :  { %v7061_v33 = vpop.eup %6707  ;;  %v6471_v61 = vpack.c.bf16 %v6677_v54, %v6676_v56 }
 0x362   :  { %v1009_v35 = vsel %vm939_vm4, %v7061_v33, 0.0 }
 0x363   :  { %1010 = vadd.xlane.f32.xlu1 %v1009_v35 }
 0x374   :  { %6684 = vrot.lane.b32.xlu1 %v6939_v34, %s6846_s11 }
 0x375   :  { %6689 = vrot.lane.b32.xlu0 %v6946_v39, %s6846_s11 }
 0x38b   :  { %v990_v41 = vpop.xlane.xlu0 %989 }
 0x38c   :  { %6709 = vrcp.f32 %v990_v41 }
 0x38f   :  { %v993_v42 = vpop.xlane.xlu1 %992 }
 0x390   :  { %6711 = vrcp.f32 %v993_v42 }
 0x396   :  { %v6710_v45 = vpop.eup %6709 }
 0x397   :  { %v1020_v46 = vmul.f32 %v6710_v45, %v7031_v53 }
 0x399   :  { %6054 = vmatmul.mubr.msk.f32.vlgmr.msra.gmra.mrb[8].mxu0 %vm939_vm4, %v1020_v46 }
 0x39a   :  { %v6712_v34 = vpop.eup %6711  ;;  %6466 = vmatpush3.bf16.msra.mxu0 %v6465_v49  ;;  %6067 = vmatprep.mubr.msk.f32.mxu0 %vm6839_vm1, %v6840_v26 }
 0x39b   :  { %v1021_v39 = vmul.f32 %v6712_v34, %v7035_v55  ;;  %6470 = vmatprep.subr.bf16.mxu0 %v6838_v23 }
 0x39d   :  { %6061 = vmatmul.mubr.msk.f32.vlgmr.msra.gmra.mrb[14].mxu1 %vm939_vm4, %v1021_v39 }
 0x39e   :  { %6469 = vmatpush3.bf16.msra.mxu1 %v6468_v50  ;;  %6074 = vmatprep.mubr.msk.f32.mxu1 %vm6839_vm1, %v6840_v26 }
 0x39f   :  { %6473 = vmatprep.subr.bf16.mxu1 %v6838_v23 }
 0x3dc   :  { %v996_v51 = vpop.xlane.xlu0 %995 }
 0x3dd   :  { %6713 = vrcp.f32 %v996_v51 }
 0x3e0   :  { %v999_v52 = vpop.xlane.xlu1 %998 }
 0x3e1   :  { %6715 = vrcp.f32 %v999_v52 }
 0x3e4   :  { %v1002_v53 = vpop.xlane.xlu0 %1001 }
 0x3e5   :  { %6717 = vrcp.f32 %v1002_v53 }
 0x3e7   :  { %v6714_v55 = vpop.eup %6713 }
 0x3e8   :  { %v1005_v57 = vpop.xlane.xlu1 %1004  ;;  %v1022_v58 = vmul.f32 %v6714_v55, %v7039_v4  ;;  %v5632_v55 = vld [vmem:[%s7747_s2 + $0xa1] ss:$0 sm:$0xff] }
 0x3e9   :  { %6719 = vrcp.f32 %v1005_v57 }
 0x3ea   :  { %6068 = vmatmul.mubr.msk.f32.vlgmr.msra.gmra.mrb[10].mxu0 %vm939_vm4, %v1022_v58 }
 0x3eb   :  { %v6716_v62 = vpop.eup %6715  ;;  %6472 = vmatpush3.bf16.msra.mxu0 %v6471_v61  ;;  %6081 = vmatprep.mubr.msk.f32.mxu0 %vm6839_vm1, %v6840_v26 }
 0x3ec   :  { %v1008_v63 = vpop.xlane.xlu0 %1007  ;;  %v1023_v0 = vmul.f32 %v6716_v62, %v7043_v11  ;;  %6476 = vmatprep.subr.bf16.mxu0 %v6838_v23 }
 0x3ed   :  { %6721 = vrcp.f32 %v1008_v63 }
 0x3ee   :  { %6075 = vmatmul.mubr.msk.f32.vlgmr.msra.gmra.mrb[16].mxu1 %vm939_vm4, %v1023_v0 }
 0x3ef   :  { %v6718_v2 = vpop.eup %6717  ;;  %6475 = vmatpush3.bf16.msra.mxu1 %v6474_v1  ;;  %6088 = vmatprep.mubr.msk.f32.mxu1 %vm6839_vm1, %v6840_v26 }
 0x3f0   :  { %v1011_v3 = vpop.xlane.xlu1 %1010  ;;  %v6690_v4 = vpop.permute.xlu0 %6689  ;;  %v1024_v5 = vmul.f32 %v6718_v2, %v7047_v19  ;;  %6479 = vmatprep.subr.bf16.mxu1 %v6838_v23 }
 0x3f1   :  { %6723 = vrcp.f32 %v1011_v3  ;;  %v6692_v7 = vunpack.i.h.bf16 %v6690_v4  ;;  %v6691_v8 = vunpack.i.l.bf16 %v6690_v4 }
 0x3f2   :  { %6082 = vmatmul.mubr.msk.f32.vlgmr.msra.gmra.mrb[12].mxu0 %vm939_vm4, %v1024_v5 }
 0x3f3   :  { %v6720_v9 = vpop.eup %6719  ;;  %v6480_v11 = vpack.c.bf16 %v6692_v7, %v6691_v8  ;;  %6095 = vmatprep.mubr.msk.f32.mxu0 %vm6839_vm1, %v6840_v26 }
 0x3f4   :  { %v6685_v12 = vpop.permute.xlu1 %6684  ;;  %v1025_v13 = vmul.f32 %v6720_v9, %v7052_v28  ;;  %v26_v28 = vld [vmem:[%s7747_s2 + $0x28] sm:$0xff] }
 0x3f5   :  { %v6687_v14 = vunpack.i.h.bf16 %v6685_v12  ;;  %v6686_v15 = vunpack.i.l.bf16 %v6685_v12  ;;  %v30_v12 = vld [vmem:[%s7747_s2 + $0x48] sm:$0xff] }
 0x3f6   :  { %6089 = vmatmul.mubr.msk.f32.vlgmr.msra.gmra.mrb[18].mxu1 %vm939_vm4, %v1025_v13  ;;  %v31_v13 = vld [vmem:[%s7747_s2 + $0x50] sm:$0xff] }
 0x3f7   :  { %v6722_v16 = vpop.eup %6721  ;;  %v6477_v17 = vpack.c.bf16 %v6687_v14, %v6686_v15  ;;  %6481 = vmatpush3.bf16.msra.mxu1 %v6480_v11  ;;  %6102 = vmatprep.mubr.msk.f32.mxu1 %vm6839_vm1, %v6840_v26  ;;  %v32_v15 = vld [vmem:[%s7747_s2 + $0x58] sm:$0xff] }
 0x3f8   :  { %v1026_v23 = vmul.f32 %v6722_v16, %v7057_v31  ;;  %v6482_v31 = vpack.c.bf16 %v26_v28, %v25_v27  ;;  %v6494_v16 = vpack.c.bf16 %v32_v15, %v31_v13 }
 0x3f9   :  { %6478 = vmatpush3.bf16.msra.mxu0 %v6477_v17  ;;  %v33_v17 = vld [vmem:[%s7747_s2 + $0x60] sm:$0xff] }
 0x3fa   :  { %6483 = vmatprep.subr.bf16.mxu0 %v6482_v31 }
 0x3fb   :  { %v6724_v18 = vpop.eup %6723 }
 0x3fc   :  { %6096 = vmatmul.mubr.msk.f32.vlgmr.msra.gmra.mrb[14].mxu0 %vm939_vm4, %v1026_v23  ;;  %v1027_v19 = vmul.f32 %v6724_v18, %v7061_v33  ;;  %v6486_v33 = vpack.c.bf16 %v28_v32, %v27_v29  ;;  %v34_v23 = vld [vmem:[%s7747_s2 + $0x68] sm:$0xff]  ;;  %v35_v18 = vld [vmem:[%s7747_s2 + $0x70] sm:$0xff] }
 0x3fd   :  { %6485 = vmatpush3.bf16.msra.mxu0 %v6482_v31 }
 0x3fe   :  { %6103 = vmatmul.mubr.msk.f32.vlgmr.msra.gmra.mrb[20].mxu1 %vm939_vm4, %v1027_v19  ;;  %6487 = vmatprep.subr.bf16.mxu0 %v6486_v33  ;;  %v6498_v19 = vpack.c.bf16 %v34_v23, %v33_v17 }
 0x401   :  { %6489 = vmatpush3.bf16.msra.mxu0 %v6486_v33 }
 0x402   :  { %6499 = vmatprep.subr.bf16.mxu0 %v6498_v19 }
 0x46c   :  { %v1103_v20 = vpop.f32.mrb[8].mxu0 }
 0x46d   :  { %v6055_v21 = vpop.f32.mrb[9].mxu0 }
 0x470   :  { %v1182_v22 = vpop.f32.mrb[14].mxu1 }
 0x471   :  { %v6062_v24 = vpop.f32.mrb[15].mxu1 }
 0x472   :  { %v38_v24 = vld [vmem:[%s7747_s2 + $0x88] sm:$0xff] }
 0x4bd   :  { %v1261_v25 = vpop.f32.mrb[10].mxu0 }
 0x4be   :  { %1662 = vrot.lane.b32.xlu1 %v1261_v25, %s6847_s18  ;;  %v6069_v30 = vpop.f32.mrb[11].mxu0 }
 0x4c1   :  { %v1340_v35 = vpop.f32.mrb[16].mxu1 }
 0x4c2   :  { %1664 = vrot.lane.b32.xlu0 %v1340_v35, %s6847_s18  ;;  %v6076_v36 = vpop.f32.mrb[17].mxu1  ;;  %v5633_v35 = vld [vmem:[%s7747_s2 + $0xa2] ss:$0 sm:$0xff] }
 0x4c5   :  { %v1419_v37 = vpop.f32.mrb[12].mxu0 }
 0x4c6   :  { %1670 = vrot.lane.b32.xlu1 %v1419_v37, %s6848_s21  ;;  %v6083_v38 = vpop.f32.mrb[13].mxu0 }
 0x4c9   :  { %v1498_v40 = vpop.f32.mrb[18].mxu1 }
 0x4ca   :  { %1672 = vrot.lane.b32.xlu0 %v1498_v40, %s6848_s21  ;;  %v6090_v41 = vpop.f32.mrb[19].mxu1  ;;  %v5634_v40 = vld [vmem:[%s7747_s2 + $0xa3] ss:$0 sm:$0xff] }
 0x4cf   :  { %v1577_v42 = vpop.f32.mrb[14].mxu0 }
 0x4d0   :  { %1678 = vrot.lane.b32.xlu1 %v1577_v42, %s6849_s23  ;;  %v6097_v43 = vpop.f32.mrb[15].mxu0 }
 0x4d1   :  { %v1656_v44 = vpop.f32.mrb[20].mxu1 }
 0x4d2   :  { %1680 = vrot.lane.b32.xlu0 %v1656_v44, %s6849_s23  ;;  %v6104_v45 = vpop.f32.mrb[21].mxu1 }
 0x4d3   :  { %v39_v45 = vld [vmem:[%s7747_s2 + $0x90] sm:$0xff] }
 0x530   :  { %v1663_v46 = vpop.permute.xlu1 %1662 }
 0x531   :  { %v1684_v34 = vsel %vm280_vm2, %v1103_v20, %v1663_v46  ;;  %v36_v20 = vld [vmem:[%s7747_s2 + $0x78] sm:$0xff] }
 0x532   :  { %v6502_v21 = vpack.c.bf16 %v36_v20, %v35_v18  ;;  %v40_v46 = vld [vmem:[%s7747_s2 + $0x98] sm:$0xff]  ;;  %v5637_v20 = vld [vmem:[%s7747_s2 + $0xa6] ss:$0 sm:$0xff] }
 0x534   :  { %v1665_v47 = vpop.permute.xlu0 %1664 }
 0x535   :  { %v1685_v51 = vsel %vm280_vm2, %v1182_v22, %v1665_v47  ;;  %v37_v22 = vld [vmem:[%s7747_s2 + $0x80] sm:$0xff]  ;;  %v6510_v47 = vpack.c.bf16 %v40_v46, %v39_v45 }
 0x536   :  { %v6506_v25 = vpack.c.bf16 %v38_v24, %v37_v22 }
 0x538   :  { %v1671_v48 = vpop.permute.xlu1 %1670 }
 0x539   :  { %v1686_v39 = vsel %vm939_vm4, %v1684_v34, %v1671_v48  ;;  %v5635_v48 = vld [vmem:[%s7747_s2 + $0xa4] ss:$0 sm:$0xff] }
 0x53c   :  { %v1673_v49 = vpop.permute.xlu0 %1672 }
 0x53d   :  { %v1687_v53 = vsel %vm939_vm4, %v1685_v51, %v1673_v49 }
 0x542   :  { %v1679_v50 = vpop.permute.xlu1 %1678 }
 0x543   :  { %v1689_v52 = vsel %vm1688_vm5, %v1686_v39, %v1679_v50 }
 0x544   :  { %v1681_v54 = vpop.permute.xlu0 %1680  ;;  %6113 = vmatprep.mubr.msk.f32.mxu0 %vm81_vm0, %v1689_v52 }
 0x545   :  { %v1690_v56 = vsel %vm1688_vm5, %v1687_v53, %v1681_v54  ;;  %v5636_v53 = vld [vmem:[%s7747_s2 + $0xa5] ss:$0 sm:$0xff] }
 0x546   :  { %6114 = vmatmul.mubr.msk.f32.vlgmr.msra.gmra.mrb[16].mxu0 %vm81_vm0, %v1690_v56 }
 0x547   :  { %6501 = vmatpush3.bf16.msra.mxu0 %v6498_v19 }
 0x548   :  { %6503 = vmatprep.subr.bf16.mxu0 %v6502_v21 }
 0x54b   :  { %6505 = vmatpush3.bf16.msra.mxu0 %v6502_v21 }
 0x54c   :  { %6507 = vmatprep.subr.bf16.mxu0 %v6506_v25 }
 0x54f   :  { %6509 = vmatpush3.bf16.msra.mxu0 %v6506_v25  ;;  %v5638_v25 = vld [vmem:[%s7747_s2 + $0xa7] ss:$0 sm:$0xff] }
 0x550   :  { %6511 = vmatprep.subr.bf16.mxu0 %v6510_v47 }
 0x553   :  { %6513 = vmatpush3.bf16.msra.mxu0 %v6510_v47 }
 0x554   :  { %6167 = vmatprep.subr.mxu0 %v6840_v26 }
 0x619   :  { %v6115_v57 = vpop.f32.mrb[16].mxu0 }
 0x61a   :  { %v1769_v58 = vadd.f32 %v6115_v57, %v5632_v55  ;;  %v1763_v59 = vpop.f32.mrb[17].mxu0 }
 0x61b   :  { %v1764_v60 = vadd.f32 %v5632_v55, %v1763_v59 }
 0x61c   :  { %v1773_v61 = vadd.f32 %v1769_v58, %v6907_v10 }
 0x61d   :  { %v1772_v62 = vadd.f32 %v1764_v60, %v6891_v6  ;;  %v29_v6 = vld [vmem:[%s7747_s2 + $0x40] sm:$0xff] }
 0x61e   :  { %v1777_v63 = vsel %vm81_vm0, %v1773_v61, 0.0  ;;  %v6490_v14 = vpack.c.bf16 %v30_v12, %v29_v6  ;;  %v2005_v12 = vld [vmem:[%s7747_s2 + $0xc0] sm:$0xff] }
 0x61f   :  { %1778 = vadd.xlane.f32.xlu0 %v1777_v63  ;;  %v1774_v0 = vsel %vm81_vm0, %v1772_v62, 0.0 }
 0x620   :  { %1775 = vadd.xlane.f32.xlu1 %v1774_v0  ;;  %6491 = vmatprep.subr.bf16.mxu1 %v6490_v14 }
 0x621   :  { %6493 = vmatpush3.bf16.msra.mxu1 %v6490_v14 }
 0x622   :  { %6495 = vmatprep.subr.bf16.mxu1 %v6494_v16 }
 0x625   :  { %6497 = vmatpush3.bf16.msra.mxu1 %v6494_v16 }
 0x6ac   :  { %v1779_v1 = vpop.xlane.xlu0 %1778 }
 0x6ad   :  { %v1782_v2 = vmul.f32 0.03125, %v1779_v1  ;;  %v1776_v3 = vpop.xlane.xlu1 %1775 }
 0x6ae   :  { %v1781_v4 = vmul.f32 0.03125, %v1776_v3 }
 0x6af   :  { %v1784_v5 = vsub.f32 %v1773_v61, %v1782_v2 }
 0x6b0   :  { %v1783_v7 = vsub.f32 %v1772_v62, %v1781_v4 }
 0x6b1   :  { %v1786_v8 = vmul.f32 %v1784_v5, %v1784_v5 }
 0x6b2   :  { %v1785_v9 = vmul.f32 %v1783_v7, %v1783_v7 }
 0x6b3   :  { %v1790_v11 = vsel %vm81_vm0, %v1786_v8, 0.0 }
 0x6b4   :  { %1791 = vadd.xlane.f32.xlu1 %v1790_v11  ;;  %v1787_v10 = vsel %vm81_vm0, %v1785_v9, 0.0  ;;  %v2002_v9 = vld [vmem:[%s7747_s2 + $0xa8] sm:$0xff]  ;;  %v2003_v11 = vld [vmem:[%s7747_s2 + $0xb0] sm:$0xff] }
 0x6b5   :  { %1788 = vadd.xlane.f32.xlu0 %v1787_v10  ;;  %v2004_v10 = vld [vmem:[%s7747_s2 + $0xb8] sm:$0xff]  ;;  %v6514_v6 = vpack.c.bf16 %v2003_v11, %v2002_v9 }
 0x6b6   :  { %v6518_v13 = vpack.c.bf16 %v2005_v12, %v2004_v10 }
 0x6b7   :  { %6515 = vmatprep.subr.bf16.mxu1 %v6514_v6 }
 0x741   :  { %v1792_v27 = vpop.xlane.xlu1 %1791 }
 0x742   :  { %v1794_v28 = vmul.f32 0.03125, %v1792_v27  ;;  %v1789_v29 = vpop.xlane.xlu0 %1788 }
 0x743   :  { %v1793_v30 = vmul.f32 0.03125, %v1789_v29 }
 0x744   :  { %v1796_v31 = vadd.f32 1e-05, %v1794_v28 }
 0x745   :  { %v1795_v32 = vadd.f32 1e-05, %v1793_v30 }
 0x746   :  { %6725 = vrsqrt.f32 %v1796_v31  ;;  %v5691_v31 = vld [vmem:[%s7747_s2 + $0x148] ss:$0 sm:$0xff] }
 0x747   :  { %6727 = vrsqrt.f32 %v1795_v32 }
 0x750   :  { %v6726_v33 = vpop.eup %6725 }
 0x751   :  { %v6728_v36 = vpop.eup %6727  ;;  %v1800_v37 = vmul.f32 %v6726_v33, %v1784_v5 }
 0x752   :  { %v1799_v38 = vmul.f32 %v6728_v36, %v1783_v7 }
 0x753   :  { %v1802_v41 = vmul.f32 %v5633_v35, %v1800_v37 }
 0x754   :  { %v1801_v42 = vmul.f32 %v5633_v35, %v1799_v38 }
 0x755   :  { %v1804_v44 = vadd.f32 %v5634_v40, %v1802_v41 }
 0x756   :  { %v1803_v43 = vadd.f32 %v5634_v40, %v1801_v42 }
 0x758   :  { %6124 = vmatprep.mubr.msk.f32.mxu1 %vm81_vm0, %v1803_v43 }
 0x759   :  { %6125 = vmatmul.mubr.msk.f32.vlgmr.msra.gmra.mrb[22].mxu1 %vm81_vm0, %v1804_v44 }
 0x75a   :  { %6517 = vmatpush3.bf16.msra.mxu1 %v6514_v6 }
 0x75b   :  { %6519 = vmatprep.subr.bf16.mxu1 %v6518_v13 }
 0x75e   :  { %6521 = vmatpush3.bf16.msra.mxu1 %v6518_v13 }
 0x75f   :  { %6157 = vmatprep.subr.mxu1 %v6840_v26 }
 0x82c   :  { %v6126_v49 = vpop.f32.mrb[22].mxu1 }
 0x82d   :  { %v1883_v34 = vadd.f32 %v6126_v49, %v5635_v48  ;;  %v1877_v39 = vpop.f32.mrb[23].mxu1 }
 0x82e   :  { %v1878_v50 = vadd.f32 %v5635_v48, %v1877_v39 }
 0x82f   :  { %v1887_v52 = vmax.f32 %v1883_v34, 0.0 }
 0x830   :  { %v1886_v51 = vmax.f32 %v1878_v50, 0.0 }
 0x832   :  { %6143 = vmatprep.mubr.msk.f32.mxu0 %vm1888_vm6, %v1886_v51 }
 0x833   :  { %6144 = vmatmul.mubr.msk.f32.vlgmr.msra.gmra.mrb[18].mxu0 %vm1888_vm6, %v1887_v52 }
 0x834   :  { %6169 = vmatprep.mubr.msk.f32.mxu0 %vm6839_vm1, %v6840_v26 }
 0x906   :  { %v6145_v54 = vpop.f32.mrb[18].mxu0 }
 0x907   :  { %v1967_v56 = vadd.f32 %v6145_v54, %v5636_v53  ;;  %v1961_v55 = vpop.f32.mrb[19].mxu0 }
 0x908   :  { %v1962_v57 = vadd.f32 %v5636_v53, %v1961_v55 }
 0x909   :  { %v1971_v58 = vadd.f32 %v1967_v56, %v1804_v44 }
 0x90a   :  { %v1970_v59 = vadd.f32 %v1962_v57, %v1803_v43 }
 0x90b   :  { %v1975_v60 = vsel %vm81_vm0, %v1971_v58, 0.0 }
 0x90c   :  { %1976 = vadd.xlane.f32.xlu1 %v1975_v60  ;;  %v1972_v61 = vsel %vm81_vm0, %v1970_v59, 0.0 }
 0x90d   :  { %1973 = vadd.xlane.f32.xlu0 %v1972_v61 }
 0x999   :  { %v1977_v62 = vpop.xlane.xlu1 %1976 }
 0x99a   :  { %v1979_v63 = vmul.f32 0.03125, %v1977_v62  ;;  %v1974_v0 = vpop.xlane.xlu0 %1973 }
 0x99b   :  { %v1978_v1 = vmul.f32 0.03125, %v1974_v0 }
 0x99c   :  { %v1981_v2 = vsub.f32 %v1971_v58, %v1979_v63 }
 0x99d   :  { %v1980_v3 = vsub.f32 %v1970_v59, %v1978_v1 }
 0x99e   :  { %v1983_v4 = vmul.f32 %v1981_v2, %v1981_v2 }
 0x99f   :  { %v1982_v5 = vmul.f32 %v1980_v3, %v1980_v3 }
 0x9a0   :  { %v1987_v7 = vsel %vm81_vm0, %v1983_v4, 0.0 }
 0x9a1   :  { %1988 = vadd.xlane.f32.xlu1 %v1987_v7  ;;  %v1984_v8 = vsel %vm81_vm0, %v1982_v5, 0.0 }
 0x9a2   :  { %1985 = vadd.xlane.f32.xlu0 %v1984_v8 }
 0xa2e   :  { %v1989_v14 = vpop.xlane.xlu1 %1988 }
 0xa2f   :  { %v1991_v15 = vmul.f32 0.03125, %v1989_v14  ;;  %v1986_v16 = vpop.xlane.xlu0 %1985 }
 0xa30   :  { %v1990_v17 = vmul.f32 0.03125, %v1986_v16 }
 0xa31   :  { %v1993_v23 = vadd.f32 1e-05, %v1991_v15 }
 0xa32   :  { %v1992_v18 = vadd.f32 1e-05, %v1990_v17 }
 0xa33   :  { %6729 = vrsqrt.f32 %v1993_v23 }
 0xa34   :  { %6731 = vrsqrt.f32 %v1992_v18 }
 0xa3d   :  { %v6730_v19 = vpop.eup %6729 }
 0xa3e   :  { %v6732_v21 = vpop.eup %6731  ;;  %v1997_v22 = vmul.f32 %v6730_v19, %v1981_v2 }
 0xa3f   :  { %v1996_v24 = vmul.f32 %v6732_v21, %v1980_v3 }
 0xa40   :  { %v1999_v27 = vmul.f32 %v5637_v20, %v1997_v22 }
 0xa41   :  { %v1998_v28 = vmul.f32 %v5637_v20, %v1996_v24 }
 0xa42   :  { %v7216_v30 = vadd.f32 %v5638_v25, %v1999_v27 }
 0xa43   :  { %v7214_v29 = vadd.f32 %v5638_v25, %v1998_v28 }
 0xa45   :  { %6154 = vmatprep.mubr.msk.f32.mxu1 %vm81_vm0, %v7214_v29 }
 0xa46   :  { %6155 = vmatmul.mubr.msk.f32.vlgmr.msra.gmra.mrb[24].mxu1 %vm81_vm0, %v7216_v30 }
 0xa47   :  { %6159 = vmatprep.mubr.msk.f32.mxu1 %vm6839_vm1, %v6840_v26 }
 0xb19   :  { %v6156_v32 = vpop.f32.mrb[24].mxu1 }
 0xb1a   :  { %v7227_v33 = vadd.f32 %v6156_v32, %v5691_v31  ;;  %v2134_v35 = vpop.f32.mrb[25].mxu1 }
 0xb1b   :  { %v7233_v36 = vadd.f32 %v5691_v31, %v2134_v35 }
 0xb1c   :  { %2380 = vrot.lane.b32.xlu0 %v7227_v33, %s6844_s9  ;;  %2222 = vrot.lane.b32.xlu1 %v7227_v33, %s6837_s22 }
 0xb20   :  { %2301 = vrot.lane.b32.xlu1 %v7233_v36, %s6844_s9  ;;  %2144 = vrot.lane.b32.xlu0 %v7233_v36, %s6837_s22 }
 0xb24   :  { %2299 = vrot.lane.b32.xlu1 %v7233_v36, %s6841_s1  ;;  %2378 = vrot.lane.b32.xlu0 %v7227_v33, %s6841_s1 }
 0xb28   :  { %2459 = vrot.lane.b32.xlu1 %v7233_v36, %s6845_s10  ;;  %2538 = vrot.lane.b32.xlu0 %v7227_v33, %s6845_s10 }
 0xb2c   :  { %2457 = vrot.lane.b32.xlu1 %v7233_v36, %s6842_s7  ;;  %2536 = vrot.lane.b32.xlu0 %v7227_v33, %s6842_s7 }
 0xb30   :  { %2617 = vrot.lane.b32.xlu1 %v7233_v36, %s6846_s11  ;;  %2696 = vrot.lane.b32.xlu0 %v7227_v33, %s6846_s11 }
 0xb34   :  { %2615 = vrot.lane.b32.xlu1 %v7233_v36, %s6843_s8  ;;  %2694 = vrot.lane.b32.xlu0 %v7227_v33, %s6843_s8 }
 0xb8e   :  { %v2381_v37 = vpop.permute.xlu0 %2380  ;;  %v2223_v38 = vpop.permute.xlu1 %2222 }
 0xb92   :  { %v2302_v40 = vpop.permute.xlu1 %2301  ;;  %v2145_v41 = vpop.permute.xlu0 %2144 }
 0xb93   :  { %6158 = vmatpush3.xpose.msk.msra.mxu1 %vm280_vm2, %v2145_v41  ;;  %6168 = vmatpush3.xpose.msk.msra.mxu0 %vm280_vm2, %v2302_v40 }
 0xb94   :  { %6162 = vmatprep.subr.mxu1 %v6840_v26  ;;  %6177 = vmatprep.subr.mxu0 %v6840_v26 }
 0xb96   :  { %v2300_v42 = vpop.permute.xlu1 %2299  ;;  %6160 = vmatmul.mubr.msk.f32.vlgmr.msra.gmra.mrb[26].mxu1 %vm280_vm2, %v7233_v36  ;;  %v2379_v43 = vpop.permute.xlu0 %2378 }
 0xb97   :  { %6163 = vmatpush3.xpose.msk.msra.mxu1 %vm280_vm2, %v2223_v38  ;;  %6170 = vmatmul.mubr.msk.f32.vlgmr.msra.gmra.mrb[20].mxu0 %vm280_vm2, %v2300_v42 }
 0xb98   :  { %6164 = vmatprep.mubr.msk.f32.mxu1 %vm6839_vm1, %v6840_v26  ;;  %6172 = vmatprep.subr.mxu1 %v6840_v26 }
 0xb99   :  { %6179 = vmatprep.mubr.msk.f32.mxu0 %vm6839_vm1, %v6840_v26 }
 0xb9a   :  { %v2460_v44 = vpop.permute.xlu1 %2459  ;;  %6165 = vmatmul.mubr.msk.f32.vlgmr.msra.gmra.mrb[28].mxu1 %vm280_vm2, %v7227_v33  ;;  %v2539_v45 = vpop.permute.xlu0 %2538 }
 0xb9b   :  { %6173 = vmatpush3.xpose.msk.msra.mxu1 %vm280_vm2, %v2381_v37  ;;  %6178 = vmatpush3.xpose.msk.msra.mxu0 %vm280_vm2, %v2460_v44 }
 0xb9c   :  { %6174 = vmatprep.mubr.msk.f32.mxu1 %vm6839_vm1, %v6840_v26  ;;  %6182 = vmatprep.subr.mxu1 %v6840_v26 }
 0xb9d   :  { %6187 = vmatprep.subr.mxu0 %v6840_v26 }
 0xb9e   :  { %v2458_v46 = vpop.permute.xlu1 %2457  ;;  %6175 = vmatmul.mubr.msk.f32.vlgmr.msra.gmra.mrb[30].mxu1 %vm280_vm2, %v2379_v43  ;;  %v2537_v47 = vpop.permute.xlu0 %2536 }
 0xb9f   :  { %6180 = vmatmul.mubr.msk.f32.vlgmr.msra.gmra.mrb[22].mxu0 %vm280_vm2, %v2458_v46  ;;  %6183 = vmatpush3.xpose.msk.msra.mxu1 %vm280_vm2, %v2539_v45 }
 0xba0   :  { %6184 = vmatprep.mubr.msk.f32.mxu1 %vm6839_vm1, %v6840_v26  ;;  %6192 = vmatprep.subr.mxu1 %v6840_v26 }
 0xba1   :  { %6189 = vmatprep.mubr.msk.f32.mxu0 %vm6839_vm1, %v6840_v26 }
 0xba2   :  { %v2618_v48 = vpop.permute.xlu1 %2617  ;;  %6185 = vmatmul.mubr.msk.f32.vlgmr.msra.gmra.mrb[32].mxu1 %vm280_vm2, %v2537_v47  ;;  %v2697_v49 = vpop.permute.xlu0 %2696 }
 0xba3   :  { %6188 = vmatpush3.xpose.msk.msra.mxu0 %vm280_vm2, %v2618_v48  ;;  %6193 = vmatpush3.xpose.msk.msra.mxu1 %vm280_vm2, %v2697_v49 }
 0xba4   :  { %6194 = vmatprep.mubr.msk.f32.mxu1 %vm6839_vm1, %v6840_v26  ;;  %6197 = vmatprep.subr.mxu0 %v6840_v26 }
 0xba5   :  { %6202 = vmatprep.subr.mxu1 %v6840_v26 }
 0xba6   :  { %v2616_v34 = vpop.permute.xlu1 %2615  ;;  %v2695_v39 = vpop.permute.xlu0 %2694 }
 0xba7   :  { %6190 = vmatmul.mubr.msk.f32.vlgmr.msra.gmra.mrb[24].mxu0 %vm280_vm2, %v2616_v34  ;;  %6195 = vmatmul.mubr.msk.f32.vlgmr.msra.gmra.mrb[34].mxu1 %vm280_vm2, %v2695_v39 }
 0xba8   :  { %6199 = vmatprep.mubr.msk.f32.mxu0 %vm6839_vm1, %v6840_v26  ;;  %6204 = vmatprep.mubr.msk.f32.mxu1 %vm6839_vm1, %v6840_v26 }
 0xc69   :  { %v2216_v50 = vpop.f32.mrb[26].mxu1 }
 0xc6a   :  { %v2220_v51 = vmul.f32 0.35355338, %v2216_v50  ;;  %v6161_v52 = vpop.f32.mrb[27].mxu1  ;;  %v2373_v53 = vpop.f32.mrb[20].mxu0 }
 0xc6b   :  { %v6171_v54 = vpop.f32.mrb[21].mxu0  ;;  %v2377_v59 = vmul.f32 0.35355338, %v2373_v53 }
 0xc6c   :  { %v2773_v56 = vsel %vm280_vm2, %v2220_v51, -inf }
 0xc6d   :  { %2774 = vmax.xlane.f32.xlu1 %v2773_v56  ;;  %v2294_v55 = vpop.f32.mrb[28].mxu1  ;;  %v2779_v3 = vsel %vm280_vm2, %v2377_v59, -inf }
 0xc6e   :  { %v2298_v57 = vmul.f32 0.35355338, %v2294_v55  ;;  %v6166_v58 = vpop.f32.mrb[29].mxu1 }
 0xc70   :  { %v2776_v60 = vsel %vm280_vm2, %v2298_v57, -inf }
 0xc71   :  { %2777 = vmax.xlane.f32.xlu0 %v2776_v60  ;;  %v2452_v61 = vpop.f32.mrb[30].mxu1 }
 0xc72   :  { %v2456_v62 = vmul.f32 0.35355338, %v2452_v61  ;;  %v6176_v63 = vpop.f32.mrb[31].mxu1  ;;  %v2531_v0 = vpop.f32.mrb[22].mxu0 }
 0xc73   :  { %v6181_v1 = vpop.f32.mrb[23].mxu0  ;;  %v2535_v2 = vmul.f32 0.35355338, %v2531_v0 }
 0xc74   :  { %v2782_v4 = vsel %vm280_vm2, %v2456_v62, -inf }
 0xc75   :  { %2780 = vmax.xlane.f32.xlu0 %v2779_v3  ;;  %2783 = vmax.xlane.f32.xlu1 %v2782_v4  ;;  %v2610_v5 = vpop.f32.mrb[32].mxu1  ;;  %v2785_v9 = vsel %vm280_vm2, %v2535_v2, -inf }
 0xc76   :  { %v2614_v7 = vmul.f32 0.35355338, %v2610_v5  ;;  %v6186_v8 = vpop.f32.mrb[33].mxu1 }
 0xc78   :  { %v2788_v11 = vsel %vm280_vm2, %v2614_v7, -inf }
 0xc79   :  { %2786 = vmax.xlane.f32.xlu0 %v2785_v9  ;;  %2789 = vmax.xlane.f32.xlu1 %v2788_v11 }
 0xc7a   :  { %v2689_v10 = vpop.f32.mrb[24].mxu0  ;;  %v2768_v6 = vpop.f32.mrb[34].mxu1 }
 0xc7b   :  { %v2693_v12 = vmul.f32 0.35355338, %v2689_v10  ;;  %v2772_v13 = vmul.f32 0.35355338, %v2768_v6  ;;  %v6191_v14 = vpop.f32.mrb[25].mxu0  ;;  %v6196_v15 = vpop.f32.mrb[35].mxu1 }
 0xc7d   :  { %v2791_v16 = vsel %vm280_vm2, %v2693_v12, -inf  ;;  %v2794_v17 = vsel %vm280_vm2, %v2772_v13, -inf }
 0xc7e   :  { %2792 = vmax.xlane.f32.xlu0 %v2791_v16  ;;  %2795 = vmax.xlane.f32.xlu1 %v2794_v17 }
 0xc8f   :  { %2937 = vrot.lane.b32.xlu1 %v7227_v33, %s6850_s6 }
 0xc93   :  { %3013 = vrot.lane.b32.xlu1 %v7233_v36, %s6851_s12 }
 0xc94   :  { %2861 = vrot.lane.b32.xlu0 %v7233_v36, %s6850_s6 }
 0xc97   :  { %3165 = vrot.lane.b32.xlu1 %v7233_v36, %s6852_s13 }
 0xc98   :  { %3089 = vrot.lane.b32.xlu0 %v7227_v33, %s6851_s12 }
 0xc9c   :  { %3241 = vrot.lane.b32.xlu0 %v7227_v33, %s6852_s13 }
 0xcfa   :  { %v2775_v23 = vpop.xlane.xlu1 %2774 }
 0xcfb   :  { %v2797_v18 = vsub.f32 %v2220_v51, %v2775_v23 }
 0xcfd   :  { %v2805_v19 = vmul.f32 1.442695, %v2797_v18 }
 0xcfe   :  { %v2778_v20 = vpop.xlane.xlu0 %2777 }
 0xcff   :  { %6733 = vpow2.f32 %v2805_v19  ;;  %v2798_v21 = vsub.f32 %v2298_v57, %v2778_v20 }
 0xd01   :  { %v2807_v22 = vmul.f32 1.442695, %v2798_v21 }
 0xd02   :  { %v2784_v24 = vpop.xlane.xlu1 %2783  ;;  %v2781_v25 = vpop.xlane.xlu0 %2780 }
 0xd03   :  { %6735 = vpow2.f32 %v2807_v22  ;;  %v2800_v27 = vsub.f32 %v2456_v62, %v2784_v24  ;;  %v2799_v28 = vsub.f32 %v2377_v59, %v2781_v25 }
 0xd05   :  { %v2811_v31 = vmul.f32 1.442695, %v2800_v27  ;;  %v2809_v32 = vmul.f32 1.442695, %v2799_v28 }
 0xd06   :  { %v2790_v35 = vpop.xlane.xlu1 %2789  ;;  %v2787_v37 = vpop.xlane.xlu0 %2786 }
 0xd07   :  { %6737 = vpow2.f32 %v2811_v31  ;;  %v2802_v38 = vsub.f32 %v2614_v7, %v2790_v35  ;;  %v2801_v40 = vsub.f32 %v2535_v2, %v2787_v37  ;;  %v2007_v35 = vld [vmem:[%s7747_s2 + $0xd0] sm:$0xff] }
 0xd08   :  { %6739 = vpow2.f32 %v2809_v32  ;;  %v2006_v32 = vld [vmem:[%s7747_s2 + $0xc8] sm:$0xff] }
 0xd09   :  { %v6734_v41 = vpop.eup %6733  ;;  %v2815_v42 = vmul.f32 1.442695, %v2802_v38  ;;  %v2813_v43 = vmul.f32 1.442695, %v2801_v40  ;;  %v6522_v37 = vpack.c.bf16 %v2007_v35, %v2006_v32  ;;  %v2017_v32 = vld [vmem:[%s7747_s2 + $0x120] sm:$0xff] }
 0xd0a   :  { %v2821_v44 = vsel %vm280_vm2, %v6734_v41, 0.0 }
 0xd0b   :  { %6741 = vpow2.f32 %v2815_v42  ;;  %2822 = vadd.xlane.f32.xlu0 %v2821_v44  ;;  %v2796_v45 = vpop.xlane.xlu1 %2795  ;;  %v2793_v46 = vpop.xlane.xlu0 %2792  ;;  %v2009_v42 = vld [vmem:[%s7747_s2 + $0xe0] sm:$0xff] }
 0xd0c   :  { %6743 = vpow2.f32 %v2813_v43  ;;  %v2804_v47 = vsub.f32 %v2772_v13, %v2796_v45  ;;  %v2803_v48 = vsub.f32 %v2693_v12, %v2793_v46 }
 0xd0d   :  { %v6736_v49 = vpop.eup %6735 }
 0xd0e   :  { %v2819_v34 = vmul.f32 1.442695, %v2804_v47  ;;  %v2817_v39 = vmul.f32 1.442695, %v2803_v48  ;;  %v2824_v50 = vsel %vm280_vm2, %v6736_v49, 0.0 }
 0xd0f   :  { %v2938_v51 = vpop.permute.xlu1 %2937  ;;  %2825 = vadd.xlane.f32.xlu1 %v2824_v50  ;;  %v2862_v52 = vpop.permute.xlu0 %2861 }
 0xd10   :  { %6745 = vpow2.f32 %v2819_v34  ;;  %6198 = vmatpush3.msra.mxu0 %v2862_v52  ;;  %6203 = vmatpush3.msra.mxu1 %v2938_v51 }
 0xd11   :  { %v6738_v53 = vpop.eup %6737  ;;  %6747 = vpow2.f32 %v2817_v39  ;;  %6207 = vmatprep.subr.mxu0 %v6840_v26  ;;  %6212 = vmatprep.subr.mxu1 %v6840_v26 }
 0xd12   :  { %v6740_v54 = vpop.eup %6739  ;;  %v2830_v56 = vsel %vm280_vm2, %v6738_v53, 0.0 }
 0xd13   :  { %2831 = vadd.xlane.f32.xlu1 %v2830_v56  ;;  %v2827_v55 = vsel %vm280_vm2, %v6740_v54, 0.0  ;;  %v3090_v1 = vpop.permute.xlu0 %3089  ;;  %v3014_v2 = vpop.permute.xlu1 %3013 }
 0xd14   :  { %2828 = vadd.xlane.f32.xlu0 %v2827_v55 }
 0xd15   :  { %v6742_v57 = vpop.eup %6741 }
 0xd16   :  { %v6744_v58 = vpop.eup %6743  ;;  %v2836_v59 = vsel %vm280_vm2, %v6742_v57, 0.0 }
 0xd17   :  { %2837 = vadd.xlane.f32.xlu1 %v2836_v59  ;;  %v2833_v60 = vsel %vm280_vm2, %v6744_v58, 0.0  ;;  %v3242_v3 = vpop.permute.xlu0 %3241  ;;  %v3166_v4 = vpop.permute.xlu1 %3165 }
 0xd18   :  { %2834 = vadd.xlane.f32.xlu0 %v2833_v60 }
 0xd1a   :  { %v7329_v61 = vpop.eup %6745 }
 0xd1b   :  { %v7331_v62 = vpop.eup %6747  ;;  %v2842_v63 = vsel %vm280_vm2, %v7329_v61, 0.0 }
 0xd1c   :  { %2843 = vadd.xlane.f32.xlu1 %v2842_v63  ;;  %v2839_v0 = vsel %vm280_vm2, %v7331_v62, 0.0 }
 0xd1d   :  { %2840 = vadd.xlane.f32.xlu0 %v2839_v0 }
 0xd2d   :  { %3317 = vrot.lane.b32.xlu1 %v7233_v36, %s6853_s14 }
 0xd33   :  { %3393 = vrot.lane.b32.xlu0 %v7227_v33, %s6853_s14 }
 0xd98   :  { %v2823_v5 = vpop.xlane.xlu0 %2822 }
 0xd99   :  { %6749 = vrcp.f32 %v2823_v5 }
 0xd9c   :  { %v2826_v7 = vpop.xlane.xlu1 %2825 }
 0xd9d   :  { %6751 = vrcp.f32 %v2826_v7 }
 0xda0   :  { %v2832_v8 = vpop.xlane.xlu1 %2831 }
 0xda1   :  { %6753 = vrcp.f32 %v2832_v8  ;;  %v2829_v9 = vpop.xlane.xlu0 %2828 }
 0xda2   :  { %6755 = vrcp.f32 %v2829_v9 }
 0xda3   :  { %v6750_v11 = vpop.eup %6749 }
 0xda4   :  { %v2853_v10 = vmul.f32 %v6750_v11, %v6734_v41  ;;  %v2838_v6 = vpop.xlane.xlu1 %2837  ;;  %v2008_v41 = vld [vmem:[%s7747_s2 + $0xd8] sm:$0xff] }
 0xda5   :  { %6757 = vrcp.f32 %v2838_v6  ;;  %v2835_v36 = vpop.xlane.xlu0 %2834  ;;  %v6526_v43 = vpack.c.bf16 %v2009_v42, %v2008_v41 }
 0xda6   :  { %6759 = vrcp.f32 %v2835_v36  ;;  %6200 = vmatmul.mubr.msk.f32.vlgmr.msra.gmra.mrb[26].mxu0 %vm280_vm2, %v2853_v10 }
 0xda7   :  { %v6752_v33 = vpop.eup %6751  ;;  %6208 = vmatpush3.msra.mxu0 %v3014_v2  ;;  %6209 = vmatprep.mubr.msk.f32.mxu0 %vm6839_vm1, %v6840_v26 }
 0xda8   :  { %v2854_v12 = vmul.f32 %v6752_v33, %v6736_v49  ;;  %6217 = vmatprep.subr.mxu0 %v6840_v26 }
 0xda9   :  { %v2844_v13 = vpop.xlane.xlu1 %2843 }
 0xdaa   :  { %6761 = vrcp.f32 %v2844_v13  ;;  %v2841_v14 = vpop.xlane.xlu0 %2840  ;;  %6205 = vmatmul.mubr.msk.f32.vlgmr.msra.gmra.mrb[36].mxu1 %vm280_vm2, %v2854_v12 }
 0xdab   :  { %v6754_v15 = vpop.eup %6753  ;;  %6763 = vrcp.f32 %v2841_v14  ;;  %6213 = vmatpush3.msra.mxu1 %v3090_v1  ;;  %6214 = vmatprep.mubr.msk.f32.mxu1 %vm6839_vm1, %v6840_v26 }
 0xdac   :  { %v6756_v16 = vpop.eup %6755  ;;  %v2856_v17 = vmul.f32 %v6754_v15, %v6738_v53  ;;  %6222 = vmatprep.subr.mxu1 %v6840_v26 }
 0xdad   :  { %v2855_v23 = vmul.f32 %v6756_v16, %v6740_v54  ;;  %v3318_v24 = vpop.permute.xlu1 %3317 }
 0xdae   :  { %6215 = vmatmul.mubr.msk.f32.vlgmr.msra.gmra.mrb[38].mxu1 %vm280_vm2, %v2856_v17  ;;  %v3394_v22 = vpop.permute.xlu0 %3393 }
 0xdaf   :  { %v6758_v18 = vpop.eup %6757  ;;  %6210 = vmatmul.mubr.msk.f32.vlgmr.msra.gmra.mrb[28].mxu0 %vm280_vm2, %v2855_v23  ;;  %6223 = vmatpush3.msra.mxu1 %v3242_v3 }
 0xdb0   :  { %v6760_v19 = vpop.eup %6759  ;;  %v2858_v20 = vmul.f32 %v6758_v18, %v6742_v57  ;;  %6218 = vmatpush3.msra.mxu0 %v3166_v4  ;;  %6219 = vmatprep.mubr.msk.f32.mxu0 %vm6839_vm1, %v6840_v26  ;;  %v5684_v4 = vld [vmem:[%s7747_s2 + $0x149] ss:$0 sm:$0xff] }
 0xdb1   :  { %v2857_v21 = vmul.f32 %v6760_v19, %v6744_v58  ;;  %6224 = vmatprep.mubr.msk.f32.mxu1 %vm6839_vm1, %v6840_v26  ;;  %6227 = vmatprep.subr.mxu0 %v6840_v26  ;;  %v2011_v19 = vld [vmem:[%s7747_s2 + $0xf0] sm:$0xff] }
 0xdb2   :  { %6232 = vmatprep.subr.mxu1 %v6840_v26  ;;  %6225 = vmatmul.mubr.msk.f32.vlgmr.msra.gmra.mrb[40].mxu1 %vm280_vm2, %v2858_v20 }
 0xdb3   :  { %6220 = vmatmul.mubr.msk.f32.vlgmr.msra.gmra.mrb[30].mxu0 %vm280_vm2, %v2857_v21  ;;  %6233 = vmatpush3.msra.mxu1 %v3394_v22  ;;  %v2012_v21 = vld [vmem:[%s7747_s2 + $0xf8] sm:$0xff]  ;;  %v2013_v22 = vld [vmem:[%s7747_s2 + $0x100] sm:$0xff] }
 0xdb4   :  { %v6762_v25 = vpop.eup %6761  ;;  %6228 = vmatpush3.msra.mxu0 %v3318_v24  ;;  %6229 = vmatprep.mubr.msk.f32.mxu0 %vm6839_vm1, %v6840_v26  ;;  %v6534_v24 = vpack.c.bf16 %v2013_v22, %v2012_v21 }
 0xdb5   :  { %v6764_v27 = vpop.eup %6763  ;;  %v2860_v28 = vmul.f32 %v6762_v25, %v7329_v61  ;;  %6234 = vmatprep.mubr.msk.f32.mxu1 %vm6839_vm1, %v6840_v26  ;;  %6523 = vmatprep.subr.bf16.mxu0 %v6522_v37  ;;  %v2014_v25 = vld [vmem:[%s7747_s2 + $0x108] sm:$0xff] }
 0xdb6   :  { %v2859_v31 = vmul.f32 %v6764_v27, %v7331_v62  ;;  %v2015_v27 = vld [vmem:[%s7747_s2 + $0x110] sm:$0xff] }
 0xdb7   :  { %6235 = vmatmul.mubr.msk.f32.vlgmr.msra.gmra.mrb[42].mxu1 %vm280_vm2, %v2860_v28  ;;  %v2016_v28 = vld [vmem:[%s7747_s2 + $0x118] sm:$0xff] }
 0xdb8   :  { %6230 = vmatmul.mubr.msk.f32.vlgmr.msra.gmra.mrb[32].mxu0 %vm280_vm2, %v2859_v31  ;;  %v6538_v31 = vpack.c.bf16 %v2015_v27, %v2014_v25  ;;  %v6542_v35 = vpack.c.bf16 %v2017_v32, %v2016_v28  ;;  %v5689_v32 = vld [vmem:[%s7747_s2 + $0x14e] ss:$0 sm:$0xff] }
 0xdb9   :  { %6525 = vmatpush3.bf16.msra.mxu0 %v6522_v37  ;;  %v2018_v37 = vld [vmem:[%s7747_s2 + $0x128] sm:$0xff] }
 0xdba   :  { %6527 = vmatprep.subr.bf16.mxu0 %v6526_v43 }
 0xdbd   :  { %6529 = vmatpush3.bf16.msra.mxu0 %v6526_v43 }
 0xdbe   :  { %6539 = vmatprep.subr.bf16.mxu0 %v6538_v31 }
 0xe79   :  { %v2933_v38 = vpop.f32.mrb[26].mxu0 }
 0xe7a   :  { %v6201_v40 = vpop.f32.mrb[27].mxu0 }
 0xe7d   :  { %v3009_v44 = vpop.f32.mrb[36].mxu1 }
 0xe7e   :  { %v6206_v45 = vpop.f32.mrb[37].mxu1 }
 0xe81   :  { %v3161_v46 = vpop.f32.mrb[38].mxu1 }
 0xe82   :  { %v3085_v47 = vpop.f32.mrb[28].mxu0  ;;  %3473 = vrot.lane.b32.xlu0 %v3161_v46, %s6847_s18  ;;  %v6216_v48 = vpop.f32.mrb[39].mxu1 }
 0xe83   :  { %3471 = vrot.lane.b32.xlu1 %v3085_v47, %s6847_s18  ;;  %v6211_v49 = vpop.f32.mrb[29].mxu0  ;;  %v5685_v48 = vld [vmem:[%s7747_s2 + $0x14a] ss:$0 sm:$0xff] }
 0xe85   :  { %v3313_v34 = vpop.f32.mrb[40].mxu1 }
 0xe86   :  { %v3237_v39 = vpop.f32.mrb[30].mxu0  ;;  %3481 = vrot.lane.b32.xlu0 %v3313_v34, %s6848_s21  ;;  %v6226_v50 = vpop.f32.mrb[41].mxu1 }
 0xe87   :  { %3479 = vrot.lane.b32.xlu1 %v3237_v39, %s6848_s21  ;;  %v6221_v51 = vpop.f32.mrb[31].mxu0  ;;  %v5686_v50 = vld [vmem:[%s7747_s2 + $0x14b] ss:$0 sm:$0xff] }
 0xe8a   :  { %v3465_v52 = vpop.f32.mrb[42].mxu1 }
 0xe8b   :  { %v3389_v53 = vpop.f32.mrb[32].mxu0  ;;  %3489 = vrot.lane.b32.xlu0 %v3465_v52, %s6849_s23  ;;  %v6236_v54 = vpop.f32.mrb[43].mxu1 }
 0xe8c   :  { %3487 = vrot.lane.b32.xlu1 %v3389_v53, %s6849_s23  ;;  %v6231_v56 = vpop.f32.mrb[33].mxu0 }
 0xe8d   :  { %v2020_v56 = vld [vmem:[%s7747_s2 + $0x138] sm:$0xff] }
 0xef4   :  { %v3474_v55 = vpop.permute.xlu0 %3473 }
 0xef5   :  { %v3472_v57 = vpop.permute.xlu1 %3471  ;;  %v3494_v60 = vsel %vm280_vm2, %v3009_v44, %v3474_v55  ;;  %v2021_v55 = vld [vmem:[%s7747_s2 + $0x140] sm:$0xff] }
 0xef6   :  { %v3493_v61 = vsel %vm280_vm2, %v2933_v38, %v3472_v57  ;;  %v2019_v38 = vld [vmem:[%s7747_s2 + $0x130] sm:$0xff]  ;;  %v6550_v57 = vpack.c.bf16 %v2021_v55, %v2020_v56 }
 0xef7   :  { %v6546_v40 = vpack.c.bf16 %v2019_v38, %v2018_v37 }
 0xef8   :  { %v3482_v58 = vpop.permute.xlu0 %3481 }
 0xef9   :  { %v3480_v59 = vpop.permute.xlu1 %3479  ;;  %v3496_v62 = vsel %vm939_vm4, %v3494_v60, %v3482_v58  ;;  %v5687_v58 = vld [vmem:[%s7747_s2 + $0x14c] ss:$0 sm:$0xff] }
 0xefa   :  { %v3495_v0 = vsel %vm939_vm4, %v3493_v61, %v3480_v59 }
 0xefd   :  { %v3490_v63 = vpop.permute.xlu0 %3489 }
 0xefe   :  { %v3488_v1 = vpop.permute.xlu1 %3487  ;;  %v3498_v2 = vsel %vm1688_vm5, %v3496_v62, %v3490_v63 }
 0xeff   :  { %v3497_v3 = vsel %vm1688_vm5, %v3495_v0, %v3488_v1  ;;  %v5688_v1 = vld [vmem:[%s7747_s2 + $0x14d] ss:$0 sm:$0xff] }
 0xf00   :  { %6245 = vmatprep.mubr.msk.f32.mxu0 %vm81_vm0, %v3497_v3 }
 0xf01   :  { %6246 = vmatmul.mubr.msk.f32.vlgmr.msra.gmra.mrb[34].mxu0 %vm81_vm0, %v3498_v2 }
 0xf02   :  { %6541 = vmatpush3.bf16.msra.mxu0 %v6538_v31 }
 0xf03   :  { %6543 = vmatprep.subr.bf16.mxu0 %v6542_v35 }
 0xf06   :  { %6545 = vmatpush3.bf16.msra.mxu0 %v6542_v35 }
 0xf07   :  { %6547 = vmatprep.subr.bf16.mxu0 %v6546_v40 }
 0xf0a   :  { %6549 = vmatpush3.bf16.msra.mxu0 %v6546_v40  ;;  %v5690_v40 = vld [vmem:[%s7747_s2 + $0x14f] ss:$0 sm:$0xff] }
 0xf0b   :  { %6551 = vmatprep.subr.bf16.mxu0 %v6550_v57 }
 0xf0e   :  { %6553 = vmatpush3.bf16.msra.mxu0 %v6550_v57 }
 0xf0f   :  { %6299 = vmatprep.subr.mxu0 %v6840_v26 }
 0xfd4   :  { %v6247_v5 = vpop.f32.mrb[34].mxu0 }
 0xfd5   :  { %v3577_v7 = vadd.f32 %v6247_v5, %v5684_v4  ;;  %v3571_v8 = vpop.f32.mrb[35].mxu0 }
 0xfd6   :  { %v3572_v9 = vadd.f32 %v5684_v4, %v3571_v8 }
 0xfd7   :  { %v3581_v11 = vadd.f32 %v3577_v7, %v7216_v30 }
 0xfd8   :  { %v3580_v10 = vadd.f32 %v3572_v9, %v7214_v29  ;;  %v2010_v29 = vld [vmem:[%s7747_s2 + $0xe8] sm:$0xff] }
 0xfd9   :  { %v3585_v6 = vsel %vm81_vm0, %v3581_v11, 0.0  ;;  %v6530_v20 = vpack.c.bf16 %v2011_v19, %v2010_v29  ;;  %v3810_v29 = vld [vmem:[%s7747_s2 + $0x160] sm:$0xff]  ;;  %v3811_v19 = vld [vmem:[%s7747_s2 + $0x168] sm:$0xff] }
 0xfda   :  { %3586 = vadd.xlane.f32.xlu0 %v3585_v6  ;;  %v3582_v36 = vsel %vm81_vm0, %v3580_v10, 0.0 }
 0xfdb   :  { %3583 = vadd.xlane.f32.xlu1 %v3582_v36  ;;  %6531 = vmatprep.subr.bf16.mxu1 %v6530_v20 }
 0xfdc   :  { %6533 = vmatpush3.bf16.msra.mxu1 %v6530_v20  ;;  %v6558_v20 = vpack.c.bf16 %v3811_v19, %v3810_v29 }
 0xfdd   :  { %6535 = vmatprep.subr.bf16.mxu1 %v6534_v24 }
 0xfe0   :  { %6537 = vmatpush3.bf16.msra.mxu1 %v6534_v24 }
0x1067   :  { %v3587_v33 = vpop.xlane.xlu0 %3586 }
0x1068   :  { %v3589_v12 = vmul.f32 0.03125, %v3587_v33  ;;  %v3584_v13 = vpop.xlane.xlu1 %3583 }
0x1069   :  { %v3588_v14 = vmul.f32 0.03125, %v3584_v13 }
0x106a   :  { %v3591_v15 = vsub.f32 %v3581_v11, %v3589_v12 }
0x106b   :  { %v3590_v16 = vsub.f32 %v3580_v10, %v3588_v14 }
0x106c   :  { %v3593_v17 = vmul.f32 %v3591_v15, %v3591_v15 }
0x106d   :  { %v3592_v23 = vmul.f32 %v3590_v16, %v3590_v16 }
0x106e   :  { %v3597_v18 = vsel %vm81_vm0, %v3593_v17, 0.0 }
0x106f   :  { %3598 = vadd.xlane.f32.xlu1 %v3597_v18  ;;  %v3594_v30 = vsel %vm81_vm0, %v3592_v23, 0.0  ;;  %v3808_v23 = vld [vmem:[%s7747_s2 + $0x150] sm:$0xff]  ;;  %v3809_v18 = vld [vmem:[%s7747_s2 + $0x158] sm:$0xff] }
0x1070   :  { %3595 = vadd.xlane.f32.xlu0 %v3594_v30  ;;  %v6554_v30 = vpack.c.bf16 %v3809_v18, %v3808_v23 }
0x1072   :  { %6555 = vmatprep.subr.bf16.mxu1 %v6554_v30 }
0x10fc   :  { %v3599_v41 = vpop.xlane.xlu1 %3598 }
0x10fd   :  { %v3601_v42 = vmul.f32 0.03125, %v3599_v41  ;;  %v3596_v43 = vpop.xlane.xlu0 %3595 }
0x10fe   :  { %v3600_v44 = vmul.f32 0.03125, %v3596_v43 }
0x10ff   :  { %v3603_v45 = vadd.f32 1e-05, %v3601_v42 }
0x1100   :  { %v3602_v46 = vadd.f32 1e-05, %v3600_v44 }
0x1101   :  { %6765 = vrsqrt.f32 %v3603_v45  ;;  %v5731_v45 = vld [vmem:[%s7747_s2 + $0x1f0] ss:$0 sm:$0xff] }
0x1102   :  { %6767 = vrsqrt.f32 %v3602_v46 }
0x110b   :  { %v6766_v47 = vpop.eup %6765 }
0x110c   :  { %v6768_v49 = vpop.eup %6767  ;;  %v3607_v34 = vmul.f32 %v6766_v47, %v3591_v15 }
0x110d   :  { %v3606_v39 = vmul.f32 %v6768_v49, %v3590_v16 }
0x110e   :  { %v3609_v51 = vmul.f32 %v5685_v48, %v3607_v34 }
0x110f   :  { %v3608_v52 = vmul.f32 %v5685_v48, %v3606_v39 }
0x1110   :  { %v3611_v54 = vadd.f32 %v5686_v50, %v3609_v51 }
0x1111   :  { %v3610_v53 = vadd.f32 %v5686_v50, %v3608_v52 }
0x1113   :  { %6256 = vmatprep.mubr.msk.f32.mxu1 %vm81_vm0, %v3610_v53 }
0x1114   :  { %6257 = vmatmul.mubr.msk.f32.vlgmr.msra.gmra.mrb[44].mxu1 %vm81_vm0, %v3611_v54 }
0x1115   :  { %6557 = vmatpush3.bf16.msra.mxu1 %v6554_v30 }
0x1116   :  { %6559 = vmatprep.subr.bf16.mxu1 %v6558_v20 }
0x1119   :  { %6561 = vmatpush3.bf16.msra.mxu1 %v6558_v20 }
0x111a   :  { %6289 = vmatprep.subr.mxu1 %v6840_v26 }
0x11e7   :  { %v6258_v59 = vpop.f32.mrb[44].mxu1 }
0x11e8   :  { %v3690_v60 = vadd.f32 %v6258_v59, %v5687_v58  ;;  %v3684_v61 = vpop.f32.mrb[45].mxu1 }
0x11e9   :  { %v3685_v62 = vadd.f32 %v5687_v58, %v3684_v61 }
0x11ea   :  { %v3694_v0 = vmax.f32 %v3690_v60, 0.0 }
0x11eb   :  { %v3693_v63 = vmax.f32 %v3685_v62, 0.0 }
0x11ed   :  { %6275 = vmatprep.mubr.msk.f32.mxu0 %vm1888_vm6, %v3693_v63 }
0x11ee   :  { %6276 = vmatmul.mubr.msk.f32.vlgmr.msra.gmra.mrb[36].mxu0 %vm1888_vm6, %v3694_v0 }
0x11ef   :  { %6301 = vmatprep.mubr.msk.f32.mxu0 %vm6839_vm1, %v6840_v26 }
0x12c1   :  { %v6277_v2 = vpop.f32.mrb[36].mxu0 }
0x12c2   :  { %v3773_v3 = vadd.f32 %v6277_v2, %v5688_v1  ;;  %v3767_v4 = vpop.f32.mrb[37].mxu0 }
0x12c3   :  { %v3768_v5 = vadd.f32 %v5688_v1, %v3767_v4 }
0x12c4   :  { %v3777_v7 = vadd.f32 %v3773_v3, %v3611_v54 }
0x12c5   :  { %v3776_v8 = vadd.f32 %v3768_v5, %v3610_v53 }
0x12c6   :  { %v3781_v9 = vsel %vm81_vm0, %v3777_v7, 0.0 }
0x12c7   :  { %3782 = vadd.xlane.f32.xlu1 %v3781_v9  ;;  %v3778_v11 = vsel %vm81_vm0, %v3776_v8, 0.0 }
0x12c8   :  { %3779 = vadd.xlane.f32.xlu0 %v3778_v11 }
0x1354   :  { %v3783_v10 = vpop.xlane.xlu1 %3782 }
0x1355   :  { %v3785_v6 = vmul.f32 0.03125, %v3783_v10  ;;  %v3780_v36 = vpop.xlane.xlu0 %3779 }
0x1356   :  { %v3784_v33 = vmul.f32 0.03125, %v3780_v36 }
0x1357   :  { %v3787_v12 = vsub.f32 %v3777_v7, %v3785_v6 }
0x1358   :  { %v3786_v13 = vsub.f32 %v3776_v8, %v3784_v33 }
0x1359   :  { %v3789_v14 = vmul.f32 %v3787_v12, %v3787_v12 }
0x135a   :  { %v3788_v15 = vmul.f32 %v3786_v13, %v3786_v13 }
0x135b   :  { %v3793_v16 = vsel %vm81_vm0, %v3789_v14, 0.0 }
0x135c   :  { %3794 = vadd.xlane.f32.xlu1 %v3793_v16  ;;  %v3790_v17 = vsel %vm81_vm0, %v3788_v15, 0.0 }
0x135d   :  { %3791 = vadd.xlane.f32.xlu0 %v3790_v17 }
0x13e9   :  { %v3795_v21 = vpop.xlane.xlu1 %3794 }
0x13ea   :  { %v3797_v22 = vmul.f32 0.03125, %v3795_v21  ;;  %v3792_v24 = vpop.xlane.xlu0 %3791 }
0x13eb   :  { %v3796_v25 = vmul.f32 0.03125, %v3792_v24 }
0x13ec   :  { %v3799_v27 = vadd.f32 1e-05, %v3797_v22 }
0x13ed   :  { %v3798_v28 = vadd.f32 1e-05, %v3796_v25 }
0x13ee   :  { %6769 = vrsqrt.f32 %v3799_v27 }
0x13ef   :  { %6771 = vrsqrt.f32 %v3798_v28 }
0x13f8   :  { %v6770_v31 = vpop.eup %6769 }
0x13f9   :  { %v6772_v35 = vpop.eup %6771  ;;  %v3803_v37 = vmul.f32 %v6770_v31, %v3787_v12 }
0x13fa   :  { %v3802_v38 = vmul.f32 %v6772_v35, %v3786_v13 }
0x13fb   :  { %v3805_v41 = vmul.f32 %v5689_v32, %v3803_v37 }
0x13fc   :  { %v3804_v42 = vmul.f32 %v5689_v32, %v3802_v38 }
0x13fd   :  { %v7482_v44 = vadd.f32 %v5690_v40, %v3805_v41 }
0x13fe   :  { %v7480_v43 = vadd.f32 %v5690_v40, %v3804_v42 }
0x1400   :  { %6286 = vmatprep.mubr.msk.f32.mxu1 %vm81_vm0, %v7480_v43 }
0x1401   :  { %6287 = vmatmul.mubr.msk.f32.vlgmr.msra.gmra.mrb[46].mxu1 %vm81_vm0, %v7482_v44 }
0x1402   :  { %6291 = vmatprep.mubr.msk.f32.mxu1 %vm6839_vm1, %v6840_v26 }
0x14d4   :  { %v6288_v46 = vpop.f32.mrb[46].mxu1 }
0x14d5   :  { %v7493_v47 = vadd.f32 %v6288_v46, %v5731_v45  ;;  %v3940_v48 = vpop.f32.mrb[47].mxu1 }
0x14d6   :  { %v7499_v49 = vadd.f32 %v5731_v45, %v3940_v48 }
0x14d7   :  { %4186 = vrot.lane.b32.xlu0 %v7493_v47, %s6844_s9  ;;  %4028 = vrot.lane.b32.xlu1 %v7493_v47, %s6837_s22 }
0x14db   :  { %4107 = vrot.lane.b32.xlu1 %v7499_v49, %s6844_s9  ;;  %3950 = vrot.lane.b32.xlu0 %v7499_v49, %s6837_s22 }
0x14df   :  { %4105 = vrot.lane.b32.xlu1 %v7499_v49, %s6841_s1  ;;  %4184 = vrot.lane.b32.xlu0 %v7493_v47, %s6841_s1 }
0x14e3   :  { %4265 = vrot.lane.b32.xlu1 %v7499_v49, %s6845_s10  ;;  %4344 = vrot.lane.b32.xlu0 %v7493_v47, %s6845_s10 }
0x14e7   :  { %4263 = vrot.lane.b32.xlu1 %v7499_v49, %s6842_s7  ;;  %4342 = vrot.lane.b32.xlu0 %v7493_v47, %s6842_s7 }
0x14eb   :  { %4423 = vrot.lane.b32.xlu1 %v7499_v49, %s6846_s11  ;;  %4502 = vrot.lane.b32.xlu0 %v7493_v47, %s6846_s11 }
0x14ef   :  { %4421 = vrot.lane.b32.xlu1 %v7499_v49, %s6843_s8  ;;  %4500 = vrot.lane.b32.xlu0 %v7493_v47, %s6843_s8 }
0x1549   :  { %v4187_v34 = vpop.permute.xlu0 %4186  ;;  %v4029_v39 = vpop.permute.xlu1 %4028 }
0x154d   :  { %v4108_v50 = vpop.permute.xlu1 %4107  ;;  %v3951_v51 = vpop.permute.xlu0 %3950 }
0x154e   :  { %6290 = vmatpush3.xpose.msk.msra.mxu1 %vm280_vm2, %v3951_v51  ;;  %6300 = vmatpush3.xpose.msk.msra.mxu0 %vm280_vm2, %v4108_v50 }
0x154f   :  { %6294 = vmatprep.subr.mxu1 %v6840_v26  ;;  %6309 = vmatprep.subr.mxu0 %v6840_v26 }
0x1551   :  { %v4106_v52 = vpop.permute.xlu1 %4105  ;;  %6292 = vmatmul.mubr.msk.f32.vlgmr.msra.gmra.mrb[48].mxu1 %vm280_vm2, %v7499_v49  ;;  %v4185_v53 = vpop.permute.xlu0 %4184 }
0x1552   :  { %6295 = vmatpush3.xpose.msk.msra.mxu1 %vm280_vm2, %v4029_v39  ;;  %6302 = vmatmul.mubr.msk.f32.vlgmr.msra.gmra.mrb[38].mxu0 %vm280_vm2, %v4106_v52 }
0x1553   :  { %6296 = vmatprep.mubr.msk.f32.mxu1 %vm6839_vm1, %v6840_v26  ;;  %6304 = vmatprep.subr.mxu1 %v6840_v26 }
0x1554   :  { %6311 = vmatprep.mubr.msk.f32.mxu0 %vm6839_vm1, %v6840_v26 }
0x1555   :  { %v4266_v54 = vpop.permute.xlu1 %4265  ;;  %6297 = vmatmul.mubr.msk.f32.vlgmr.msra.gmra.mrb[50].mxu1 %vm280_vm2, %v7493_v47  ;;  %v4345_v56 = vpop.permute.xlu0 %4344 }
0x1556   :  { %6305 = vmatpush3.xpose.msk.msra.mxu1 %vm280_vm2, %v4187_v34  ;;  %6310 = vmatpush3.xpose.msk.msra.mxu0 %vm280_vm2, %v4266_v54 }
0x1557   :  { %6306 = vmatprep.mubr.msk.f32.mxu1 %vm6839_vm1, %v6840_v26  ;;  %6314 = vmatprep.subr.mxu1 %v6840_v26 }
0x1558   :  { %6319 = vmatprep.subr.mxu0 %v6840_v26 }
0x1559   :  { %v4264_v55 = vpop.permute.xlu1 %4263  ;;  %6307 = vmatmul.mubr.msk.f32.vlgmr.msra.gmra.mrb[52].mxu1 %vm280_vm2, %v4185_v53  ;;  %v4343_v57 = vpop.permute.xlu0 %4342 }
0x155a   :  { %6312 = vmatmul.mubr.msk.f32.vlgmr.msra.gmra.mrb[40].mxu0 %vm280_vm2, %v4264_v55  ;;  %6315 = vmatpush3.xpose.msk.msra.mxu1 %vm280_vm2, %v4345_v56 }
0x155b   :  { %6316 = vmatprep.mubr.msk.f32.mxu1 %vm6839_vm1, %v6840_v26  ;;  %6324 = vmatprep.subr.mxu1 %v6840_v26 }
0x155c   :  { %6321 = vmatprep.mubr.msk.f32.mxu0 %vm6839_vm1, %v6840_v26 }
0x155d   :  { %v4424_v58 = vpop.permute.xlu1 %4423  ;;  %6317 = vmatmul.mubr.msk.f32.vlgmr.msra.gmra.mrb[54].mxu1 %vm280_vm2, %v4343_v57  ;;  %v4503_v59 = vpop.permute.xlu0 %4502 }
0x155e   :  { %6320 = vmatpush3.xpose.msk.msra.mxu0 %vm280_vm2, %v4424_v58  ;;  %6325 = vmatpush3.xpose.msk.msra.mxu1 %vm280_vm2, %v4503_v59 }
0x155f   :  { %6326 = vmatprep.mubr.msk.f32.mxu1 %vm6839_vm1, %v6840_v26  ;;  %6329 = vmatprep.subr.mxu0 %v6840_v26 }
0x1560   :  { %6334 = vmatprep.subr.mxu1 %v6840_v26 }
0x1561   :  { %v4422_v60 = vpop.permute.xlu1 %4421  ;;  %v4501_v61 = vpop.permute.xlu0 %4500 }
0x1562   :  { %6322 = vmatmul.mubr.msk.f32.vlgmr.msra.gmra.mrb[42].mxu0 %vm280_vm2, %v4422_v60  ;;  %6327 = vmatmul.mubr.msk.f32.vlgmr.msra.gmra.mrb[56].mxu1 %vm280_vm2, %v4501_v61 }
0x1563   :  { %6331 = vmatprep.mubr.msk.f32.mxu0 %vm6839_vm1, %v6840_v26  ;;  %6336 = vmatprep.mubr.msk.f32.mxu1 %vm6839_vm1, %v6840_v26 }
0x1624   :  { %v4022_v62 = vpop.f32.mrb[48].mxu1 }
0x1625   :  { %v4026_v63 = vmul.f32 0.35355338, %v4022_v62  ;;  %v6293_v0 = vpop.f32.mrb[49].mxu1  ;;  %v4179_v1 = vpop.f32.mrb[38].mxu0 }
0x1626   :  { %v6303_v2 = vpop.f32.mrb[39].mxu0  ;;  %v4183_v8 = vmul.f32 0.35355338, %v4179_v1 }
0x1627   :  { %v4579_v3 = vsel %vm280_vm2, %v4026_v63, -inf }
0x1628   :  { %4580 = vmax.xlane.f32.xlu1 %v4579_v3  ;;  %v4100_v4 = vpop.f32.mrb[50].mxu1  ;;  %v4585_v13 = vsel %vm280_vm2, %v4183_v8, -inf }
0x1629   :  { %v4104_v5 = vmul.f32 0.35355338, %v4100_v4  ;;  %v6298_v7 = vpop.f32.mrb[51].mxu1 }
0x162b   :  { %v4582_v9 = vsel %vm280_vm2, %v4104_v5, -inf }
0x162c   :  { %4583 = vmax.xlane.f32.xlu0 %v4582_v9  ;;  %v4258_v11 = vpop.f32.mrb[52].mxu1 }
0x162d   :  { %v4262_v10 = vmul.f32 0.35355338, %v4258_v11  ;;  %v6308_v6 = vpop.f32.mrb[53].mxu1  ;;  %v4337_v36 = vpop.f32.mrb[40].mxu0 }
0x162e   :  { %v6313_v33 = vpop.f32.mrb[41].mxu0  ;;  %v4341_v12 = vmul.f32 0.35355338, %v4337_v36 }
0x162f   :  { %v4588_v14 = vsel %vm280_vm2, %v4262_v10, -inf }
0x1630   :  { %4586 = vmax.xlane.f32.xlu0 %v4585_v13  ;;  %4589 = vmax.xlane.f32.xlu1 %v4588_v14  ;;  %v4416_v15 = vpop.f32.mrb[54].mxu1  ;;  %v4591_v23 = vsel %vm280_vm2, %v4341_v12, -inf }
0x1631   :  { %v4420_v16 = vmul.f32 0.35355338, %v4416_v15  ;;  %v6318_v17 = vpop.f32.mrb[55].mxu1 }
0x1633   :  { %v4594_v18 = vsel %vm280_vm2, %v4420_v16, -inf }
0x1634   :  { %4592 = vmax.xlane.f32.xlu0 %v4591_v23  ;;  %4595 = vmax.xlane.f32.xlu1 %v4594_v18 }
0x1635   :  { %v4495_v30 = vpop.f32.mrb[42].mxu0  ;;  %v4574_v29 = vpop.f32.mrb[56].mxu1 }
0x1636   :  { %v4499_v19 = vmul.f32 0.35355338, %v4495_v30  ;;  %v4578_v20 = vmul.f32 0.35355338, %v4574_v29  ;;  %v6323_v21 = vpop.f32.mrb[43].mxu0  ;;  %v6328_v22 = vpop.f32.mrb[57].mxu1 }
0x1638   :  { %v4597_v24 = vsel %vm280_vm2, %v4499_v19, -inf  ;;  %v4600_v25 = vsel %vm280_vm2, %v4578_v20, -inf }
0x1639   :  { %4598 = vmax.xlane.f32.xlu0 %v4597_v24  ;;  %4601 = vmax.xlane.f32.xlu1 %v4600_v25 }
0x164a   :  { %4743 = vrot.lane.b32.xlu1 %v7493_v47, %s6850_s6 }
0x164e   :  { %4819 = vrot.lane.b32.xlu1 %v7499_v49, %s6851_s12 }
0x164f   :  { %4667 = vrot.lane.b32.xlu0 %v7499_v49, %s6850_s6 }
0x1652   :  { %4971 = vrot.lane.b32.xlu1 %v7499_v49, %s6852_s13 }
0x1653   :  { %4895 = vrot.lane.b32.xlu0 %v7493_v47, %s6851_s12 }
0x1657   :  { %5047 = vrot.lane.b32.xlu0 %v7493_v47, %s6852_s13 }
0x16b5   :  { %v4581_v27 = vpop.xlane.xlu1 %4580 }
0x16b6   :  { %v4603_v28 = vsub.f32 %v4026_v63, %v4581_v27 }
0x16b8   :  { %v4611_v31 = vmul.f32 1.442695, %v4603_v28 }
0x16b9   :  { %v4584_v32 = vpop.xlane.xlu0 %4583 }
0x16ba   :  { %6773 = vpow2.f32 %v4611_v31  ;;  %v4604_v35 = vsub.f32 %v4104_v5, %v4584_v32 }
0x16bc   :  { %v4613_v37 = vmul.f32 1.442695, %v4604_v35 }
0x16bd   :  { %v4590_v38 = vpop.xlane.xlu1 %4589  ;;  %v4587_v40 = vpop.xlane.xlu0 %4586 }
0x16be   :  { %6775 = vpow2.f32 %v4613_v37  ;;  %v4606_v41 = vsub.f32 %v4262_v10, %v4590_v38  ;;  %v4605_v42 = vsub.f32 %v4183_v8, %v4587_v40 }
0x16c0   :  { %v4617_v45 = vmul.f32 1.442695, %v4606_v41  ;;  %v4615_v46 = vmul.f32 1.442695, %v4605_v42 }
0x16c1   :  { %v4596_v48 = vpop.xlane.xlu1 %4595  ;;  %v4593_v34 = vpop.xlane.xlu0 %4592 }
0x16c2   :  { %6777 = vpow2.f32 %v4617_v45  ;;  %v4608_v39 = vsub.f32 %v4420_v16, %v4596_v48  ;;  %v4607_v50 = vsub.f32 %v4341_v12, %v4593_v34  ;;  %v3813_v48 = vld [vmem:[%s7747_s2 + $0x178] sm:$0xff] }
0x16c3   :  { %6779 = vpow2.f32 %v4615_v46  ;;  %v3812_v46 = vld [vmem:[%s7747_s2 + $0x170] sm:$0xff] }
0x16c4   :  { %v6774_v51 = vpop.eup %6773  ;;  %v4621_v52 = vmul.f32 1.442695, %v4608_v39  ;;  %v4619_v53 = vmul.f32 1.442695, %v4607_v50  ;;  %v6562_v34 = vpack.c.bf16 %v3813_v48, %v3812_v46  ;;  %v3824_v48 = vld [vmem:[%s7747_s2 + $0x1d0] sm:$0xff] }
0x16c5   :  { %v4627_v54 = vsel %vm280_vm2, %v6774_v51, 0.0 }
0x16c6   :  { %6781 = vpow2.f32 %v4621_v52  ;;  %4628 = vadd.xlane.f32.xlu0 %v4627_v54  ;;  %v4602_v56 = vpop.xlane.xlu1 %4601  ;;  %v4599_v55 = vpop.xlane.xlu0 %4598 }
0x16c7   :  { %6783 = vpow2.f32 %v4619_v53  ;;  %v4610_v57 = vsub.f32 %v4578_v20, %v4602_v56  ;;  %v4609_v58 = vsub.f32 %v4499_v19, %v4599_v55 }
0x16c8   :  { %v6776_v59 = vpop.eup %6775 }
0x16c9   :  { %v4625_v60 = vmul.f32 1.442695, %v4610_v57  ;;  %v4623_v61 = vmul.f32 1.442695, %v4609_v58  ;;  %v4630_v62 = vsel %vm280_vm2, %v6776_v59, 0.0 }
0x16ca   :  { %v4744_v63 = vpop.permute.xlu1 %4743  ;;  %4631 = vadd.xlane.f32.xlu1 %v4630_v62  ;;  %v4668_v0 = vpop.permute.xlu0 %4667 }
0x16cb   :  { %6785 = vpow2.f32 %v4625_v60  ;;  %6330 = vmatpush3.msra.mxu0 %v4668_v0  ;;  %6335 = vmatpush3.msra.mxu1 %v4744_v63 }
0x16cc   :  { %v6778_v1 = vpop.eup %6777  ;;  %6787 = vpow2.f32 %v4623_v61  ;;  %6339 = vmatprep.subr.mxu0 %v6840_v26  ;;  %6344 = vmatprep.subr.mxu1 %v6840_v26 }
0x16cd   :  { %v6780_v2 = vpop.eup %6779  ;;  %v4636_v3 = vsel %vm280_vm2, %v6778_v1, 0.0 }
0x16ce   :  { %4637 = vadd.xlane.f32.xlu1 %v4636_v3  ;;  %v4633_v4 = vsel %vm280_vm2, %v6780_v2, 0.0  ;;  %v4896_v33 = vpop.permute.xlu0 %4895  ;;  %v4820_v12 = vpop.permute.xlu1 %4819 }
0x16cf   :  { %4634 = vadd.xlane.f32.xlu0 %v4633_v4 }
0x16d0   :  { %v6782_v5 = vpop.eup %6781 }
0x16d1   :  { %v6784_v7 = vpop.eup %6783  ;;  %v4642_v8 = vsel %vm280_vm2, %v6782_v5, 0.0 }
0x16d2   :  { %4643 = vadd.xlane.f32.xlu1 %v4642_v8  ;;  %v4639_v9 = vsel %vm280_vm2, %v6784_v7, 0.0  ;;  %v5048_v13 = vpop.permute.xlu0 %5047  ;;  %v4972_v14 = vpop.permute.xlu1 %4971 }
0x16d3   :  { %4640 = vadd.xlane.f32.xlu0 %v4639_v9 }
0x16d5   :  { %v7595_v11 = vpop.eup %6785 }
0x16d6   :  { %v7597_v10 = vpop.eup %6787  ;;  %v4648_v6 = vsel %vm280_vm2, %v7595_v11, 0.0 }
0x16d7   :  { %4649 = vadd.xlane.f32.xlu1 %v4648_v6  ;;  %v4645_v36 = vsel %vm280_vm2, %v7597_v10, 0.0 }
0x16d8   :  { %4646 = vadd.xlane.f32.xlu0 %v4645_v36 }
0x16e8   :  { %5123 = vrot.lane.b32.xlu1 %v7499_v49, %s6853_s14 }
0x16ee   :  { %5199 = vrot.lane.b32.xlu0 %v7493_v47, %s6853_s14 }
0x1753   :  { %v4629_v15 = vpop.xlane.xlu0 %4628 }
0x1754   :  { %6789 = vrcp.f32 %v4629_v15 }
0x1757   :  { %v4632_v16 = vpop.xlane.xlu1 %4631 }
0x1758   :  { %6791 = vrcp.f32 %v4632_v16 }
0x175b   :  { %v4638_v17 = vpop.xlane.xlu1 %4637 }
0x175c   :  { %6793 = vrcp.f32 %v4638_v17  ;;  %v4635_v23 = vpop.xlane.xlu0 %4634 }
0x175d   :  { %6795 = vrcp.f32 %v4635_v23 }
0x175e   :  { %v6790_v18 = vpop.eup %6789 }
0x175f   :  { %v4659_v30 = vmul.f32 %v6790_v18, %v6774_v51  ;;  %v4644_v29 = vpop.xlane.xlu1 %4643  ;;  %v3815_v51 = vld [vmem:[%s7747_s2 + $0x188] sm:$0xff] }
0x1760   :  { %6797 = vrcp.f32 %v4644_v29  ;;  %v4641_v49 = vpop.xlane.xlu0 %4640 }
0x1761   :  { %6799 = vrcp.f32 %v4641_v49  ;;  %6332 = vmatmul.mubr.msk.f32.vlgmr.msra.gmra.mrb[44].mxu0 %vm280_vm2, %v4659_v30 }
0x1762   :  { %v6792_v47 = vpop.eup %6791  ;;  %6340 = vmatpush3.msra.mxu0 %v4820_v12  ;;  %6341 = vmatprep.mubr.msk.f32.mxu0 %vm6839_vm1, %v6840_v26 }
0x1763   :  { %v4660_v19 = vmul.f32 %v6792_v47, %v6776_v59  ;;  %6349 = vmatprep.subr.mxu0 %v6840_v26 }
0x1764   :  { %v4650_v20 = vpop.xlane.xlu1 %4649 }
0x1765   :  { %6801 = vrcp.f32 %v4650_v20  ;;  %v4647_v21 = vpop.xlane.xlu0 %4646  ;;  %6337 = vmatmul.mubr.msk.f32.vlgmr.msra.gmra.mrb[58].mxu1 %vm280_vm2, %v4660_v19 }
0x1766   :  { %v6794_v22 = vpop.eup %6793  ;;  %6803 = vrcp.f32 %v4647_v21  ;;  %6345 = vmatpush3.msra.mxu1 %v4896_v33  ;;  %6346 = vmatprep.mubr.msk.f32.mxu1 %vm6839_vm1, %v6840_v26 }
0x1767   :  { %v6796_v24 = vpop.eup %6795  ;;  %v4662_v25 = vmul.f32 %v6794_v22, %v6778_v1  ;;  %6354 = vmatprep.subr.mxu1 %v6840_v26 }
0x1768   :  { %v4661_v27 = vmul.f32 %v6796_v24, %v6780_v2  ;;  %v5124_v38 = vpop.permute.xlu1 %5123 }
0x1769   :  { %6347 = vmatmul.mubr.msk.f32.vlgmr.msra.gmra.mrb[60].mxu1 %vm280_vm2, %v4662_v25  ;;  %v5200_v37 = vpop.permute.xlu0 %5199 }
0x176a   :  { %v6798_v28 = vpop.eup %6797  ;;  %6342 = vmatmul.mubr.msk.f32.vlgmr.msra.gmra.mrb[46].mxu0 %vm280_vm2, %v4661_v27  ;;  %6355 = vmatpush3.msra.mxu1 %v5048_v13  ;;  %v5724_v13 = vld [vmem:[%s7747_s2 + $0x1f1] ss:$0 sm:$0xff] }
0x176b   :  { %v6800_v31 = vpop.eup %6799  ;;  %v4664_v32 = vmul.f32 %v6798_v28, %v6782_v5  ;;  %6350 = vmatpush3.msra.mxu0 %v4972_v14  ;;  %6351 = vmatprep.mubr.msk.f32.mxu0 %vm6839_vm1, %v6840_v26  ;;  %v3817_v28 = vld [vmem:[%s7747_s2 + $0x198] sm:$0xff] }
0x176c   :  { %v4663_v35 = vmul.f32 %v6800_v31, %v6784_v7  ;;  %6356 = vmatprep.mubr.msk.f32.mxu1 %vm6839_vm1, %v6840_v26  ;;  %6359 = vmatprep.subr.mxu0 %v6840_v26 }
0x176d   :  { %6364 = vmatprep.subr.mxu1 %v6840_v26  ;;  %6357 = vmatmul.mubr.msk.f32.vlgmr.msra.gmra.mrb[62].mxu1 %vm280_vm2, %v4664_v32  ;;  %v3818_v32 = vld [vmem:[%s7747_s2 + $0x1a0] sm:$0xff] }
0x176e   :  { %6352 = vmatmul.mubr.msk.f32.vlgmr.msra.gmra.mrb[48].mxu0 %vm280_vm2, %v4663_v35  ;;  %6365 = vmatpush3.msra.mxu1 %v5200_v37  ;;  %v3819_v35 = vld [vmem:[%s7747_s2 + $0x1a8] sm:$0xff] }
0x176f   :  { %v6802_v40 = vpop.eup %6801  ;;  %6360 = vmatpush3.msra.mxu0 %v5124_v38  ;;  %6361 = vmatprep.mubr.msk.f32.mxu0 %vm6839_vm1, %v6840_v26  ;;  %v6574_v37 = vpack.c.bf16 %v3819_v35, %v3818_v32  ;;  %v3820_v38 = vld [vmem:[%s7747_s2 + $0x1b0] sm:$0xff] }
0x1770   :  { %v6804_v41 = vpop.eup %6803  ;;  %v4666_v42 = vmul.f32 %v6802_v40, %v7595_v11  ;;  %6366 = vmatprep.mubr.msk.f32.mxu1 %vm6839_vm1, %v6840_v26  ;;  %6563 = vmatprep.subr.bf16.mxu0 %v6562_v34  ;;  %v3814_v26 = vld [vmem:[%s7747_s2 + $0x180] sm:$0xff]  ;;  %v3821_v40 = vld [vmem:[%s7747_s2 + $0x1b8] sm:$0xff]  ;;  %v5729_v32 = vld [vmem:[%s7747_s2 + $0x1f6] ss:$0 sm:$0xff] }
0x1771   :  { %v4665_v45 = vmul.f32 %v6804_v41, %v7597_v10  ;;  %v6566_v52 = vpack.c.bf16 %v3815_v51, %v3814_v26  ;;  %v3822_v41 = vld [vmem:[%s7747_s2 + $0x1c0] sm:$0xff] }
0x1772   :  { %6367 = vmatmul.mubr.msk.f32.vlgmr.msra.gmra.mrb[64].mxu1 %vm280_vm2, %v4666_v42  ;;  %v6578_v42 = vpack.c.bf16 %v3821_v40, %v3820_v38  ;;  %v5730_v40 = vld [vmem:[%s7747_s2 + $0x1f7] ss:$0 sm:$0xff] }
0x1773   :  { %6362 = vmatmul.mubr.msk.f32.vlgmr.msra.gmra.mrb[50].mxu0 %vm280_vm2, %v4665_v45  ;;  %v3823_v45 = vld [vmem:[%s7747_s2 + $0x1c8] sm:$0xff] }
0x1774   :  { %6565 = vmatpush3.bf16.msra.mxu0 %v6562_v34  ;;  %v6582_v46 = vpack.c.bf16 %v3823_v45, %v3822_v41  ;;  %v3825_v34 = vld [vmem:[%s7747_s2 + $0x1d8] sm:$0xff] }
0x1775   :  { %6567 = vmatprep.subr.bf16.mxu0 %v6566_v52 }
0x1778   :  { %6569 = vmatpush3.bf16.msra.mxu0 %v6566_v52 }
0x1779   :  { %6579 = vmatprep.subr.bf16.mxu0 %v6578_v42 }
0x1834   :  { %v4739_v39 = vpop.f32.mrb[44].mxu0 }
0x1835   :  { %v6333_v50 = vpop.f32.mrb[45].mxu0 }
0x1838   :  { %v4815_v53 = vpop.f32.mrb[58].mxu1 }
0x1839   :  { %v6338_v54 = vpop.f32.mrb[59].mxu1 }
0x183c   :  { %v4967_v56 = vpop.f32.mrb[60].mxu1 }
0x183d   :  { %v4891_v55 = vpop.f32.mrb[46].mxu0  ;;  %5279 = vrot.lane.b32.xlu0 %v4967_v56, %s6847_s18  ;;  %v6348_v57 = vpop.f32.mrb[61].mxu1 }
0x183e   :  { %5277 = vrot.lane.b32.xlu1 %v4891_v55, %s6847_s18  ;;  %v6343_v58 = vpop.f32.mrb[47].mxu0  ;;  %v5725_v55 = vld [vmem:[%s7747_s2 + $0x1f2] ss:$0 sm:$0xff] }
0x1840   :  { %v5119_v59 = vpop.f32.mrb[62].mxu1 }
0x1841   :  { %v5043_v60 = vpop.f32.mrb[48].mxu0  ;;  %5287 = vrot.lane.b32.xlu0 %v5119_v59, %s6848_s21  ;;  %v6358_v61 = vpop.f32.mrb[63].mxu1 }
0x1842   :  { %5285 = vrot.lane.b32.xlu1 %v5043_v60, %s6848_s21  ;;  %v6353_v62 = vpop.f32.mrb[49].mxu0  ;;  %v5726_v60 = vld [vmem:[%s7747_s2 + $0x1f3] ss:$0 sm:$0xff] }
0x1845   :  { %v5271_v63 = vpop.f32.mrb[64].mxu1 }
0x1846   :  { %v5195_v0 = vpop.f32.mrb[50].mxu0  ;;  %5295 = vrot.lane.b32.xlu0 %v5271_v63, %s6849_s23  ;;  %v6368_v1 = vpop.f32.mrb[65].mxu1 }
0x1847   :  { %5293 = vrot.lane.b32.xlu1 %v5195_v0, %s6849_s23  ;;  %v6363_v2 = vpop.f32.mrb[51].mxu0  ;;  %v3826_v1 = vld [vmem:[%s7747_s2 + $0x1e0] sm:$0xff] }
0x1848   :  { %v3827_v2 = vld [vmem:[%s7747_s2 + $0x1e8] sm:$0xff] }
0x18af   :  { %v5280_v3 = vpop.permute.xlu0 %5279 }
0x18b0   :  { %v5278_v4 = vpop.permute.xlu1 %5277  ;;  %v5300_v8 = vsel %vm280_vm2, %v4815_v53, %v5280_v3  ;;  %v6590_v3 = vpack.c.bf16 %v3827_v2, %v3826_v1 }
0x18b1   :  { %v5299_v9 = vsel %vm280_vm2, %v4739_v39, %v5278_v4  ;;  %v6586_v39 = vpack.c.bf16 %v3825_v34, %v3824_v48  ;;  %v5727_v4 = vld [vmem:[%s7747_s2 + $0x1f4] ss:$0 sm:$0xff] }
0x18b3   :  { %v5288_v5 = vpop.permute.xlu0 %5287 }
0x18b4   :  { %v5286_v7 = vpop.permute.xlu1 %5285  ;;  %v5302_v11 = vsel %vm939_vm4, %v5300_v8, %v5288_v5 }
0x18b5   :  { %v5301_v6 = vsel %vm939_vm4, %v5299_v9, %v5286_v7 }
0x18b8   :  { %v5296_v10 = vpop.permute.xlu0 %5295 }
0x18b9   :  { %v5294_v36 = vpop.permute.xlu1 %5293  ;;  %v5304_v33 = vsel %vm1688_vm5, %v5302_v11, %v5296_v10 }
0x18ba   :  { %v5303_v12 = vsel %vm1688_vm5, %v5301_v6, %v5294_v36  ;;  %v5728_v6 = vld [vmem:[%s7747_s2 + $0x1f5] ss:$0 sm:$0xff] }
0x18bb   :  { %6377 = vmatprep.mubr.msk.f32.mxu0 %vm81_vm0, %v5303_v12 }
0x18bc   :  { %6378 = vmatmul.mubr.msk.f32.vlgmr.msra.gmra.mrb[52].mxu0 %vm81_vm0, %v5304_v33 }
0x18bd   :  { %6581 = vmatpush3.bf16.msra.mxu0 %v6578_v42 }
0x18be   :  { %6583 = vmatprep.subr.bf16.mxu0 %v6582_v46 }
0x18c1   :  { %6585 = vmatpush3.bf16.msra.mxu0 %v6582_v46 }
0x18c2   :  { %6587 = vmatprep.subr.bf16.mxu0 %v6586_v39 }
0x18c5   :  { %6589 = vmatpush3.bf16.msra.mxu0 %v6586_v39 }
0x18c6   :  { %6591 = vmatprep.subr.bf16.mxu0 %v6590_v3 }
0x18c9   :  { %6593 = vmatpush3.bf16.msra.mxu0 %v6590_v3 }
0x198f   :  { %v6379_v14 = vpop.f32.mrb[52].mxu0 }
0x1990   :  { %v5383_v15 = vadd.f32 %v6379_v14, %v5724_v13  ;;  %v5377_v16 = vpop.f32.mrb[53].mxu0 }
0x1991   :  { %v5378_v17 = vadd.f32 %v5724_v13, %v5377_v16 }
0x1992   :  { %v5387_v23 = vadd.f32 %v5383_v15, %v7482_v44 }
0x1993   :  { %v5386_v18 = vadd.f32 %v5378_v17, %v7480_v43  ;;  %v3816_v43 = vld [vmem:[%s7747_s2 + $0x190] sm:$0xff] }
0x1994   :  { %v5391_v30 = vsel %vm81_vm0, %v5387_v23, 0.0  ;;  %v6570_v31 = vpack.c.bf16 %v3817_v28, %v3816_v43 }
0x1995   :  { %5392 = vadd.xlane.f32.xlu0 %v5391_v30  ;;  %v5388_v29 = vsel %vm81_vm0, %v5386_v18, 0.0 }
0x1996   :  { %5389 = vadd.xlane.f32.xlu1 %v5388_v29  ;;  %6571 = vmatprep.subr.bf16.mxu1 %v6570_v31 }
0x1997   :  { %6573 = vmatpush3.bf16.msra.mxu1 %v6570_v31 }
0x1998   :  { %6575 = vmatprep.subr.bf16.mxu1 %v6574_v37 }
0x199b   :  { %6577 = vmatpush3.bf16.msra.mxu1 %v6574_v37 }
0x1a22   :  { %v5393_v49 = vpop.xlane.xlu0 %5392 }
0x1a23   :  { %v5395_v47 = vmul.f32 0.03125, %v5393_v49  ;;  %v5390_v19 = vpop.xlane.xlu1 %5389 }
0x1a24   :  { %v5394_v20 = vmul.f32 0.03125, %v5390_v19 }
0x1a25   :  { %v5397_v21 = vsub.f32 %v5387_v23, %v5395_v47 }
0x1a26   :  { %v5396_v22 = vsub.f32 %v5386_v18, %v5394_v20 }
0x1a27   :  { %v5399_v24 = vmul.f32 %v5397_v21, %v5397_v21 }
0x1a28   :  { %v5398_v25 = vmul.f32 %v5396_v22, %v5396_v22 }
0x1a29   :  { %v5403_v27 = vsel %vm81_vm0, %v5399_v24, 0.0 }
0x1a2a   :  { %5404 = vadd.xlane.f32.xlu1 %v5403_v27  ;;  %v5400_v44 = vsel %vm81_vm0, %v5398_v25, 0.0 }
0x1a2b   :  { %5401 = vadd.xlane.f32.xlu0 %v5400_v44 }
0x1ab7   :  { %v5405_v50 = vpop.xlane.xlu1 %5404 }
0x1ab8   :  { %v5407_v26 = vmul.f32 0.03125, %v5405_v50  ;;  %v5402_v51 = vpop.xlane.xlu0 %5401 }
0x1ab9   :  { %v5406_v52 = vmul.f32 0.03125, %v5402_v51 }
0x1aba   :  { %v5409_v53 = vadd.f32 1e-05, %v5407_v26 }
0x1abb   :  { %v5408_v54 = vadd.f32 1e-05, %v5406_v52 }
0x1abc   :  { %6805 = vrsqrt.f32 %v5409_v53 }
0x1abd   :  { %6807 = vrsqrt.f32 %v5408_v54 }
0x1ac6   :  { %v6806_v56 = vpop.eup %6805 }
0x1ac7   :  { %v6808_v57 = vpop.eup %6807  ;;  %v5413_v58 = vmul.f32 %v6806_v56, %v5397_v21 }
0x1ac8   :  { %v5412_v59 = vmul.f32 %v6808_v57, %v5396_v22 }
0x1ac9   :  { %v5415_v61 = vmul.f32 %v5725_v55, %v5413_v58 }
0x1aca   :  { %v5414_v62 = vmul.f32 %v5725_v55, %v5412_v59 }
0x1acb   :  { %v5417_v0 = vadd.f32 %v5726_v60, %v5415_v61 }
0x1acc   :  { %v5416_v63 = vadd.f32 %v5726_v60, %v5414_v62 }
0x1ace   :  { %6388 = vmatprep.mubr.msk.f32.mxu1 %vm81_vm0, %v5416_v63 }
0x1acf   :  { %6389 = vmatmul.mubr.msk.f32.vlgmr.msra.gmra.mrb[66].mxu1 %vm81_vm0, %v5417_v0 }
0x1ba2   :  { %v6390_v5 = vpop.f32.mrb[66].mxu1 }
0x1ba3   :  { %v5496_v7 = vadd.f32 %v6390_v5, %v5727_v4  ;;  %v5490_v8 = vpop.f32.mrb[67].mxu1 }
0x1ba4   :  { %v5491_v9 = vadd.f32 %v5727_v4, %v5490_v8 }
0x1ba5   :  { %v5500_v10 = vmax.f32 %v5496_v7, 0.0 }
0x1ba6   :  { %v5499_v11 = vmax.f32 %v5491_v9, 0.0 }
0x1ba8   :  { %6407 = vmatprep.mubr.msk.f32.mxu0 %vm1888_vm6, %v5499_v11 }
0x1ba9   :  { %6408 = vmatmul.mubr.msk.f32.vlgmr.msra.gmra.mrb[54].mxu0 %vm1888_vm6, %v5500_v10 }
0x1c7c   :  { %v6409_v36 = vpop.f32.mrb[54].mxu0 }
0x1c7d   :  { %v5579_v33 = vadd.f32 %v6409_v36, %v5728_v6  ;;  %v5573_v12 = vpop.f32.mrb[55].mxu0 }
0x1c7e   :  { %v5574_v13 = vadd.f32 %v5728_v6, %v5573_v12 }
0x1c7f   :  { %v5583_v14 = vadd.f32 %v5579_v33, %v5417_v0 }
0x1c80   :  { %v5582_v15 = vadd.f32 %v5574_v13, %v5416_v63 }
0x1c81   :  { %v5587_v16 = vsel %vm81_vm0, %v5583_v14, 0.0 }
0x1c82   :  { %5588 = vadd.xlane.f32.xlu1 %v5587_v16  ;;  %v5584_v17 = vsel %vm81_vm0, %v5582_v15, 0.0 }
0x1c83   :  { %5585 = vadd.xlane.f32.xlu0 %v5584_v17 }
0x1d0f   :  { %v5589_v23 = vpop.xlane.xlu1 %5588 }
0x1d10   :  { %v5591_v18 = vmul.f32 0.03125, %v5589_v23  ;;  %v5586_v30 = vpop.xlane.xlu0 %5585 }
0x1d11   :  { %v5590_v29 = vmul.f32 0.03125, %v5586_v30 }
0x1d12   :  { %v5593_v49 = vsub.f32 %v5583_v14, %v5591_v18 }
0x1d13   :  { %v5592_v47 = vsub.f32 %v5582_v15, %v5590_v29 }
0x1d14   :  { %v5595_v19 = vmul.f32 %v5593_v49, %v5593_v49 }
0x1d15   :  { %v5594_v20 = vmul.f32 %v5592_v47, %v5592_v47 }
0x1d16   :  { %v5599_v21 = vsel %vm81_vm0, %v5595_v19, 0.0 }
0x1d17   :  { %5600 = vadd.xlane.f32.xlu1 %v5599_v21  ;;  %v5596_v22 = vsel %vm81_vm0, %v5594_v20, 0.0 }
0x1d18   :  { %5597 = vadd.xlane.f32.xlu0 %v5596_v22 }
0x1da4   :  { %v5601_v24 = vpop.xlane.xlu1 %5600 }
0x1da5   :  { %v5603_v25 = vmul.f32 0.03125, %v5601_v24  ;;  %v5598_v27 = vpop.xlane.xlu0 %5597 }
0x1da6   :  { %v5602_v44 = vmul.f32 0.03125, %v5598_v27 }
0x1da7   :  { %v5605_v43 = vadd.f32 1e-05, %v5603_v25 }
0x1da8   :  { %v5604_v28 = vadd.f32 1e-05, %v5602_v44 }
0x1da9   :  { %6809 = vrsqrt.f32 %v5605_v43 }
0x1daa   :  { %6811 = vrsqrt.f32 %v5604_v28 }
0x1db3   :  { %v6810_v31 = vpop.eup %6809 }
0x1db4   :  { %v6812_v35 = vpop.eup %6811  ;;  %v5609_v37 = vmul.f32 %v6810_v31, %v5593_v49 }
0x1db5   :  { %v5608_v38 = vmul.f32 %v6812_v35, %v5592_v47 }
0x1db6   :  { %v5611_v41 = vmul.f32 %v5729_v32, %v5609_v37 }
0x1db7   :  { %v5610_v42 = vmul.f32 %v5729_v32, %v5608_v38 }
0x1db8   :  { %v5613_v45 = vadd.f32 %v5730_v40, %v5611_v41 }
0x1db9   :  { %v5612_v46 = vadd.f32 %v5730_v40, %v5610_v42 }
0x1dba   :  { %5615 = vst.msk [vmem:[#allocation2 + $0x8] sm:$0xff] %vm81_vm0, %v5613_v45 }
0x1dbb   :  { %5614 = vst.msk [vmem:[#allocation2] sm:$0xff] %vm81_vm0, %v5612_v46 }
0x1dbc   :  { %6824 = shalt.err (!%p6821_p4)
}
0x1dbd   :  { %s6825_s24 = scalar_lea.hbm %s7748_s3, 256 }
0x1dbe   :  { %p6826_p5 = scmp.ne.s32.totalorder %s7748_s3, %s6825_s24  ;;  %p6829_p6 = scmp.lt.u32.totalorder %s6825_s24, %s7748_s3 }
0x1dc0   :  { %p6831_p7 = pnand %p6829_p6, %p6826_p5 }
0x1dc2   :  { %6834 = shalt.err (!%p6831_p7)
}
0x1dc3   :  { %s6855_s0 = smov 128  }
0x1dc4   :  { %5627 = dma.vmem_to_hbm [thread:$0]  %s5622_s17, 256, %s7748_s3, [#allocation3], %s6855_s0, %s6855_s0, %s6847_s18  }
0x1dc5   :  { %6835 = dma.done.wait [#allocation3], 256  }
0x1dc6   :  { %6836 = vsyncadd [#allocation3], 4294967040 }
0x1dc7   :  { %5631 = vsyncpa [#allocation3], 1 }

</bundles_post_ra>
